<compile_context>
chip_gen: v7x
topology: tpu7x:2x2x1
jax: 0.10.0
libtpu: 0.0.40
codegen_flags: <defaults>
</compile_context>

<pallas_src>
import functools
import math

import jax
import jax.numpy as jnp
from jax.experimental import pallas as pl
from jax.experimental.pallas import tpu as pltpu

DELTA = 1e-6                                       # torchkit nn_.delta
_INV = math.log(math.exp(1.0 - DELTA) - 1.0)       # softplus^{-1}(1 - delta)
_LOG_1M_DELTA = math.log(1.0 - DELTA)


def _softplus(x):
    # stable softplus using only ops with guaranteed Mosaic lowerings
    return jnp.maximum(x, 0.0) + jnp.log(1.0 + jnp.exp(-jnp.abs(x)))


def _dsf_kernel(x_ref, dsp_ref, ldin_ref, u_ref, w_ref, xnew_ref, ldout_ref,
                *, hidden_dim, in_dim, out_dim, ld_extra):
    H, I, O, L = hidden_dim, in_dim, out_dim, ld_extra

    x = x_ref[...]            # (I, TR)        rows on lanes
    dsp = dsp_ref[...]        # (3H + I, TR)
    ld_in = ldin_ref[...]     # (I, L, TR)
    u_all = u_ref[...]        # (I, H, 1)      u_^T with trailing unit lane dim
    w_all = w_ref[...]        # (O, H, 1)

    a = _softplus(dsp[0:H, :] + _INV) + DELTA        # (H, TR)
    b = dsp[H:2 * H, :]                              # (H, TR)
    dw = dsp[2 * H:3 * H, :]                         # (H, TR)
    log_a = jnp.log(a)

    # ---- softmax over in_dim for u (I is small: unrolled) ------------------
    pre_u = [u_all[i] + dsp[3 * H + i:3 * H + i + 1, :] for i in range(I)]  # (H,TR)
    mu = pre_u[0]
    for i in range(1, I):
        mu = jnp.maximum(mu, pre_u[i])
    eu = [jnp.exp(p - mu) for p in pre_u]
    su = eu[0]
    for i in range(1, I):
        su = su + eu[i]
    log_su = jnp.log(su)
    log_u = [p - mu - log_su for p in pre_u]         # log_softmax over in_dim

    # ---- pre-sigmoid activations -------------------------------------------
    ux = eu[0] * x[0:1, :]
    for i in range(1, I):
        ux = ux + eu[i] * x[i:i + 1, :]
    ux = ux / su                                     # sum_i u[h,i] * x[i]
    pre_sigm = ux * a + b                            # (H, TR)

    sp_pos = _softplus(pre_sigm)                     # = -logsigmoid(-pre_sigm)
    sp_neg = _softplus(-pre_sigm)                    # = -logsigmoid(pre_sigm)
    sigm = jnp.exp(-sp_neg)                          # sigmoid(pre_sigm)
    sigm_c = jnp.exp(-sp_pos)                        # sigmoid(-pre_sigm) = 1 - sigm
    base = log_a - sp_pos - sp_neg                   # log(a)+logsig(x)+logsig(-x)

    # ---- per output channel o (O is small: unrolled) ------------------------
    for o in range(O):
        pre_w_o = dw + w_all[o]                      # (H, TR)
        mw = jnp.max(pre_w_o, axis=0, keepdims=True)
        ew = jnp.exp(pre_w_o - mw)
        sw = jnp.sum(ew, axis=0, keepdims=True)
        log_sw = jnp.log(sw)
        log_w_o = pre_w_o - mw - log_sw              # log_softmax over hidden

        inv_sw = 1.0 / sw
        x_pre = jnp.sum(ew * sigm, axis=0, keepdims=True) * inv_sw      # (1, TR)
        x_pre_c = jnp.sum(ew * sigm_c, axis=0, keepdims=True) * inv_sw  # 1 - x_pre
        xpc = x_pre * (1.0 - DELTA) + 0.5 * DELTA
        xpc_c = x_pre_c * (1.0 - DELTA) + 0.5 * DELTA                   # 1 - xpc (stable)
        log_xpc = jnp.log(xpc)
        log_xpc_c = jnp.log(xpc_c)                   # stable log(1 - xpc)

        xnew_ref[o:o + 1, :] = log_xpc - log_xpc_c   # logit(xpc)

        logj_o = log_w_o + base                      # (H, TR)
        ld_rows = []
        for i in range(I):
            t = logj_o + log_u[i]                    # (H, TR)
            mt = jnp.max(t, axis=0, keepdims=True)
            lse_h = mt + jnp.log(jnp.sum(jnp.exp(t - mt), axis=0, keepdims=True))
            ld_rows.append(lse_h + _LOG_1M_DELTA - log_xpc - log_xpc_c)  # (1, TR)

        # logdet_out[o, l] = logsumexp_i( logdet_[o, i] + logdet_in[i, l] )
        for l in range(L):
            vals = [ld_rows[i] + ld_in[i, l:l + 1, :] for i in range(I)]
            mv = vals[0]
            for i in range(1, I):
                mv = jnp.maximum(mv, vals[i])
            sv = jnp.exp(vals[0] - mv)
            for i in range(1, I):
                sv = sv + jnp.exp(vals[i] - mv)
            ldout_ref[o:o + 1, l:l + 1, :] = (mv + jnp.log(sv))[None, :, :]


def _round_up(x, m):
    return ((x + m - 1) // m) * m


def dense_sigmoid_flow(x, logdet, dsparams, u_, w_, *, tile_rows=256):
    """DenseSigmoidFlow.forward.

    x:        (N, D, in_dim)
    logdet:   (N, D, in_dim, L)          carried log-space Jacobian
    dsparams: (N, D, 3*hidden + in_dim)
    u_:       (hidden, in_dim), w_: (out_dim, hidden)
    returns:  xnew (N, D, out_dim), logdet_out (N, D, out_dim, L)
    """
    x = jnp.asarray(x, jnp.float32)
    logdet = jnp.asarray(logdet, jnp.float32)
    dsparams = jnp.asarray(dsparams, jnp.float32)
    u_ = jnp.asarray(u_, jnp.float32)
    w_ = jnp.asarray(w_, jnp.float32)

    N, D, I = x.shape
    H, I2 = u_.shape
    O, H2 = w_.shape
    P = dsparams.shape[-1]
    L = logdet.shape[-1]
    assert I2 == I and H2 == H and P == 3 * H + I
    assert logdet.shape == (N, D, I, L)

    R = N * D
    tile_r = _round_up(min(tile_rows, _round_up(R, 128)), 128)
    Rp = _round_up(R, tile_r)

    # flatten (N, D) -> rows, pad, and put rows on the minor (lane) axis
    x2 = x.reshape(R, I)
    dsp2 = dsparams.reshape(R, P)
    ld2 = logdet.reshape(R, I, L)
    if Rp != R:
        pad = Rp - R
        x2 = jnp.pad(x2, ((0, pad), (0, 0)))
        dsp2 = jnp.pad(dsp2, ((0, pad), (0, 0)))
        ld2 = jnp.pad(ld2, ((0, pad), (0, 0), (0, 0)))
    x_t = x2.T                                    # (I, Rp)
    dsp_t = dsp2.T                                # (P, Rp)
    ld_t = jnp.transpose(ld2, (1, 2, 0))          # (I, L, Rp)
    u_t = jnp.transpose(u_, (1, 0))[:, :, None]   # (I, H, 1)
    w_t = w_[:, :, None]                          # (O, H, 1)

    kernel = functools.partial(_dsf_kernel, hidden_dim=H, in_dim=I,
                               out_dim=O, ld_extra=L)

    xnew_t, ldout_t = pl.pallas_call(
        kernel,
        out_shape=(
            jax.ShapeDtypeStruct((O, Rp), jnp.float32),
            jax.ShapeDtypeStruct((O, L, Rp), jnp.float32),
        ),
        grid_spec=pltpu.PrefetchScalarGridSpec(
            num_scalar_prefetch=0,
            grid=(Rp // tile_r,),
            in_specs=[
                pl.BlockSpec((I, tile_r), lambda i: (0, i)),
                pl.BlockSpec((P, tile_r), lambda i: (0, i)),
                pl.BlockSpec((I, L, tile_r), lambda i: (0, 0, i)),
                pl.BlockSpec((I, H, 1), lambda i: (0, 0, 0)),
                pl.BlockSpec((O, H, 1), lambda i: (0, 0, 0)),
            ],
            out_specs=[
                pl.BlockSpec((O, tile_r), lambda i: (0, i)),
                pl.BlockSpec((O, L, tile_r), lambda i: (0, 0, i)),
            ],
        ),
        compiler_params=pltpu.CompilerParams(
            dimension_semantics=("parallel",),
        ),
    )(x_t, dsp_t, ld_t, u_t, w_t)

    xnew = jnp.transpose(xnew_t, (1, 0))[:R].reshape(N, D, O)
    logdet_out = jnp.transpose(ldout_t, (2, 0, 1))[:R].reshape(N, D, O, L)
    return xnew, logdet_out


def _dsf_reference(x, logdet, dsparams, u_, w_):
    """Pure-JAX transcription of the PyTorch forward (natural layout)."""
    H, I = u_.shape
    pre_u = u_[None, None, :, :] + dsparams[:, :, -I:][:, :, None, :]
    pre_w = w_[None, None, :, :] + dsparams[:, :, 2 * H:3 * H][:, :, None, :]
    a = jax.nn.softplus(dsparams[:, :, 0:H] + _INV) + DELTA
    b = dsparams[:, :, H:2 * H]
    w = jax.nn.softmax(pre_w, axis=3)
    u = jax.nn.softmax(pre_u, axis=3)
    pre_sigm = jnp.sum(u * a[:, :, :, None] * x[:, :, None, :], axis=3) + b
    sigm = jax.nn.sigmoid(pre_sigm)
    x_pre = jnp.sum(w * sigm[:, :, None, :], axis=3)
    xpc = x_pre * (1.0 - DELTA) + DELTA * 0.5
    xnew = jnp.log(xpc) - jnp.log(1.0 - xpc)
    logj = (jax.nn.log_softmax(pre_w, axis=3)
            + jax.nn.log_sigmoid(pre_sigm)[:, :, None, :]
            + jax.nn.log_sigmoid(-pre_sigm)[:, :, None, :]
            + jnp.log(a)[:, :, None, :])
    logj = logj[:, :, :, :, None] + jax.nn.log_softmax(pre_u, axis=3)[:, :, None, :, :]
    logj = jax.scipy.special.logsumexp(logj, axis=3)                  # (N,D,O,I)
    logdet_ = logj + _LOG_1M_DELTA - (jnp.log(xpc) + jnp.log(1.0 - xpc))[:, :, :, None]
    logdet_out = jax.scipy.special.logsumexp(
        logdet_[:, :, :, :, None] + logdet[:, :, None, :, :], axis=3)  # (N,D,O,L)
    return xnew, logdet_out


if __name__ == "__main__":
    # TODO(synk): BaseFlow.sample (host-side Gaussian sampling driver) is not a
    # device kernel and is not implemented here.
    key = jax.random.PRNGKey(0)
    k1, k2, k3, k4, k5 = jax.random.split(key, 5)

    N, D = 8, 64                     # batch, number of transformed dims
    H, I, O, L = 16, 4, 4, 1         # hidden_dim, in_dim, out_dim, logdet tail dim

    x = jax.random.normal(k1, (N, D, I), dtype=jnp.float32)
    dsparams = 0.1 * jax.random.normal(k2, (N, D, 3 * H + I), dtype=jnp.float32)
    logdet_in = 0.1 * jax.random.normal(k3, (N, D, I, L), dtype=jnp.float32)
    u_ = jax.random.uniform(k4, (H, I), minval=-1e-3, maxval=1e-3, dtype=jnp.float32)
    w_ = jax.random.uniform(k5, (O, H), minval=-1e-3, maxval=1e-3, dtype=jnp.float32)

    xnew, logdet_out = dense_sigmoid_flow(x, logdet_in, dsparams, u_, w_)
    jax.block_until_ready((xnew, logdet_out))

    ref_x, ref_ld = _dsf_reference(x, logdet_in, dsparams, u_, w_)

    assert xnew.shape == (N, D, O)
    assert logdet_out.shape == (N, D, O, L)
    assert jnp.allclose(xnew, ref_x, rtol=1e-4, atol=1e-4), \
        float(jnp.max(jnp.abs(xnew - ref_x)))
    assert jnp.allclose(logdet_out, ref_ld, rtol=1e-4, atol=1e-4), \
        float(jnp.max(jnp.abs(logdet_out - ref_ld)))

    print("KERNEL_OK")
</pallas_src>

<mosaic_0001>
module attributes {stable_mosaic.version = 11 : i64} {
  func.func @_dsf_kernel(%arg0: i32, %arg1: memref<4x256xf32, #tpu.memory_space<vmem>>, %arg2: memref<52x256xf32, #tpu.memory_space<vmem>>, %arg3: memref<4x1x256xf32, #tpu.memory_space<vmem>>, %arg4: memref<4x16x1xf32, #tpu.memory_space<vmem>>, %arg5: memref<4x16x1xf32, #tpu.memory_space<vmem>>, %arg6: memref<4x256xf32, #tpu.memory_space<vmem>>, %arg7: memref<4x1x256xf32, #tpu.memory_space<vmem>>) attributes {dimension_semantics = [#tpu.dimension_semantics<parallel>], iteration_bounds = array<i64: 2>, scalar_prefetch = 0 : i64, scratch_operands = 0 : i64, tpu.core_type = #tpu.core_type<tc>, window_params = [{transform_indices = @transform_0, window_bounds = array<i64: 4, 256>}, {transform_indices = @transform_1, window_bounds = array<i64: 52, 256>}, {transform_indices = @transform_2, window_bounds = array<i64: 4, 1, 256>}, {pipeline_mode = #tpu.pipeline_mode<synchronous>, transform_indices = @transform_3, window_bounds = array<i64: 4, 16, 1>}, {pipeline_mode = #tpu.pipeline_mode<synchronous>, transform_indices = @transform_4, window_bounds = array<i64: 4, 16, 1>}, {transform_indices = @transform_5, window_bounds = array<i64: 4, 256>}, {transform_indices = @transform_6, window_bounds = array<i64: 4, 1, 256>}]} {
    %c0 = arith.constant 0 : index
    %c0_0 = arith.constant 0 : index
    %0 = vector.load %arg1[%c0, %c0_0] : memref<4x256xf32, #tpu.memory_space<vmem>>, vector<4x256xf32>
    %c0_1 = arith.constant 0 : index
    %c0_2 = arith.constant 0 : index
    %1 = vector.load %arg2[%c0_1, %c0_2] : memref<52x256xf32, #tpu.memory_space<vmem>>, vector<52x256xf32>
    %c0_3 = arith.constant 0 : index
    %c0_4 = arith.constant 0 : index
    %c0_5 = arith.constant 0 : index
    %2 = vector.load %arg3[%c0_3, %c0_4, %c0_5] : memref<4x1x256xf32, #tpu.memory_space<vmem>>, vector<4x1x256xf32>
    %c0_6 = arith.constant 0 : index
    %c0_7 = arith.constant 0 : index
    %c0_8 = arith.constant 0 : index
    %3 = vector.load %arg4[%c0_6, %c0_7, %c0_8] : memref<4x16x1xf32, #tpu.memory_space<vmem>>, vector<4x16x1xf32>
    %c0_9 = arith.constant 0 : index
    %c0_10 = arith.constant 0 : index
    %c0_11 = arith.constant 0 : index
    %4 = vector.load %arg5[%c0_9, %c0_10, %c0_11] : memref<4x16x1xf32, #tpu.memory_space<vmem>>, vector<4x16x1xf32>
    %5 = vector.extract_strided_slice %1 {offsets = [0, 0], sizes = [16, 256], strides = [1, 1]} : vector<52x256xf32> to vector<16x256xf32>
    %cst = arith.constant 0.541323245 : f32
    %6 = vector.broadcast %cst : f32 to vector<16x256xf32>
    %7 = arith.addf %5, %6 : vector<16x256xf32>
    %cst_12 = arith.constant 0.000000e+00 : f32
    %8 = vector.broadcast %cst_12 : f32 to vector<16x256xf32>
    %9 = arith.maximumf %7, %8 : vector<16x256xf32>
    %10 = math.absf %7 : vector<16x256xf32>
    %cst_13 = arith.constant 0.000000e+00 : f32
    %11 = vector.broadcast %cst_13 : f32 to vector<16x256xf32>
    %12 = arith.subf %11, %10 : vector<16x256xf32>
    %13 = math.exp %12 : vector<16x256xf32>
    %cst_14 = arith.constant 1.000000e+00 : f32
    %14 = vector.broadcast %cst_14 : f32 to vector<16x256xf32>
    %15 = arith.addf %14, %13 : vector<16x256xf32>
    %16 = math.log %15 : vector<16x256xf32>
    %17 = arith.addf %9, %16 : vector<16x256xf32>
    %cst_15 = arith.constant 9.99999997E-7 : f32
    %18 = vector.broadcast %cst_15 : f32 to vector<16x256xf32>
    %19 = arith.addf %17, %18 : vector<16x256xf32>
    %20 = vector.extract_strided_slice %1 {offsets = [16, 0], sizes = [16, 256], strides = [1, 1]} : vector<52x256xf32> to vector<16x256xf32>
    %21 = vector.extract_strided_slice %1 {offsets = [32, 0], sizes = [16, 256], strides = [1, 1]} : vector<52x256xf32> to vector<16x256xf32>
    %22 = math.log %19 : vector<16x256xf32>
    %23 = vector.extract_strided_slice %3 {offsets = [0, 0, 0], sizes = [1, 16, 1], strides = [1, 1, 1]} : vector<4x16x1xf32> to vector<1x16x1xf32>
    %24 = vector.shape_cast %23 : vector<1x16x1xf32> to vector<16x1xf32>
    %25 = vector.extract_strided_slice %1 {offsets = [48, 0], sizes = [1, 256], strides = [1, 1]} : vector<52x256xf32> to vector<1x256xf32>
    %26 = vector.broadcast %24 : vector<16x1xf32> to vector<16x256xf32>
    %27 = vector.broadcast %25 : vector<1x256xf32> to vector<16x256xf32>
    %28 = arith.addf %26, %27 : vector<16x256xf32>
    %29 = vector.extract_strided_slice %3 {offsets = [1, 0, 0], sizes = [1, 16, 1], strides = [1, 1, 1]} : vector<4x16x1xf32> to vector<1x16x1xf32>
    %30 = vector.shape_cast %29 : vector<1x16x1xf32> to vector<16x1xf32>
    %31 = vector.extract_strided_slice %1 {offsets = [49, 0], sizes = [1, 256], strides = [1, 1]} : vector<52x256xf32> to vector<1x256xf32>
    %32 = vector.broadcast %30 : vector<16x1xf32> to vector<16x256xf32>
    %33 = vector.broadcast %31 : vector<1x256xf32> to vector<16x256xf32>
    %34 = arith.addf %32, %33 : vector<16x256xf32>
    %35 = vector.extract_strided_slice %3 {offsets = [2, 0, 0], sizes = [1, 16, 1], strides = [1, 1, 1]} : vector<4x16x1xf32> to vector<1x16x1xf32>
    %36 = vector.shape_cast %35 : vector<1x16x1xf32> to vector<16x1xf32>
    %37 = vector.extract_strided_slice %1 {offsets = [50, 0], sizes = [1, 256], strides = [1, 1]} : vector<52x256xf32> to vector<1x256xf32>
    %38 = vector.broadcast %36 : vector<16x1xf32> to vector<16x256xf32>
    %39 = vector.broadcast %37 : vector<1x256xf32> to vector<16x256xf32>
    %40 = arith.addf %38, %39 : vector<16x256xf32>
    %41 = vector.extract_strided_slice %3 {offsets = [3, 0, 0], sizes = [1, 16, 1], strides = [1, 1, 1]} : vector<4x16x1xf32> to vector<1x16x1xf32>
    %42 = vector.shape_cast %41 : vector<1x16x1xf32> to vector<16x1xf32>
    %43 = vector.extract_strided_slice %1 {offsets = [51, 0], sizes = [1, 256], strides = [1, 1]} : vector<52x256xf32> to vector<1x256xf32>
    %44 = vector.broadcast %42 : vector<16x1xf32> to vector<16x256xf32>
    %45 = vector.broadcast %43 : vector<1x256xf32> to vector<16x256xf32>
    %46 = arith.addf %44, %45 : vector<16x256xf32>
    %47 = arith.maximumf %28, %34 : vector<16x256xf32>
    %48 = arith.maximumf %47, %40 : vector<16x256xf32>
    %49 = arith.maximumf %48, %46 : vector<16x256xf32>
    %50 = arith.subf %28, %49 : vector<16x256xf32>
    %51 = math.exp %50 : vector<16x256xf32>
    %52 = arith.subf %34, %49 : vector<16x256xf32>
    %53 = math.exp %52 : vector<16x256xf32>
    %54 = arith.subf %40, %49 : vector<16x256xf32>
    %55 = math.exp %54 : vector<16x256xf32>
    %56 = arith.subf %46, %49 : vector<16x256xf32>
    %57 = math.exp %56 : vector<16x256xf32>
    %58 = arith.addf %51, %53 : vector<16x256xf32>
    %59 = arith.addf %58, %55 : vector<16x256xf32>
    %60 = arith.addf %59, %57 : vector<16x256xf32>
    %61 = math.log %60 : vector<16x256xf32>
    %62 = arith.subf %28, %49 : vector<16x256xf32>
    %63 = arith.subf %62, %61 : vector<16x256xf32>
    %64 = arith.subf %34, %49 : vector<16x256xf32>
    %65 = arith.subf %64, %61 : vector<16x256xf32>
    %66 = arith.subf %40, %49 : vector<16x256xf32>
    %67 = arith.subf %66, %61 : vector<16x256xf32>
    %68 = arith.subf %46, %49 : vector<16x256xf32>
    %69 = arith.subf %68, %61 : vector<16x256xf32>
    %70 = vector.extract_strided_slice %0 {offsets = [0, 0], sizes = [1, 256], strides = [1, 1]} : vector<4x256xf32> to vector<1x256xf32>
    %71 = vector.broadcast %70 : vector<1x256xf32> to vector<16x256xf32>
    %72 = arith.mulf %51, %71 : vector<16x256xf32>
    %73 = vector.extract_strided_slice %0 {offsets = [1, 0], sizes = [1, 256], strides = [1, 1]} : vector<4x256xf32> to vector<1x256xf32>
    %74 = vector.broadcast %73 : vector<1x256xf32> to vector<16x256xf32>
    %75 = arith.mulf %53, %74 : vector<16x256xf32>
    %76 = arith.addf %72, %75 : vector<16x256xf32>
    %77 = vector.extract_strided_slice %0 {offsets = [2, 0], sizes = [1, 256], strides = [1, 1]} : vector<4x256xf32> to vector<1x256xf32>
    %78 = vector.broadcast %77 : vector<1x256xf32> to vector<16x256xf32>
    %79 = arith.mulf %55, %78 : vector<16x256xf32>
    %80 = arith.addf %76, %79 : vector<16x256xf32>
    %81 = vector.extract_strided_slice %0 {offsets = [3, 0], sizes = [1, 256], strides = [1, 1]} : vector<4x256xf32> to vector<1x256xf32>
    %82 = vector.broadcast %81 : vector<1x256xf32> to vector<16x256xf32>
    %83 = arith.mulf %57, %82 : vector<16x256xf32>
    %84 = arith.addf %80, %83 : vector<16x256xf32>
    %85 = arith.divf %84, %60 : vector<16x256xf32>
    %86 = arith.mulf %85, %19 : vector<16x256xf32>
    %87 = arith.addf %86, %20 : vector<16x256xf32>
    %cst_16 = arith.constant 0.000000e+00 : f32
    %88 = vector.broadcast %cst_16 : f32 to vector<16x256xf32>
    %89 = arith.maximumf %87, %88 : vector<16x256xf32>
    %90 = math.absf %87 : vector<16x256xf32>
    %cst_17 = arith.constant 0.000000e+00 : f32
    %91 = vector.broadcast %cst_17 : f32 to vector<16x256xf32>
    %92 = arith.subf %91, %90 : vector<16x256xf32>
    %93 = math.exp %92 : vector<16x256xf32>
    %cst_18 = arith.constant 1.000000e+00 : f32
    %94 = vector.broadcast %cst_18 : f32 to vector<16x256xf32>
    %95 = arith.addf %94, %93 : vector<16x256xf32>
    %96 = math.log %95 : vector<16x256xf32>
    %97 = arith.addf %89, %96 : vector<16x256xf32>
    %cst_19 = arith.constant 0.000000e+00 : f32
    %98 = vector.broadcast %cst_19 : f32 to vector<16x256xf32>
    %99 = arith.subf %98, %87 : vector<16x256xf32>
    %cst_20 = arith.constant 0.000000e+00 : f32
    %100 = vector.broadcast %cst_20 : f32 to vector<16x256xf32>
    %101 = arith.maximumf %99, %100 : vector<16x256xf32>
    %102 = math.absf %99 : vector<16x256xf32>
    %cst_21 = arith.constant 0.000000e+00 : f32
    %103 = vector.broadcast %cst_21 : f32 to vector<16x256xf32>
    %104 = arith.subf %103, %102 : vector<16x256xf32>
    %105 = math.exp %104 : vector<16x256xf32>
    %cst_22 = arith.constant 1.000000e+00 : f32
    %106 = vector.broadcast %cst_22 : f32 to vector<16x256xf32>
    %107 = arith.addf %106, %105 : vector<16x256xf32>
    %108 = math.log %107 : vector<16x256xf32>
    %109 = arith.addf %101, %108 : vector<16x256xf32>
    %cst_23 = arith.constant 0.000000e+00 : f32
    %110 = vector.broadcast %cst_23 : f32 to vector<16x256xf32>
    %111 = arith.subf %110, %109 : vector<16x256xf32>
    %112 = math.exp %111 : vector<16x256xf32>
    %cst_24 = arith.constant 0.000000e+00 : f32
    %113 = vector.broadcast %cst_24 : f32 to vector<16x256xf32>
    %114 = arith.subf %113, %97 : vector<16x256xf32>
    %115 = math.exp %114 : vector<16x256xf32>
    %116 = arith.subf %22, %97 : vector<16x256xf32>
    %117 = arith.subf %116, %109 : vector<16x256xf32>
    %118 = vector.extract_strided_slice %4 {offsets = [0, 0, 0], sizes = [1, 16, 1], strides = [1, 1, 1]} : vector<4x16x1xf32> to vector<1x16x1xf32>
    %119 = vector.shape_cast %118 : vector<1x16x1xf32> to vector<16x1xf32>
    %120 = vector.broadcast %119 : vector<16x1xf32> to vector<16x256xf32>
    %121 = arith.addf %21, %120 : vector<16x256xf32>
    %cst_25 = arith.constant dense<0xFF800000> : vector<256xf32>
    %122 = vector.multi_reduction <maximumf>, %121, %cst_25 [0] : vector<16x256xf32> to vector<256xf32>
    %123 = vector.shape_cast %122 : vector<256xf32> to vector<1x256xf32>
    %124 = vector.broadcast %123 : vector<1x256xf32> to vector<16x256xf32>
    %125 = arith.subf %121, %124 : vector<16x256xf32>
    %126 = math.exp %125 : vector<16x256xf32>
    %cst_26 = arith.constant dense<0.000000e+00> : vector<256xf32>
    %127 = vector.multi_reduction <add>, %126, %cst_26 [0] : vector<16x256xf32> to vector<256xf32>
    %128 = vector.shape_cast %127 : vector<256xf32> to vector<1x256xf32>
    %129 = math.log %128 : vector<1x256xf32>
    %130 = vector.broadcast %123 : vector<1x256xf32> to vector<16x256xf32>
    %131 = arith.subf %121, %130 : vector<16x256xf32>
    %132 = vector.broadcast %129 : vector<1x256xf32> to vector<16x256xf32>
    %133 = arith.subf %131, %132 : vector<16x256xf32>
    %cst_27 = arith.constant 1.000000e+00 : f32
    %134 = vector.broadcast %cst_27 : f32 to vector<1x256xf32>
    %135 = arith.divf %134, %128 : vector<1x256xf32>
    %136 = arith.mulf %126, %112 : vector<16x256xf32>
    %cst_28 = arith.constant dense<0.000000e+00> : vector<256xf32>
    %137 = vector.multi_reduction <add>, %136, %cst_28 [0] : vector<16x256xf32> to vector<256xf32>
    %138 = vector.shape_cast %137 : vector<256xf32> to vector<1x256xf32>
    %139 = arith.mulf %138, %135 : vector<1x256xf32>
    %140 = arith.mulf %126, %115 : vector<16x256xf32>
    %cst_29 = arith.constant dense<0.000000e+00> : vector<256xf32>
    %141 = vector.multi_reduction <add>, %140, %cst_29 [0] : vector<16x256xf32> to vector<256xf32>
    %142 = vector.shape_cast %141 : vector<256xf32> to vector<1x256xf32>
    %143 = arith.mulf %142, %135 : vector<1x256xf32>
    %cst_30 = arith.constant 0.999998986 : f32
    %144 = vector.broadcast %cst_30 : f32 to vector<1x256xf32>
    %145 = arith.mulf %139, %144 : vector<1x256xf32>
    %cst_31 = arith.constant 5.000000e-07 : f32
    %146 = vector.broadcast %cst_31 : f32 to vector<1x256xf32>
    %147 = arith.addf %145, %146 : vector<1x256xf32>
    %cst_32 = arith.constant 0.999998986 : f32
    %148 = vector.broadcast %cst_32 : f32 to vector<1x256xf32>
    %149 = arith.mulf %143, %148 : vector<1x256xf32>
    %cst_33 = arith.constant 5.000000e-07 : f32
    %150 = vector.broadcast %cst_33 : f32 to vector<1x256xf32>
    %151 = arith.addf %149, %150 : vector<1x256xf32>
    %152 = math.log %147 : vector<1x256xf32>
    %153 = math.log %151 : vector<1x256xf32>
    %154 = arith.subf %152, %153 : vector<1x256xf32>
    %c0_34 = arith.constant 0 : index
    %c0_35 = arith.constant 0 : index
    %155 = vector.load %arg6[%c0_34, %c0_35] : memref<4x256xf32, #tpu.memory_space<vmem>>, vector<1x256xf32>
    tpu.vector_store %arg6[%c0_34, %c0_35], %154 {strides = array<i32>} : memref<4x256xf32, #tpu.memory_space<vmem>>, vector<1x256xf32>,
    %156 = arith.addf %133, %117 : vector<16x256xf32>
    %157 = arith.addf %156, %63 : vector<16x256xf32>
    %cst_36 = arith.constant dense<0xFF800000> : vector<256xf32>
    %158 = vector.multi_reduction <maximumf>, %157, %cst_36 [0] : vector<16x256xf32> to vector<256xf32>
    %159 = vector.shape_cast %158 : vector<256xf32> to vector<1x256xf32>
    %160 = vector.broadcast %159 : vector<1x256xf32> to vector<16x256xf32>
    %161 = arith.subf %157, %160 : vector<16x256xf32>
    %162 = math.exp %161 : vector<16x256xf32>
    %cst_37 = arith.constant dense<0.000000e+00> : vector<256xf32>
    %163 = vector.multi_reduction <add>, %162, %cst_37 [0] : vector<16x256xf32> to vector<256xf32>
    %164 = vector.shape_cast %163 : vector<256xf32> to vector<1x256xf32>
    %165 = math.log %164 : vector<1x256xf32>
    %166 = arith.addf %159, %165 : vector<1x256xf32>
    %cst_38 = arith.constant -1.00000045E-6 : f32
    %167 = vector.broadcast %cst_38 : f32 to vector<1x256xf32>
    %168 = arith.addf %166, %167 : vector<1x256xf32>
    %169 = arith.subf %168, %152 : vector<1x256xf32>
    %170 = arith.subf %169, %153 : vector<1x256xf32>
    %171 = arith.addf %156, %65 : vector<16x256xf32>
    %cst_39 = arith.constant dense<0xFF800000> : vector<256xf32>
    %172 = vector.multi_reduction <maximumf>, %171, %cst_39 [0] : vector<16x256xf32> to vector<256xf32>
    %173 = vector.shape_cast %172 : vector<256xf32> to vector<1x256xf32>
    %174 = vector.broadcast %173 : vector<1x256xf32> to vector<16x256xf32>
    %175 = arith.subf %171, %174 : vector<16x256xf32>
    %176 = math.exp %175 : vector<16x256xf32>
    %cst_40 = arith.constant dense<0.000000e+00> : vector<256xf32>
    %177 = vector.multi_reduction <add>, %176, %cst_40 [0] : vector<16x256xf32> to vector<256xf32>
    %178 = vector.shape_cast %177 : vector<256xf32> to vector<1x256xf32>
    %179 = math.log %178 : vector<1x256xf32>
    %180 = arith.addf %173, %179 : vector<1x256xf32>
    %cst_41 = arith.constant -1.00000045E-6 : f32
    %181 = vector.broadcast %cst_41 : f32 to vector<1x256xf32>
    %182 = arith.addf %180, %181 : vector<1x256xf32>
    %183 = arith.subf %182, %152 : vector<1x256xf32>
    %184 = arith.subf %183, %153 : vector<1x256xf32>
    %185 = arith.addf %156, %67 : vector<16x256xf32>
    %cst_42 = arith.constant dense<0xFF800000> : vector<256xf32>
    %186 = vector.multi_reduction <maximumf>, %185, %cst_42 [0] : vector<16x256xf32> to vector<256xf32>
    %187 = vector.shape_cast %186 : vector<256xf32> to vector<1x256xf32>
    %188 = vector.broadcast %187 : vector<1x256xf32> to vector<16x256xf32>
    %189 = arith.subf %185, %188 : vector<16x256xf32>
    %190 = math.exp %189 : vector<16x256xf32>
    %cst_43 = arith.constant dense<0.000000e+00> : vector<256xf32>
    %191 = vector.multi_reduction <add>, %190, %cst_43 [0] : vector<16x256xf32> to vector<256xf32>
    %192 = vector.shape_cast %191 : vector<256xf32> to vector<1x256xf32>
    %193 = math.log %192 : vector<1x256xf32>
    %194 = arith.addf %187, %193 : vector<1x256xf32>
    %cst_44 = arith.constant -1.00000045E-6 : f32
    %195 = vector.broadcast %cst_44 : f32 to vector<1x256xf32>
    %196 = arith.addf %194, %195 : vector<1x256xf32>
    %197 = arith.subf %196, %152 : vector<1x256xf32>
    %198 = arith.subf %197, %153 : vector<1x256xf32>
    %199 = arith.addf %156, %69 : vector<16x256xf32>
    %cst_45 = arith.constant dense<0xFF800000> : vector<256xf32>
    %200 = vector.multi_reduction <maximumf>, %199, %cst_45 [0] : vector<16x256xf32> to vector<256xf32>
    %201 = vector.shape_cast %200 : vector<256xf32> to vector<1x256xf32>
    %202 = vector.broadcast %201 : vector<1x256xf32> to vector<16x256xf32>
    %203 = arith.subf %199, %202 : vector<16x256xf32>
    %204 = math.exp %203 : vector<16x256xf32>
    %cst_46 = arith.constant dense<0.000000e+00> : vector<256xf32>
    %205 = vector.multi_reduction <add>, %204, %cst_46 [0] : vector<16x256xf32> to vector<256xf32>
    %206 = vector.shape_cast %205 : vector<256xf32> to vector<1x256xf32>
    %207 = math.log %206 : vector<1x256xf32>
    %208 = arith.addf %201, %207 : vector<1x256xf32>
    %cst_47 = arith.constant -1.00000045E-6 : f32
    %209 = vector.broadcast %cst_47 : f32 to vector<1x256xf32>
    %210 = arith.addf %208, %209 : vector<1x256xf32>
    %211 = arith.subf %210, %152 : vector<1x256xf32>
    %212 = arith.subf %211, %153 : vector<1x256xf32>
    %213 = vector.extract_strided_slice %2 {offsets = [0, 0, 0], sizes = [1, 1, 256], strides = [1, 1, 1]} : vector<4x1x256xf32> to vector<1x1x256xf32>
    %214 = vector.shape_cast %213 : vector<1x1x256xf32> to vector<1x256xf32>
    %215 = arith.addf %170, %214 : vector<1x256xf32>
    %216 = vector.extract_strided_slice %2 {offsets = [1, 0, 0], sizes = [1, 1, 256], strides = [1, 1, 1]} : vector<4x1x256xf32> to vector<1x1x256xf32>
    %217 = vector.shape_cast %216 : vector<1x1x256xf32> to vector<1x256xf32>
    %218 = arith.addf %184, %217 : vector<1x256xf32>
    %219 = vector.extract_strided_slice %2 {offsets = [2, 0, 0], sizes = [1, 1, 256], strides = [1, 1, 1]} : vector<4x1x256xf32> to vector<1x1x256xf32>
    %220 = vector.shape_cast %219 : vector<1x1x256xf32> to vector<1x256xf32>
    %221 = arith.addf %198, %220 : vector<1x256xf32>
    %222 = vector.extract_strided_slice %2 {offsets = [3, 0, 0], sizes = [1, 1, 256], strides = [1, 1, 1]} : vector<4x1x256xf32> to vector<1x1x256xf32>
    %223 = vector.shape_cast %222 : vector<1x1x256xf32> to vector<1x256xf32>
    %224 = arith.addf %212, %223 : vector<1x256xf32>
    %225 = arith.maximumf %215, %218 : vector<1x256xf32>
    %226 = arith.maximumf %225, %221 : vector<1x256xf32>
    %227 = arith.maximumf %226, %224 : vector<1x256xf32>
    %228 = arith.subf %215, %227 : vector<1x256xf32>
    %229 = math.exp %228 : vector<1x256xf32>
    %230 = arith.subf %218, %227 : vector<1x256xf32>
    %231 = math.exp %230 : vector<1x256xf32>
    %232 = arith.addf %229, %231 : vector<1x256xf32>
    %233 = arith.subf %221, %227 : vector<1x256xf32>
    %234 = math.exp %233 : vector<1x256xf32>
    %235 = arith.addf %232, %234 : vector<1x256xf32>
    %236 = arith.subf %224, %227 : vector<1x256xf32>
    %237 = math.exp %236 : vector<1x256xf32>
    %238 = arith.addf %235, %237 : vector<1x256xf32>
    %239 = math.log %238 : vector<1x256xf32>
    %240 = arith.addf %227, %239 : vector<1x256xf32>
    %241 = vector.shape_cast %240 : vector<1x256xf32> to vector<1x1x256xf32>
    %c0_48 = arith.constant 0 : index
    %c0_49 = arith.constant 0 : index
    %c0_50 = arith.constant 0 : index
    %242 = vector.load %arg7[%c0_48, %c0_49, %c0_50] : memref<4x1x256xf32, #tpu.memory_space<vmem>>, vector<1x1x256xf32>
    tpu.vector_store %arg7[%c0_48, %c0_49, %c0_50], %241 {strides = array<i32>} : memref<4x1x256xf32, #tpu.memory_space<vmem>>, vector<1x1x256xf32>,
    %243 = vector.extract_strided_slice %4 {offsets = [1, 0, 0], sizes = [1, 16, 1], strides = [1, 1, 1]} : vector<4x16x1xf32> to vector<1x16x1xf32>
    %244 = vector.shape_cast %243 : vector<1x16x1xf32> to vector<16x1xf32>
    %245 = vector.broadcast %244 : vector<16x1xf32> to vector<16x256xf32>
    %246 = arith.addf %21, %245 : vector<16x256xf32>
    %cst_51 = arith.constant dense<0xFF800000> : vector<256xf32>
    %247 = vector.multi_reduction <maximumf>, %246, %cst_51 [0] : vector<16x256xf32> to vector<256xf32>
    %248 = vector.shape_cast %247 : vector<256xf32> to vector<1x256xf32>
    %249 = vector.broadcast %248 : vector<1x256xf32> to vector<16x256xf32>
    %250 = arith.subf %246, %249 : vector<16x256xf32>
    %251 = math.exp %250 : vector<16x256xf32>
    %cst_52 = arith.constant dense<0.000000e+00> : vector<256xf32>
    %252 = vector.multi_reduction <add>, %251, %cst_52 [0] : vector<16x256xf32> to vector<256xf32>
    %253 = vector.shape_cast %252 : vector<256xf32> to vector<1x256xf32>
    %254 = math.log %253 : vector<1x256xf32>
    %255 = vector.broadcast %248 : vector<1x256xf32> to vector<16x256xf32>
    %256 = arith.subf %246, %255 : vector<16x256xf32>
    %257 = vector.broadcast %254 : vector<1x256xf32> to vector<16x256xf32>
    %258 = arith.subf %256, %257 : vector<16x256xf32>
    %cst_53 = arith.constant 1.000000e+00 : f32
    %259 = vector.broadcast %cst_53 : f32 to vector<1x256xf32>
    %260 = arith.divf %259, %253 : vector<1x256xf32>
    %261 = arith.mulf %251, %112 : vector<16x256xf32>
    %cst_54 = arith.constant dense<0.000000e+00> : vector<256xf32>
    %262 = vector.multi_reduction <add>, %261, %cst_54 [0] : vector<16x256xf32> to vector<256xf32>
    %263 = vector.shape_cast %262 : vector<256xf32> to vector<1x256xf32>
    %264 = arith.mulf %263, %260 : vector<1x256xf32>
    %265 = arith.mulf %251, %115 : vector<16x256xf32>
    %cst_55 = arith.constant dense<0.000000e+00> : vector<256xf32>
    %266 = vector.multi_reduction <add>, %265, %cst_55 [0] : vector<16x256xf32> to vector<256xf32>
    %267 = vector.shape_cast %266 : vector<256xf32> to vector<1x256xf32>
    %268 = arith.mulf %267, %260 : vector<1x256xf32>
    %cst_56 = arith.constant 0.999998986 : f32
    %269 = vector.broadcast %cst_56 : f32 to vector<1x256xf32>
    %270 = arith.mulf %264, %269 : vector<1x256xf32>
    %cst_57 = arith.constant 5.000000e-07 : f32
    %271 = vector.broadcast %cst_57 : f32 to vector<1x256xf32>
    %272 = arith.addf %270, %271 : vector<1x256xf32>
    %cst_58 = arith.constant 0.999998986 : f32
    %273 = vector.broadcast %cst_58 : f32 to vector<1x256xf32>
    %274 = arith.mulf %268, %273 : vector<1x256xf32>
    %cst_59 = arith.constant 5.000000e-07 : f32
    %275 = vector.broadcast %cst_59 : f32 to vector<1x256xf32>
    %276 = arith.addf %274, %275 : vector<1x256xf32>
    %277 = math.log %272 : vector<1x256xf32>
    %278 = math.log %276 : vector<1x256xf32>
    %279 = arith.subf %277, %278 : vector<1x256xf32>
    %c1 = arith.constant 1 : index
    %c0_60 = arith.constant 0 : index
    %280 = vector.load %arg6[%c1, %c0_60] : memref<4x256xf32, #tpu.memory_space<vmem>>, vector<1x256xf32>
    tpu.vector_store %arg6[%c1, %c0_60], %279 {strides = array<i32>} : memref<4x256xf32, #tpu.memory_space<vmem>>, vector<1x256xf32>,
    %281 = arith.addf %258, %117 : vector<16x256xf32>
    %282 = arith.addf %281, %63 : vector<16x256xf32>
    %cst_61 = arith.constant dense<0xFF800000> : vector<256xf32>
    %283 = vector.multi_reduction <maximumf>, %282, %cst_61 [0] : vector<16x256xf32> to vector<256xf32>
    %284 = vector.shape_cast %283 : vector<256xf32> to vector<1x256xf32>
    %285 = vector.broadcast %284 : vector<1x256xf32> to vector<16x256xf32>
    %286 = arith.subf %282, %285 : vector<16x256xf32>
    %287 = math.exp %286 : vector<16x256xf32>
    %cst_62 = arith.constant dense<0.000000e+00> : vector<256xf32>
    %288 = vector.multi_reduction <add>, %287, %cst_62 [0] : vector<16x256xf32> to vector<256xf32>
    %289 = vector.shape_cast %288 : vector<256xf32> to vector<1x256xf32>
    %290 = math.log %289 : vector<1x256xf32>
    %291 = arith.addf %284, %290 : vector<1x256xf32>
    %cst_63 = arith.constant -1.00000045E-6 : f32
    %292 = vector.broadcast %cst_63 : f32 to vector<1x256xf32>
    %293 = arith.addf %291, %292 : vector<1x256xf32>
    %294 = arith.subf %293, %277 : vector<1x256xf32>
    %295 = arith.subf %294, %278 : vector<1x256xf32>
    %296 = arith.addf %281, %65 : vector<16x256xf32>
    %cst_64 = arith.constant dense<0xFF800000> : vector<256xf32>
    %297 = vector.multi_reduction <maximumf>, %296, %cst_64 [0] : vector<16x256xf32> to vector<256xf32>
    %298 = vector.shape_cast %297 : vector<256xf32> to vector<1x256xf32>
    %299 = vector.broadcast %298 : vector<1x256xf32> to vector<16x256xf32>
    %300 = arith.subf %296, %299 : vector<16x256xf32>
    %301 = math.exp %300 : vector<16x256xf32>
    %cst_65 = arith.constant dense<0.000000e+00> : vector<256xf32>
    %302 = vector.multi_reduction <add>, %301, %cst_65 [0] : vector<16x256xf32> to vector<256xf32>
    %303 = vector.shape_cast %302 : vector<256xf32> to vector<1x256xf32>
    %304 = math.log %303 : vector<1x256xf32>
    %305 = arith.addf %298, %304 : vector<1x256xf32>
    %cst_66 = arith.constant -1.00000045E-6 : f32
    %306 = vector.broadcast %cst_66 : f32 to vector<1x256xf32>
    %307 = arith.addf %305, %306 : vector<1x256xf32>
    %308 = arith.subf %307, %277 : vector<1x256xf32>
    %309 = arith.subf %308, %278 : vector<1x256xf32>
    %310 = arith.addf %281, %67 : vector<16x256xf32>
    %cst_67 = arith.constant dense<0xFF800000> : vector<256xf32>
    %311 = vector.multi_reduction <maximumf>, %310, %cst_67 [0] : vector<16x256xf32> to vector<256xf32>
    %312 = vector.shape_cast %311 : vector<256xf32> to vector<1x256xf32>
    %313 = vector.broadcast %312 : vector<1x256xf32> to vector<16x256xf32>
    %314 = arith.subf %310, %313 : vector<16x256xf32>
    %315 = math.exp %314 : vector<16x256xf32>
    %cst_68 = arith.constant dense<0.000000e+00> : vector<256xf32>
    %316 = vector.multi_reduction <add>, %315, %cst_68 [0] : vector<16x256xf32> to vector<256xf32>
    %317 = vector.shape_cast %316 : vector<256xf32> to vector<1x256xf32>
    %318 = math.log %317 : vector<1x256xf32>
    %319 = arith.addf %312, %318 : vector<1x256xf32>
    %cst_69 = arith.constant -1.00000045E-6 : f32
    %320 = vector.broadcast %cst_69 : f32 to vector<1x256xf32>
    %321 = arith.addf %319, %320 : vector<1x256xf32>
    %322 = arith.subf %321, %277 : vector<1x256xf32>
    %323 = arith.subf %322, %278 : vector<1x256xf32>
    %324 = arith.addf %281, %69 : vector<16x256xf32>
    %cst_70 = arith.constant dense<0xFF800000> : vector<256xf32>
    %325 = vector.multi_reduction <maximumf>, %324, %cst_70 [0] : vector<16x256xf32> to vector<256xf32>
    %326 = vector.shape_cast %325 : vector<256xf32> to vector<1x256xf32>
    %327 = vector.broadcast %326 : vector<1x256xf32> to vector<16x256xf32>
    %328 = arith.subf %324, %327 : vector<16x256xf32>
    %329 = math.exp %328 : vector<16x256xf32>
    %cst_71 = arith.constant dense<0.000000e+00> : vector<256xf32>
    %330 = vector.multi_reduction <add>, %329, %cst_71 [0] : vector<16x256xf32> to vector<256xf32>
    %331 = vector.shape_cast %330 : vector<256xf32> to vector<1x256xf32>
    %332 = math.log %331 : vector<1x256xf32>
    %333 = arith.addf %326, %332 : vector<1x256xf32>
    %cst_72 = arith.constant -1.00000045E-6 : f32
    %334 = vector.broadcast %cst_72 : f32 to vector<1x256xf32>
    %335 = arith.addf %333, %334 : vector<1x256xf32>
    %336 = arith.subf %335, %277 : vector<1x256xf32>
    %337 = arith.subf %336, %278 : vector<1x256xf32>
    %338 = vector.extract_strided_slice %2 {offsets = [0, 0, 0], sizes = [1, 1, 256], strides = [1, 1, 1]} : vector<4x1x256xf32> to vector<1x1x256xf32>
    %339 = vector.shape_cast %338 : vector<1x1x256xf32> to vector<1x256xf32>
    %340 = arith.addf %295, %339 : vector<1x256xf32>
    %341 = vector.extract_strided_slice %2 {offsets = [1, 0, 0], sizes = [1, 1, 256], strides = [1, 1, 1]} : vector<4x1x256xf32> to vector<1x1x256xf32>
    %342 = vector.shape_cast %341 : vector<1x1x256xf32> to vector<1x256xf32>
    %343 = arith.addf %309, %342 : vector<1x256xf32>
    %344 = vector.extract_strided_slice %2 {offsets = [2, 0, 0], sizes = [1, 1, 256], strides = [1, 1, 1]} : vector<4x1x256xf32> to vector<1x1x256xf32>
    %345 = vector.shape_cast %344 : vector<1x1x256xf32> to vector<1x256xf32>
    %346 = arith.addf %323, %345 : vector<1x256xf32>
    %347 = vector.extract_strided_slice %2 {offsets = [3, 0, 0], sizes = [1, 1, 256], strides = [1, 1, 1]} : vector<4x1x256xf32> to vector<1x1x256xf32>
    %348 = vector.shape_cast %347 : vector<1x1x256xf32> to vector<1x256xf32>
    %349 = arith.addf %337, %348 : vector<1x256xf32>
    %350 = arith.maximumf %340, %343 : vector<1x256xf32>
    %351 = arith.maximumf %350, %346 : vector<1x256xf32>
    %352 = arith.maximumf %351, %349 : vector<1x256xf32>
    %353 = arith.subf %340, %352 : vector<1x256xf32>
    %354 = math.exp %353 : vector<1x256xf32>
    %355 = arith.subf %343, %352 : vector<1x256xf32>
    %356 = math.exp %355 : vector<1x256xf32>
    %357 = arith.addf %354, %356 : vector<1x256xf32>
    %358 = arith.subf %346, %352 : vector<1x256xf32>
    %359 = math.exp %358 : vector<1x256xf32>
    %360 = arith.addf %357, %359 : vector<1x256xf32>
    %361 = arith.subf %349, %352 : vector<1x256xf32>
    %362 = math.exp %361 : vector<1x256xf32>
    %363 = arith.addf %360, %362 : vector<1x256xf32>
    %364 = math.log %363 : vector<1x256xf32>
    %365 = arith.addf %352, %364 : vector<1x256xf32>
    %366 = vector.shape_cast %365 : vector<1x256xf32> to vector<1x1x256xf32>
    %c1_73 = arith.constant 1 : index
    %c0_74 = arith.constant 0 : index
    %c0_75 = arith.constant 0 : index
    %367 = vector.load %arg7[%c1_73, %c0_74, %c0_75] : memref<4x1x256xf32, #tpu.memory_space<vmem>>, vector<1x1x256xf32>
    tpu.vector_store %arg7[%c1_73, %c0_74, %c0_75], %366 {strides = array<i32>} : memref<4x1x256xf32, #tpu.memory_space<vmem>>, vector<1x1x256xf32>,
    %368 = vector.extract_strided_slice %4 {offsets = [2, 0, 0], sizes = [1, 16, 1], strides = [1, 1, 1]} : vector<4x16x1xf32> to vector<1x16x1xf32>
    %369 = vector.shape_cast %368 : vector<1x16x1xf32> to vector<16x1xf32>
    %370 = vector.broadcast %369 : vector<16x1xf32> to vector<16x256xf32>
    %371 = arith.addf %21, %370 : vector<16x256xf32>
    %cst_76 = arith.constant dense<0xFF800000> : vector<256xf32>
    %372 = vector.multi_reduction <maximumf>, %371, %cst_76 [0] : vector<16x256xf32> to vector<256xf32>
    %373 = vector.shape_cast %372 : vector<256xf32> to vector<1x256xf32>
    %374 = vector.broadcast %373 : vector<1x256xf32> to vector<16x256xf32>
    %375 = arith.subf %371, %374 : vector<16x256xf32>
    %376 = math.exp %375 : vector<16x256xf32>
    %cst_77 = arith.constant dense<0.000000e+00> : vector<256xf32>
    %377 = vector.multi_reduction <add>, %376, %cst_77 [0] : vector<16x256xf32> to vector<256xf32>
    %378 = vector.shape_cast %377 : vector<256xf32> to vector<1x256xf32>
    %379 = math.log %378 : vector<1x256xf32>
    %380 = vector.broadcast %373 : vector<1x256xf32> to vector<16x256xf32>
    %381 = arith.subf %371, %380 : vector<16x256xf32>
    %382 = vector.broadcast %379 : vector<1x256xf32> to vector<16x256xf32>
    %383 = arith.subf %381, %382 : vector<16x256xf32>
    %cst_78 = arith.constant 1.000000e+00 : f32
    %384 = vector.broadcast %cst_78 : f32 to vector<1x256xf32>
    %385 = arith.divf %384, %378 : vector<1x256xf32>
    %386 = arith.mulf %376, %112 : vector<16x256xf32>
    %cst_79 = arith.constant dense<0.000000e+00> : vector<256xf32>
    %387 = vector.multi_reduction <add>, %386, %cst_79 [0] : vector<16x256xf32> to vector<256xf32>
    %388 = vector.shape_cast %387 : vector<256xf32> to vector<1x256xf32>
    %389 = arith.mulf %388, %385 : vector<1x256xf32>
    %390 = arith.mulf %376, %115 : vector<16x256xf32>
    %cst_80 = arith.constant dense<0.000000e+00> : vector<256xf32>
    %391 = vector.multi_reduction <add>, %390, %cst_80 [0] : vector<16x256xf32> to vector<256xf32>
    %392 = vector.shape_cast %391 : vector<256xf32> to vector<1x256xf32>
    %393 = arith.mulf %392, %385 : vector<1x256xf32>
    %cst_81 = arith.constant 0.999998986 : f32
    %394 = vector.broadcast %cst_81 : f32 to vector<1x256xf32>
    %395 = arith.mulf %389, %394 : vector<1x256xf32>
    %cst_82 = arith.constant 5.000000e-07 : f32
    %396 = vector.broadcast %cst_82 : f32 to vector<1x256xf32>
    %397 = arith.addf %395, %396 : vector<1x256xf32>
    %cst_83 = arith.constant 0.999998986 : f32
    %398 = vector.broadcast %cst_83 : f32 to vector<1x256xf32>
    %399 = arith.mulf %393, %398 : vector<1x256xf32>
    %cst_84 = arith.constant 5.000000e-07 : f32
    %400 = vector.broadcast %cst_84 : f32 to vector<1x256xf32>
    %401 = arith.addf %399, %400 : vector<1x256xf32>
    %402 = math.log %397 : vector<1x256xf32>
    %403 = math.log %401 : vector<1x256xf32>
    %404 = arith.subf %402, %403 : vector<1x256xf32>
    %c2 = arith.constant 2 : index
    %c0_85 = arith.constant 0 : index
    %405 = vector.load %arg6[%c2, %c0_85] : memref<4x256xf32, #tpu.memory_space<vmem>>, vector<1x256xf32>
    tpu.vector_store %arg6[%c2, %c0_85], %404 {strides = array<i32>} : memref<4x256xf32, #tpu.memory_space<vmem>>, vector<1x256xf32>,
    %406 = arith.addf %383, %117 : vector<16x256xf32>
    %407 = arith.addf %406, %63 : vector<16x256xf32>
    %cst_86 = arith.constant dense<0xFF800000> : vector<256xf32>
    %408 = vector.multi_reduction <maximumf>, %407, %cst_86 [0] : vector<16x256xf32> to vector<256xf32>
    %409 = vector.shape_cast %408 : vector<256xf32> to vector<1x256xf32>
    %410 = vector.broadcast %409 : vector<1x256xf32> to vector<16x256xf32>
    %411 = arith.subf %407, %410 : vector<16x256xf32>
    %412 = math.exp %411 : vector<16x256xf32>
    %cst_87 = arith.constant dense<0.000000e+00> : vector<256xf32>
    %413 = vector.multi_reduction <add>, %412, %cst_87 [0] : vector<16x256xf32> to vector<256xf32>
    %414 = vector.shape_cast %413 : vector<256xf32> to vector<1x256xf32>
    %415 = math.log %414 : vector<1x256xf32>
    %416 = arith.addf %409, %415 : vector<1x256xf32>
    %cst_88 = arith.constant -1.00000045E-6 : f32
    %417 = vector.broadcast %cst_88 : f32 to vector<1x256xf32>
    %418 = arith.addf %416, %417 : vector<1x256xf32>
    %419 = arith.subf %418, %402 : vector<1x256xf32>
    %420 = arith.subf %419, %403 : vector<1x256xf32>
    %421 = arith.addf %406, %65 : vector<16x256xf32>
    %cst_89 = arith.constant dense<0xFF800000> : vector<256xf32>
    %422 = vector.multi_reduction <maximumf>, %421, %cst_89 [0] : vector<16x256xf32> to vector<256xf32>
    %423 = vector.shape_cast %422 : vector<256xf32> to vector<1x256xf32>
    %424 = vector.broadcast %423 : vector<1x256xf32> to vector<16x256xf32>
    %425 = arith.subf %421, %424 : vector<16x256xf32>
    %426 = math.exp %425 : vector<16x256xf32>
    %cst_90 = arith.constant dense<0.000000e+00> : vector<256xf32>
    %427 = vector.multi_reduction <add>, %426, %cst_90 [0] : vector<16x256xf32> to vector<256xf32>
    %428 = vector.shape_cast %427 : vector<256xf32> to vector<1x256xf32>
    %429 = math.log %428 : vector<1x256xf32>
    %430 = arith.addf %423, %429 : vector<1x256xf32>
    %cst_91 = arith.constant -1.00000045E-6 : f32
    %431 = vector.broadcast %cst_91 : f32 to vector<1x256xf32>
    %432 = arith.addf %430, %431 : vector<1x256xf32>
    %433 = arith.subf %432, %402 : vector<1x256xf32>
    %434 = arith.subf %433, %403 : vector<1x256xf32>
    %435 = arith.addf %406, %67 : vector<16x256xf32>
    %cst_92 = arith.constant dense<0xFF800000> : vector<256xf32>
    %436 = vector.multi_reduction <maximumf>, %435, %cst_92 [0] : vector<16x256xf32> to vector<256xf32>
    %437 = vector.shape_cast %436 : vector<256xf32> to vector<1x256xf32>
    %438 = vector.broadcast %437 : vector<1x256xf32> to vector<16x256xf32>
    %439 = arith.subf %435, %438 : vector<16x256xf32>
    %440 = math.exp %439 : vector<16x256xf32>
    %cst_93 = arith.constant dense<0.000000e+00> : vector<256xf32>
    %441 = vector.multi_reduction <add>, %440, %cst_93 [0] : vector<16x256xf32> to vector<256xf32>
    %442 = vector.shape_cast %441 : vector<256xf32> to vector<1x256xf32>
    %443 = math.log %442 : vector<1x256xf32>
    %444 = arith.addf %437, %443 : vector<1x256xf32>
    %cst_94 = arith.constant -1.00000045E-6 : f32
    %445 = vector.broadcast %cst_94 : f32 to vector<1x256xf32>
    %446 = arith.addf %444, %445 : vector<1x256xf32>
    %447 = arith.subf %446, %402 : vector<1x256xf32>
    %448 = arith.subf %447, %403 : vector<1x256xf32>
    %449 = arith.addf %406, %69 : vector<16x256xf32>
    %cst_95 = arith.constant dense<0xFF800000> : vector<256xf32>
    %450 = vector.multi_reduction <maximumf>, %449, %cst_95 [0] : vector<16x256xf32> to vector<256xf32>
    %451 = vector.shape_cast %450 : vector<256xf32> to vector<1x256xf32>
    %452 = vector.broadcast %451 : vector<1x256xf32> to vector<16x256xf32>
    %453 = arith.subf %449, %452 : vector<16x256xf32>
    %454 = math.exp %453 : vector<16x256xf32>
    %cst_96 = arith.constant dense<0.000000e+00> : vector<256xf32>
    %455 = vector.multi_reduction <add>, %454, %cst_96 [0] : vector<16x256xf32> to vector<256xf32>
    %456 = vector.shape_cast %455 : vector<256xf32> to vector<1x256xf32>
    %457 = math.log %456 : vector<1x256xf32>
    %458 = arith.addf %451, %457 : vector<1x256xf32>
    %cst_97 = arith.constant -1.00000045E-6 : f32
    %459 = vector.broadcast %cst_97 : f32 to vector<1x256xf32>
    %460 = arith.addf %458, %459 : vector<1x256xf32>
    %461 = arith.subf %460, %402 : vector<1x256xf32>
    %462 = arith.subf %461, %403 : vector<1x256xf32>
    %463 = vector.extract_strided_slice %2 {offsets = [0, 0, 0], sizes = [1, 1, 256], strides = [1, 1, 1]} : vector<4x1x256xf32> to vector<1x1x256xf32>
    %464 = vector.shape_cast %463 : vector<1x1x256xf32> to vector<1x256xf32>
    %465 = arith.addf %420, %464 : vector<1x256xf32>
    %466 = vector.extract_strided_slice %2 {offsets = [1, 0, 0], sizes = [1, 1, 256], strides = [1, 1, 1]} : vector<4x1x256xf32> to vector<1x1x256xf32>
    %467 = vector.shape_cast %466 : vector<1x1x256xf32> to vector<1x256xf32>
    %468 = arith.addf %434, %467 : vector<1x256xf32>
    %469 = vector.extract_strided_slice %2 {offsets = [2, 0, 0], sizes = [1, 1, 256], strides = [1, 1, 1]} : vector<4x1x256xf32> to vector<1x1x256xf32>
    %470 = vector.shape_cast %469 : vector<1x1x256xf32> to vector<1x256xf32>
    %471 = arith.addf %448, %470 : vector<1x256xf32>
    %472 = vector.extract_strided_slice %2 {offsets = [3, 0, 0], sizes = [1, 1, 256], strides = [1, 1, 1]} : vector<4x1x256xf32> to vector<1x1x256xf32>
    %473 = vector.shape_cast %472 : vector<1x1x256xf32> to vector<1x256xf32>
    %474 = arith.addf %462, %473 : vector<1x256xf32>
    %475 = arith.maximumf %465, %468 : vector<1x256xf32>
    %476 = arith.maximumf %475, %471 : vector<1x256xf32>
    %477 = arith.maximumf %476, %474 : vector<1x256xf32>
    %478 = arith.subf %465, %477 : vector<1x256xf32>
    %479 = math.exp %478 : vector<1x256xf32>
    %480 = arith.subf %468, %477 : vector<1x256xf32>
    %481 = math.exp %480 : vector<1x256xf32>
    %482 = arith.addf %479, %481 : vector<1x256xf32>
    %483 = arith.subf %471, %477 : vector<1x256xf32>
    %484 = math.exp %483 : vector<1x256xf32>
    %485 = arith.addf %482, %484 : vector<1x256xf32>
    %486 = arith.subf %474, %477 : vector<1x256xf32>
    %487 = math.exp %486 : vector<1x256xf32>
    %488 = arith.addf %485, %487 : vector<1x256xf32>
    %489 = math.log %488 : vector<1x256xf32>
    %490 = arith.addf %477, %489 : vector<1x256xf32>
    %491 = vector.shape_cast %490 : vector<1x256xf32> to vector<1x1x256xf32>
    %c2_98 = arith.constant 2 : index
    %c0_99 = arith.constant 0 : index
    %c0_100 = arith.constant 0 : index
    %492 = vector.load %arg7[%c2_98, %c0_99, %c0_100] : memref<4x1x256xf32, #tpu.memory_space<vmem>>, vector<1x1x256xf32>
    tpu.vector_store %arg7[%c2_98, %c0_99, %c0_100], %491 {strides = array<i32>} : memref<4x1x256xf32, #tpu.memory_space<vmem>>, vector<1x1x256xf32>,
    %493 = vector.extract_strided_slice %4 {offsets = [3, 0, 0], sizes = [1, 16, 1], strides = [1, 1, 1]} : vector<4x16x1xf32> to vector<1x16x1xf32>
    %494 = vector.shape_cast %493 : vector<1x16x1xf32> to vector<16x1xf32>
    %495 = vector.broadcast %494 : vector<16x1xf32> to vector<16x256xf32>
    %496 = arith.addf %21, %495 : vector<16x256xf32>
    %cst_101 = arith.constant dense<0xFF800000> : vector<256xf32>
    %497 = vector.multi_reduction <maximumf>, %496, %cst_101 [0] : vector<16x256xf32> to vector<256xf32>
    %498 = vector.shape_cast %497 : vector<256xf32> to vector<1x256xf32>
    %499 = vector.broadcast %498 : vector<1x256xf32> to vector<16x256xf32>
    %500 = arith.subf %496, %499 : vector<16x256xf32>
    %501 = math.exp %500 : vector<16x256xf32>
    %cst_102 = arith.constant dense<0.000000e+00> : vector<256xf32>
    %502 = vector.multi_reduction <add>, %501, %cst_102 [0] : vector<16x256xf32> to vector<256xf32>
    %503 = vector.shape_cast %502 : vector<256xf32> to vector<1x256xf32>
    %504 = math.log %503 : vector<1x256xf32>
    %505 = vector.broadcast %498 : vector<1x256xf32> to vector<16x256xf32>
    %506 = arith.subf %496, %505 : vector<16x256xf32>
    %507 = vector.broadcast %504 : vector<1x256xf32> to vector<16x256xf32>
    %508 = arith.subf %506, %507 : vector<16x256xf32>
    %cst_103 = arith.constant 1.000000e+00 : f32
    %509 = vector.broadcast %cst_103 : f32 to vector<1x256xf32>
    %510 = arith.divf %509, %503 : vector<1x256xf32>
    %511 = arith.mulf %501, %112 : vector<16x256xf32>
    %cst_104 = arith.constant dense<0.000000e+00> : vector<256xf32>
    %512 = vector.multi_reduction <add>, %511, %cst_104 [0] : vector<16x256xf32> to vector<256xf32>
    %513 = vector.shape_cast %512 : vector<256xf32> to vector<1x256xf32>
    %514 = arith.mulf %513, %510 : vector<1x256xf32>
    %515 = arith.mulf %501, %115 : vector<16x256xf32>
    %cst_105 = arith.constant dense<0.000000e+00> : vector<256xf32>
    %516 = vector.multi_reduction <add>, %515, %cst_105 [0] : vector<16x256xf32> to vector<256xf32>
    %517 = vector.shape_cast %516 : vector<256xf32> to vector<1x256xf32>
    %518 = arith.mulf %517, %510 : vector<1x256xf32>
    %cst_106 = arith.constant 0.999998986 : f32
    %519 = vector.broadcast %cst_106 : f32 to vector<1x256xf32>
    %520 = arith.mulf %514, %519 : vector<1x256xf32>
    %cst_107 = arith.constant 5.000000e-07 : f32
    %521 = vector.broadcast %cst_107 : f32 to vector<1x256xf32>
    %522 = arith.addf %520, %521 : vector<1x256xf32>
    %cst_108 = arith.constant 0.999998986 : f32
    %523 = vector.broadcast %cst_108 : f32 to vector<1x256xf32>
    %524 = arith.mulf %518, %523 : vector<1x256xf32>
    %cst_109 = arith.constant 5.000000e-07 : f32
    %525 = vector.broadcast %cst_109 : f32 to vector<1x256xf32>
    %526 = arith.addf %524, %525 : vector<1x256xf32>
    %527 = math.log %522 : vector<1x256xf32>
    %528 = math.log %526 : vector<1x256xf32>
    %529 = arith.subf %527, %528 : vector<1x256xf32>
    %c3 = arith.constant 3 : index
    %c0_110 = arith.constant 0 : index
    %530 = vector.load %arg6[%c3, %c0_110] : memref<4x256xf32, #tpu.memory_space<vmem>>, vector<1x256xf32>
    tpu.vector_store %arg6[%c3, %c0_110], %529 {strides = array<i32>} : memref<4x256xf32, #tpu.memory_space<vmem>>, vector<1x256xf32>,
    %531 = arith.addf %508, %117 : vector<16x256xf32>
    %532 = arith.addf %531, %63 : vector<16x256xf32>
    %cst_111 = arith.constant dense<0xFF800000> : vector<256xf32>
    %533 = vector.multi_reduction <maximumf>, %532, %cst_111 [0] : vector<16x256xf32> to vector<256xf32>
    %534 = vector.shape_cast %533 : vector<256xf32> to vector<1x256xf32>
    %535 = vector.broadcast %534 : vector<1x256xf32> to vector<16x256xf32>
    %536 = arith.subf %532, %535 : vector<16x256xf32>
    %537 = math.exp %536 : vector<16x256xf32>
    %cst_112 = arith.constant dense<0.000000e+00> : vector<256xf32>
    %538 = vector.multi_reduction <add>, %537, %cst_112 [0] : vector<16x256xf32> to vector<256xf32>
    %539 = vector.shape_cast %538 : vector<256xf32> to vector<1x256xf32>
    %540 = math.log %539 : vector<1x256xf32>
    %541 = arith.addf %534, %540 : vector<1x256xf32>
    %cst_113 = arith.constant -1.00000045E-6 : f32
    %542 = vector.broadcast %cst_113 : f32 to vector<1x256xf32>
    %543 = arith.addf %541, %542 : vector<1x256xf32>
    %544 = arith.subf %543, %527 : vector<1x256xf32>
    %545 = arith.subf %544, %528 : vector<1x256xf32>
    %546 = arith.addf %531, %65 : vector<16x256xf32>
    %cst_114 = arith.constant dense<0xFF800000> : vector<256xf32>
    %547 = vector.multi_reduction <maximumf>, %546, %cst_114 [0] : vector<16x256xf32> to vector<256xf32>
    %548 = vector.shape_cast %547 : vector<256xf32> to vector<1x256xf32>
    %549 = vector.broadcast %548 : vector<1x256xf32> to vector<16x256xf32>
    %550 = arith.subf %546, %549 : vector<16x256xf32>
    %551 = math.exp %550 : vector<16x256xf32>
    %cst_115 = arith.constant dense<0.000000e+00> : vector<256xf32>
    %552 = vector.multi_reduction <add>, %551, %cst_115 [0] : vector<16x256xf32> to vector<256xf32>
    %553 = vector.shape_cast %552 : vector<256xf32> to vector<1x256xf32>
    %554 = math.log %553 : vector<1x256xf32>
    %555 = arith.addf %548, %554 : vector<1x256xf32>
    %cst_116 = arith.constant -1.00000045E-6 : f32
    %556 = vector.broadcast %cst_116 : f32 to vector<1x256xf32>
    %557 = arith.addf %555, %556 : vector<1x256xf32>
    %558 = arith.subf %557, %527 : vector<1x256xf32>
    %559 = arith.subf %558, %528 : vector<1x256xf32>
    %560 = arith.addf %531, %67 : vector<16x256xf32>
    %cst_117 = arith.constant dense<0xFF800000> : vector<256xf32>
    %561 = vector.multi_reduction <maximumf>, %560, %cst_117 [0] : vector<16x256xf32> to vector<256xf32>
    %562 = vector.shape_cast %561 : vector<256xf32> to vector<1x256xf32>
    %563 = vector.broadcast %562 : vector<1x256xf32> to vector<16x256xf32>
    %564 = arith.subf %560, %563 : vector<16x256xf32>
    %565 = math.exp %564 : vector<16x256xf32>
    %cst_118 = arith.constant dense<0.000000e+00> : vector<256xf32>
    %566 = vector.multi_reduction <add>, %565, %cst_118 [0] : vector<16x256xf32> to vector<256xf32>
    %567 = vector.shape_cast %566 : vector<256xf32> to vector<1x256xf32>
    %568 = math.log %567 : vector<1x256xf32>
    %569 = arith.addf %562, %568 : vector<1x256xf32>
    %cst_119 = arith.constant -1.00000045E-6 : f32
    %570 = vector.broadcast %cst_119 : f32 to vector<1x256xf32>
    %571 = arith.addf %569, %570 : vector<1x256xf32>
    %572 = arith.subf %571, %527 : vector<1x256xf32>
    %573 = arith.subf %572, %528 : vector<1x256xf32>
    %574 = arith.addf %531, %69 : vector<16x256xf32>
    %cst_120 = arith.constant dense<0xFF800000> : vector<256xf32>
    %575 = vector.multi_reduction <maximumf>, %574, %cst_120 [0] : vector<16x256xf32> to vector<256xf32>
    %576 = vector.shape_cast %575 : vector<256xf32> to vector<1x256xf32>
    %577 = vector.broadcast %576 : vector<1x256xf32> to vector<16x256xf32>
    %578 = arith.subf %574, %577 : vector<16x256xf32>
    %579 = math.exp %578 : vector<16x256xf32>
    %cst_121 = arith.constant dense<0.000000e+00> : vector<256xf32>
    %580 = vector.multi_reduction <add>, %579, %cst_121 [0] : vector<16x256xf32> to vector<256xf32>
    %581 = vector.shape_cast %580 : vector<256xf32> to vector<1x256xf32>
    %582 = math.log %581 : vector<1x256xf32>
    %583 = arith.addf %576, %582 : vector<1x256xf32>
    %cst_122 = arith.constant -1.00000045E-6 : f32
    %584 = vector.broadcast %cst_122 : f32 to vector<1x256xf32>
    %585 = arith.addf %583, %584 : vector<1x256xf32>
    %586 = arith.subf %585, %527 : vector<1x256xf32>
    %587 = arith.subf %586, %528 : vector<1x256xf32>
    %588 = vector.extract_strided_slice %2 {offsets = [0, 0, 0], sizes = [1, 1, 256], strides = [1, 1, 1]} : vector<4x1x256xf32> to vector<1x1x256xf32>
    %589 = vector.shape_cast %588 : vector<1x1x256xf32> to vector<1x256xf32>
    %590 = arith.addf %545, %589 : vector<1x256xf32>
    %591 = vector.extract_strided_slice %2 {offsets = [1, 0, 0], sizes = [1, 1, 256], strides = [1, 1, 1]} : vector<4x1x256xf32> to vector<1x1x256xf32>
    %592 = vector.shape_cast %591 : vector<1x1x256xf32> to vector<1x256xf32>
    %593 = arith.addf %559, %592 : vector<1x256xf32>
    %594 = vector.extract_strided_slice %2 {offsets = [2, 0, 0], sizes = [1, 1, 256], strides = [1, 1, 1]} : vector<4x1x256xf32> to vector<1x1x256xf32>
    %595 = vector.shape_cast %594 : vector<1x1x256xf32> to vector<1x256xf32>
    %596 = arith.addf %573, %595 : vector<1x256xf32>
    %597 = vector.extract_strided_slice %2 {offsets = [3, 0, 0], sizes = [1, 1, 256], strides = [1, 1, 1]} : vector<4x1x256xf32> to vector<1x1x256xf32>
    %598 = vector.shape_cast %597 : vector<1x1x256xf32> to vector<1x256xf32>
    %599 = arith.addf %587, %598 : vector<1x256xf32>
    %600 = arith.maximumf %590, %593 : vector<1x256xf32>
    %601 = arith.maximumf %600, %596 : vector<1x256xf32>
    %602 = arith.maximumf %601, %599 : vector<1x256xf32>
    %603 = arith.subf %590, %602 : vector<1x256xf32>
    %604 = math.exp %603 : vector<1x256xf32>
    %605 = arith.subf %593, %602 : vector<1x256xf32>
    %606 = math.exp %605 : vector<1x256xf32>
    %607 = arith.addf %604, %606 : vector<1x256xf32>
    %608 = arith.subf %596, %602 : vector<1x256xf32>
    %609 = math.exp %608 : vector<1x256xf32>
    %610 = arith.addf %607, %609 : vector<1x256xf32>
    %611 = arith.subf %599, %602 : vector<1x256xf32>
    %612 = math.exp %611 : vector<1x256xf32>
    %613 = arith.addf %610, %612 : vector<1x256xf32>
    %614 = math.log %613 : vector<1x256xf32>
    %615 = arith.addf %602, %614 : vector<1x256xf32>
    %616 = vector.shape_cast %615 : vector<1x256xf32> to vector<1x1x256xf32>
    %c3_123 = arith.constant 3 : index
    %c0_124 = arith.constant 0 : index
    %c0_125 = arith.constant 0 : index
    %617 = vector.load %arg7[%c3_123, %c0_124, %c0_125] : memref<4x1x256xf32, #tpu.memory_space<vmem>>, vector<1x1x256xf32>
    tpu.vector_store %arg7[%c3_123, %c0_124, %c0_125], %616 {strides = array<i32>} : memref<4x1x256xf32, #tpu.memory_space<vmem>>, vector<1x1x256xf32>,
    return
  }
  func.func @transform_0(%arg0: i32) -> (i32, i32) {
    %c0_i32 = arith.constant 0 : i32
    %c0_i32_0 = arith.constant 0 : i32
    return %c0_i32, %arg0 : i32, i32
  }
  func.func @transform_1(%arg0: i32) -> (i32, i32) {
    %c0_i32 = arith.constant 0 : i32
    %c0_i32_0 = arith.constant 0 : i32
    return %c0_i32, %arg0 : i32, i32
  }
  func.func @transform_2(%arg0: i32) -> (i32, i32, i32) {
    %c0_i32 = arith.constant 0 : i32
    %c0_i32_0 = arith.constant 0 : i32
    %c0_i32_1 = arith.constant 0 : i32
    return %c0_i32, %c0_i32_0, %arg0 : i32, i32, i32
  }
  func.func @transform_3(%arg0: i32) -> (i32, i32, i32) {
    %c0_i32 = arith.constant 0 : i32
    %c0_i32_0 = arith.constant 0 : i32
    %c0_i32_1 = arith.constant 0 : i32
    %c0_i32_2 = arith.constant 0 : i32
    return %c0_i32, %c0_i32_0, %c0_i32_1 : i32, i32, i32
  }
  func.func @transform_4(%arg0: i32) -> (i32, i32, i32) {
    %c0_i32 = arith.constant 0 : i32
    %c0_i32_0 = arith.constant 0 : i32
    %c0_i32_1 = arith.constant 0 : i32
    %c0_i32_2 = arith.constant 0 : i32
    return %c0_i32, %c0_i32_0, %c0_i32_1 : i32, i32, i32
  }
  func.func @transform_5(%arg0: i32) -> (i32, i32) {
    %c0_i32 = arith.constant 0 : i32
    %c0_i32_0 = arith.constant 0 : i32
    return %c0_i32, %arg0 : i32, i32
  }
  func.func @transform_6(%arg0: i32) -> (i32, i32, i32) {
    %c0_i32 = arith.constant 0 : i32
    %c0_i32_0 = arith.constant 0 : i32
    %c0_i32_1 = arith.constant 0 : i32
    return %c0_i32, %c0_i32_0, %arg0 : i32, i32, i32
  }
}

</mosaic_0001>

<bundles_post_ra>
// kernel: tpu_custom_call.1
= control target key start
LH: loop header
LB: loop body
LE: loop exit
PB: predicated region body
PF: predicated region fallthrough
CT: control target
= control target key end

     0   :  { %12 = vsyncpa [#allocation3], 0  ;;  %s5656_s0 = inlined_call_operand.vmem [shape: f32[4,512], index: 0, kind: input, shape index: {}]   ;;  %s5657_s1 = inlined_call_operand.hbm [shape: f32[52,512], index: 1, kind: input, shape index: {}]   ;;  %s5658_s2 = inlined_call_operand.vmem [shape: f32[4,1,512], index: 2, kind: input, shape index: {}]   ;;  %s5659_s3 = inlined_call_operand.vmem [shape: f32[4,16,1], index: 3, kind: input, shape index: {}]   ;;  %s5660_s4 = inlined_call_operand.vmem [shape: f32[4,16,1], index: 4, kind: input, shape index: {}]   ;;  %s5661_s5 = inlined_call_operand.hbm [shape: f32[4,512], index: 5, kind: output, shape index: {0}]   ;;  %s5662_s6 = inlined_call_operand.hbm [shape: f32[4,1,512], index: 6, kind: output, shape index: {1}]  }
   0x1   :  { %14 = vsyncpa [#allocation3 + $0x1], 0 }
   0x2   :  { %15 = vsyncpa [#allocation4], 0 }
   0x3   :  { %17 = vsyncpa [#allocation4 + $0x1], 0 }
   0x4   :  { %18 = vsyncpa [#allocation8], 0 }
   0x5   :  { %20 = vsyncpa [#allocation8 + $0x1], 0  ;;  %s3612_s21 = smov 0   ;;  %s3614_s22 = smov 0  }
   0x6   :  { %s3616_s23 = smov 0   ;;  %s3618_s24 = smov 0  }
   0x7 LB: > { %s3633_s25 = sadd.s32 4294967295, %s3564_s24   ;;  %s2858_s26 = sadd.s32 4294967294, %s3564_s24   ;;  %s3564_s24 = sphi %s3618_s24, %s5970_s24   ;;  %s3560_s23 = sphi %s3616_s23, %s5969_s23   ;;  %s3556_s22 = sphi %s3614_s22, %s5968_s22   ;;  %s3552_s21 = sphi %s3612_s21, %s5967_s21  }
   0x8   : > { %s3637_s27 = sadd.s32 1, %s3564_s24   ;;  %s59_s28 = sadd.s32 1, %s3560_s23 }
   0x9   : > { %s56_s29 = ssub.s32 %s3564_s24, %s3637_s27  ;;  %p66_p0 = scmp.ne.s32.totalorder %s3560_s23, %s3556_s22 }
   0xa   : > { %p57_p1 = scmp.eq.s32.totalorder %s56_s29, 0  ;;  %p67_p2 = scmp.eq.s32.totalorder %s3564_s24, 0 }
   0xb   : > { %p72_p3 = scmp.ne.s32.totalorder %s3556_s22, %s3552_s21  ;;  %p73_p4 = scmp.eq.s32.totalorder %s3633_s25, 0 }
   0xc   : > { %s3649_s30 = scalar_select %p57_p1, %s3560_s23, %s59_s28  }
   0xd   : > { %p3651_p5 = por %p67_p2, %p66_p0  ;;  %p3655_p6 = por %p73_p4, %p72_p3 }
   0xe   : > { %p164_p7 = scmp.eq.s32.totalorder %s3633_s25, 1  ;;  %p170_p8 = scmp.eq.s32.totalorder %s2858_s26, 1 }
   0xf   : > { %p5663_p11 = scmp.ge.s32.totalorder %s3564_s24, 2 }
  0x10   : > { %p3660_p9 = por %p164_p7, %p66_p0  ;;  %p3664_p10 = por %p170_p8, %p72_p3 }
  0x11   : > { %218 = sbr.rel (%p5663_p11) target bundleno = 52 (0x34), region = 24  ;;  %s3672_s11 = sand.u32 (!%p5663_p11), 1, %s3560_s23  }
  0x12   : > { %s5757_s9 = scalar_select %p3660_p9, 1, 0 }
  0x13   : > { %s5758_s10 = scalar_select %p3664_p10, 1, 0 }
  0x14   : > { %s2885_s12 = sshll.u32 (!%p5663_p11), %s3564_s24, 8  ;;  %s2888_s13 = smul.u32 (!%p5663_p11), 112, %s3672_s11 }
  0x15   : > { %s3679_s16 = scalar_lea.hbm (!%p5663_p11), %s5657_s1, %s2885_s12  ;;  %s232_s19 = scalar_lea.sflag (!%p5663_p11), [#allocation3], %s3672_s11 }
  0x16   : > { %s235_s17 = scalar_lea.vmem (!%p5663_p11), [#allocation2], %s2888_s13  ;;  %s3438_s20 = scalar_lea.hbm (!%p5663_p11), %s3679_s16, 1792 }
  0x17   : > { %s242_s18 = sshll.u32 (!%p5663_p11), %s235_s17, 4  ;;  %p3439_p12 = scmp.ne.s32.totalorder (!%p5663_p11), %s3679_s16, %s3438_s20  ;;  %s3681_s18 = int_to_ptr.vmem [resolvable:$true] %s242_s18 }
  0x18   : > { %s3442_s29 = scalar_lea.hbm %s5657_s1, 3584  ;;  %p3443_p1 = scmp.lt.u32.totalorder %s3679_s16, %s5657_s1 }
  0x19   : > { %p3440_p13 = pnand %p3439_p12, %p3651_p5  ;;  %p3444_p2 = scmp.lt.u32.totalorder %s3442_s29, %s3438_s20 }
  0x1a   : > { %p3446_p4 = scmp.lt.u32.totalorder %s3438_s20, %s3679_s16 }
  0x1b   : > { %p3441_p0 = pneg %p3440_p13  ;;  %p3445_p3 = por %p3444_p2, %p3443_p1 }
  0x1d   : > { %p3447_p7 = por %p3446_p4, %p3445_p3 }
  0x1f   : > { %p3448_p8 = pnand %p3447_p7, %p3441_p0 }
  0x21   : > { %3451 = shalt.err (!%p3448_p8)
}
  0x22   : > { %s3452_s13 = scalar_lea.vmem %s3681_s18, 1792  ;;  %s3566_s15 = smov [#allocation2]  }
  0x23   : > { %p3453_p12 = scmp.ne.s32.totalorder %s3681_s18, %s3452_s13  ;;  %s3456_s17 = sshll.u32 %s3566_s15, 4  ;;  %s3457_s17 = int_to_ptr.vmem [resolvable:$false] %s3456_s17 }
  0x24   : > { %s3458_s26 = scalar_lea.vmem %s3457_s17, 3584  ;;  %p3459_p10 = scmp.lt.s32.totalorder %s3681_s18, %s3457_s17 }
  0x25   : > { %p3454_p13 = pnand %p3453_p12, %p3651_p5  ;;  %p3460_p9 = scmp.lt.s32.totalorder %s3458_s26, %s3452_s13 }
  0x27   : > { %p3455_p11 = pneg %p3454_p13  ;;  %p3461_p1 = por %p3460_p9, %p3459_p10 }
  0x29   : > { %p3462_p2 = pnand %p3461_p1, %p3455_p11 }
  0x2b   : > { %3465 = shalt.err (!%p3462_p2)
}
  0x2c   : > { %s3567_s20 = smov 512   ;;  %s3568_s28 = smov 256  }
  0x2d   : > { %s3569_s29 = smov 16   ;;  %251 = sbr.rel (!%p3651_p5) target bundleno = 52 (0x34), region = 36 }
  0x2e   : > { %2890 = dma.hbm_to_vmem [thread:$0]  (%p3651_p5), %s3679_s16, 1792, %s3681_s18, %s232_s19, %s3567_s20, %s3568_s28, %s3569_s29  }
  0x2f   : > { %s2863_s12 = sshll.u32 (%p3651_p5), %s3672_s11, 3  ;;  %s2864_s14 = sshll.u32 (%p3651_p5), %s3564_s24, 1 }
  0x30   : > { %s257_s17 = scalar_lea.vmem (%p3651_p5), %s5658_s2, %s2864_s14  ;;  %s255_s26 = scalar_lea.vmem (%p3651_p5), [#allocation5], %s2863_s12 }
  0x31   : > { %v273_v0 = vld [vmem:[%s257_s17] sm:$0x3] (%p3651_p5)  ;;  %v275_v1 = vld [vmem:[%s257_s17 + $0x4] sm:$0x3] (%p3651_p5)  ;;  %v277_v2 = vld [vmem:[%s257_s17 + $0x8] sm:$0x3] (%p3651_p5) }
  0x32   : > { %274 = vst [vmem:[%s255_s26] sm:$0x3] (%p3651_p5), %v273_v0  ;;  %276 = vst [vmem:[%s255_s26 + $0x2] sm:$0x3] (%p3651_p5), %v275_v1  ;;  %v279_v3 = vld [vmem:[%s257_s17 + $0xc] sm:$0x3] (%p3651_p5) }
  0x33   : > { %278 = vst [vmem:[%s255_s26 + $0x4] sm:$0x3] (%p3651_p5), %v277_v2  ;;  %280 = vst [vmem:[%s255_s26 + $0x6] sm:$0x3] (%p3651_p5), %v279_v3 }
  0x34 PF: > { %p2865_p5 = scmp.ge.s32.totalorder %s3564_s24, 1  ;;  %p310_p9 = scmp.lt.s32.totalorder %s3564_s24, 3 }
  0x36   : > { %p311_p10 = pnand %p2865_p5, %p310_p9 }
  0x38   : > { %314 = sbr.rel (%p311_p10) target bundleno = 737 (0x2e1), region = 77 }
  0x3f   : > { %s3717_s7 = sand.u32 1, %s3556_s22  }
  0x40   : > { %s2889_s11 = smul.u32 112, %s3717_s7  ;;  %s317_s16 = scalar_lea.sflag [#allocation3], %s3717_s7 }
  0x42   : > { %s3721_s18 = scalar_lea.vmem [#allocation2], %s2889_s11 }
  0x43   : > { %3539 = dma.done.wait (%p3655_p6), %s317_s16, 1792  }
  0x44   : > { %3541 = vsyncadd (%p3655_p6), %s317_s16, 4294965504  ;;  %v3570_v4 = vmov 0   ;;  %v401_v5 = vld [vmem:[%s5659_s3 + $0x10] sm:$0xff]  ;;  %v399_v6 = vld [vmem:[%s5659_s3] sm:$0xff]  ;;  %s2869_s13 = sshll.u32 %s3633_s25, 1  ;;  %v5665_v43 = vlaneseq  ;;  %s2886_s19 = sshll.u32 %s3633_s25, 7 }
  0x45   : > { %2945 = vset.pattern.permute.xlu1 %v3570_v4  ;;  %2944 = vset.pattern.permute.xlu0 %v3570_v4  ;;  %v402_v7 = vld [vmem:[%s5659_s3 + $0x18] sm:$0xff]  ;;  %v400_v8 = vld [vmem:[%s5659_s3 + $0x8] sm:$0xff]  ;;  %v403_v10 = vld [vmem:[%s5659_s3 + $0x20] sm:$0xff]  ;;  %p371_p6 = scmp.lt.s32.totalorder %s2869_s13, 3  ;;  %s5498_s12 = scalar_lea.hbm %s5661_s5, %s2886_s19 }
  0x46   : > { %491 = vperm.xlu1 %2945, %v401_v5   ;;  %469 = vperm.xlu0 %2944, %v399_v6   ;;  %v404_v9 = vld [vmem:[%s5659_s3 + $0x28] sm:$0xff]  ;;  %v406_v11 = vld [vmem:[%s5659_s3 + $0x38] sm:$0xff]  ;;  %v405_v12 = vld [vmem:[%s5659_s3 + $0x30] sm:$0xff]  ;;  %v3793_v46 = vshrl.u32 %v5665_v43, 7  ;;  %s2691_s14 = scalar_lea.sflag [#allocation4], %s3717_s7  ;;  %p5962_p0 = scmp.ne.s32.totalorder %s5757_s9, 0 }
  0x47   : > { %v408_v13 = vld [vmem:[%s5660_s4 + $0x8] sm:$0xff]  ;;  %v407_v14 = vld [vmem:[%s5660_s4] sm:$0xff]  ;;  %v410_v15 = vld [vmem:[%s5660_s4 + $0x18] sm:$0xff]  ;;  %s5972_s13 = smov (!%p371_p6, %s2869_s13), 3 }
  0x48   : > { %v409_v16 = vld [vmem:[%s5660_s4 + $0x10] sm:$0xff]  ;;  %v412_v17 = vld [vmem:[%s5660_s4 + $0x28] sm:$0xff]  ;;  %v411_v18 = vld [vmem:[%s5660_s4 + $0x20] sm:$0xff]  ;;  %5759 = vst [vmem:[#allocation12_spill] sm:$0xff] %v3793_v46  ;;  %s2870_s8 = sshll.u32 %s5972_s13, 2  ;;  %v3796_v48 = vsub.s32 1, %v3793_v46 }
  0x49   : > { %v414_v19 = vld [vmem:[%s5660_s4 + $0x38] sm:$0xff]  ;;  %v413_v20 = vld [vmem:[%s5660_s4 + $0x30] sm:$0xff]  ;;  %v3800_v51 = vsub.s32 0, %v3793_v46  ;;  %v3803_v52 = vsub.s32 2, %v3793_v46  ;;  %s374_s26 = scalar_lea.vmem %s5656_s0, %s2870_s8  ;;  %v3810_v57 = vsub.s32 3, %v3793_v46  ;;  %v658_v59 = vsub.s32 4, %v3793_v46 }
  0x4a   : > { %496 = vperm.xlu1 %2945, %v402_v7   ;;  %474 = vperm.xlu0 %2944, %v400_v8   ;;  %v381_v21 = vld [vmem:[%s3721_s18] sm:$0xff]  ;;  %v382_v22 = vld [vmem:[%s3721_s18 + $0x8] sm:$0xff]  ;;  %v383_v26 = vld [vmem:[%s3721_s18 + $0x10] sm:$0xff]  ;;  %5760 = vst [vmem:[#allocation13_spill] sm:$0xff] %v3796_v48  ;;  %v680_v3 = vsub.s32 5, %v3793_v46  ;;  %v706_v4 = vsub.s32 6, %v3793_v46 }
  0x4b   : > { %v3777_v23 = vadd.f32 0.54132324, %v381_v21  ;;  %v3779_v24 = vadd.f32 0.54132324, %v382_v22  ;;  %v384_v28 = vld [vmem:[%s3721_s18 + $0x18] sm:$0xff]  ;;  %5761 = vst [vmem:[#allocation14_spill] sm:$0xff] %v3800_v51 }
  0x4c   : > { %v3785_v30 = vadd.f32 0.54132324, %v383_v26  ;;  %v3787_v32 = vadd.f32 0.54132324, %v384_v28  ;;  %v393_v50 = vld [vmem:[%s3721_s18 + $0x60] sm:$0xf] }
  0x4d   : > { %v423_v25 = vand.u32 2147483647, %v3777_v23  ;;  %v424_v27 = vand.u32 2147483647, %v3779_v24  ;;  %v394_v53 = vld [vmem:[%s3721_s18 + $0x68] sm:$0xf]  ;;  %v502_v58 = vrot.slane %v393_v50, %v3796_v48  ;;  %v480_v62 = vrot.slane %v393_v50, %v3800_v51 }
  0x4e   : > { %518 = vperm.xlu1 %2945, %v404_v9   ;;  %513 = vperm.xlu0 %2944, %v403_v10   ;;  %v425_v34 = vand.u32 2147483647, %v3785_v30  ;;  %v426_v36 = vand.u32 2147483647, %v3787_v32  ;;  %v506_v61 = vrot.slane %v394_v53, %v3796_v48  ;;  %v484_v63 = vrot.slane %v394_v53, %v3800_v51  ;;  %v3818_v1 = vld [vmem:[%s374_s26] sm:$0xff]  ;;  %s3572_s8 = smov [#allocation6]  }
  0x4f   : > { %v427_v29 = vsub.f32 0.0, %v423_v25  ;;  %v428_v31 = vsub.f32 0.0, %v424_v27  ;;  %v524_v0 = vrot.slane %v393_v50, %v3803_v52  ;;  %v528_v2 = vrot.slane %v394_v53, %v3803_v52  ;;  %s3470_s15 = sshll.u32 %s3572_s8, 4  ;;  %s3471_s15 = int_to_ptr.vmem [resolvable:$false] %s3470_s15 }
  0x50   : > { %v429_v37 = vsub.f32 0.0, %v425_v34  ;;  %v430_v38 = vsub.f32 0.0, %v426_v36  ;;  %v732_v8 = vsub.s32 7, %v3793_v46  ;;  %v421_v9 = vmax.f32 %v3785_v30, 0.0  ;;  %s3472_s17 = scalar_lea.vmem %s3471_s15, 256 }
  0x51   : > { %v431_v33 = vmul.f32 1.442695, %v427_v29  ;;  %v433_v35 = vmul.f32 1.442695, %v428_v31  ;;  %v546_v10 = vrot.slane %v393_v50, %v3810_v57  ;;  %v3834_v21 = vrot.slane %v3818_v1, %v680_v3 }
  0x52   : > { %540 = vperm.xlu1 %2945, %v406_v11   ;;  %535 = vperm.xlu0 %2944, %v405_v12   ;;  %v435_v39 = vmul.f32 1.442695, %v429_v37  ;;  %v437_v40 = vmul.f32 1.442695, %v430_v38  ;;  %v550_v11 = vrot.slane %v394_v53, %v3810_v57  ;;  %v422_v12 = vmax.f32 %v3787_v32, 0.0 }
  0x53   : > { %2946 = vpow2.f32 %v431_v33  ;;  %v419_v22 = vmax.f32 %v3777_v23, 0.0  ;;  %v420_v36 = vmax.f32 %v3779_v24, 0.0  ;;  %v703_v23 = vrot.slane %v3818_v1, %v3803_v52 }
  0x54   : > { %2948 = vpow2.f32 %v433_v35 }
  0x55   : > { %2950 = vpow2.f32 %v435_v39  ;;  %v3972_v32 = vrot.slane %v703_v23, %v3803_v52 }
  0x56   : > { %883 = vperm.xlu1 %2945, %v408_v13   ;;  %878 = vperm.xlu0 %2944, %v407_v14   ;;  %2952 = vpow2.f32 %v437_v40  ;;  %v655_v13 = vrot.slane %v3818_v1, %v3800_v51  ;;  %v659_v14 = vrot.slane %v3818_v1, %v658_v59 }
  0x5a   : > { %1371 = vperm.xlu1 %2945, %v410_v15   ;;  %1366 = vperm.xlu0 %2944, %v409_v16  }
  0x5d   : > { %v2947_v41 = vpop.eup %2946 }
  0x5e   : > { %1813 = vperm.xlu1 %2945, %v412_v17   ;;  %1808 = vperm.xlu0 %2944, %v411_v18   ;;  %v2949_v42 = vpop.eup %2948  ;;  %v439_v44 = vadd.f32 1.0, %v2947_v41 }
  0x5f   : > { %v440_v45 = vadd.f32 1.0, %v2949_v42  ;;  %v2951_v47 = vpop.eup %2950  ;;  %v3849_v42 = vrot.slane %v3818_v1, %v706_v4 }
  0x60   : > { %2954 = vlog2.f32 %v439_v44  ;;  %v2953_v49 = vpop.eup %2952  ;;  %v441_v54 = vadd.f32 1.0, %v2951_v47  ;;  %v729_v44 = vrot.slane %v3818_v1, %v3810_v57 }
  0x61   : > { %2956 = vlog2.f32 %v440_v45  ;;  %v442_v60 = vadd.f32 1.0, %v2953_v49 }
  0x62   : > { %2255 = vperm.xlu1 %2945, %v414_v19   ;;  %2250 = vperm.xlu0 %2944, %v413_v20   ;;  %2958 = vlog2.f32 %v441_v54  ;;  %v677_v20 = vrot.slane %v3818_v1, %v3796_v48  ;;  %v3984_v23 = vrot.slane %v729_v44, %v3810_v57 }
  0x63   : > { %2960 = vlog2.f32 %v442_v60 }
  0x6a   : > { %v2955_v5 = vpop.eup %2954 }
  0x6b   : > { %v2957_v15 = vpop.eup %2956  ;;  %v444_v25 = vmul.f32 0.6931472, %v2955_v5  ;;  %v3863_v5 = vrot.slane %v659_v14, %v3800_v51 }
  0x6c   : > { %v446_v37 = vmul.f32 0.6931472, %v2957_v15 }
  0x6d   : > { %v451_v45 = vadd.f32 %v444_v25, %v419_v22 }
  0xc5   : > { %v492_v55 = vpop.permute.xlu1 %491  ;;  %v470_v56 = vpop.permute.xlu0 %469 }
  0xc6   : > { %v3837_v26 = vadd.f32 %v502_v58, %v492_v55  ;;  %v3839_v27 = vadd.f32 %v506_v61, %v492_v55  ;;  %v485_v28 = vadd.f32 %v480_v62, %v470_v56  ;;  %v486_v29 = vadd.f32 %v484_v63, %v470_v56  ;;  %v2959_v55 = vpop.eup %2958 }
  0xc8   : > { %v555_v47 = vmax.f32 %v485_v28, %v3837_v26  ;;  %v556_v24 = vmax.f32 %v486_v29, %v3839_v27 }
  0xc9   : > { %v497_v6 = vpop.permute.xlu1 %496  ;;  %v475_v7 = vpop.permute.xlu0 %474 }
  0xca   : > { %v509_v16 = vadd.f32 %v502_v58, %v497_v6  ;;  %v510_v17 = vadd.f32 %v506_v61, %v497_v6  ;;  %v487_v18 = vadd.f32 %v480_v62, %v475_v7  ;;  %v488_v19 = vadd.f32 %v484_v63, %v475_v7 }
  0xcb   : > { %v3860_v63 = vrot.slane %v655_v13, %v3800_v51  ;;  %v3866_v6 = vrot.slane %v677_v20, %v3796_v48  ;;  %v448_v7 = vmul.f32 0.6931472, %v2959_v55 }
  0xcc   : > { %v557_v38 = vmax.f32 %v487_v18, %v509_v16  ;;  %v558_v39 = vmax.f32 %v488_v19, %v510_v17 }
  0xcd   : > { %v519_v31 = vpop.permute.xlu1 %518  ;;  %v514_v33 = vpop.permute.xlu0 %513 }
  0xce   : > { %v531_v34 = vadd.f32 %v524_v0, %v519_v31  ;;  %v532_v35 = vadd.f32 %v528_v2, %v519_v31  ;;  %v3842_v40 = vadd.f32 %v524_v0, %v514_v33  ;;  %v3844_v41 = vadd.f32 %v528_v2, %v514_v33  ;;  %v2961_v2 = vpop.eup %2960 }
  0xcf   : > { %v452_v0 = vadd.f32 %v446_v37, %v420_v36 }
  0xd0   : > { %v561_v49 = vmax.f32 %v557_v38, %v531_v34  ;;  %v562_v50 = vmax.f32 %v558_v39, %v532_v35  ;;  %v559_v61 = vmax.f32 %v555_v47, %v3842_v40  ;;  %v560_v62 = vmax.f32 %v556_v24, %v3844_v41 }
  0xd1   : > { %v541_v53 = vpop.permute.xlu1 %540  ;;  %v536_v54 = vpop.permute.xlu0 %535  ;;  %v3883_v20 = vadd.f32 1e-06, %v452_v0  ;;  %v733_v38 = vrot.slane %v3818_v1, %v732_v8  ;;  %v453_v24 = vadd.f32 %v448_v7, %v421_v9  ;;  %v3926_v9 = vld [vmem:[%s3721_s18 + $0x40] sm:$0xff] }
  0xd2   : > { %v553_v56 = vadd.f32 %v546_v10, %v541_v53  ;;  %v554_v58 = vadd.f32 %v550_v11, %v541_v53  ;;  %v551_v59 = vadd.f32 %v546_v10, %v536_v54  ;;  %v3855_v60 = vadd.f32 %v550_v11, %v536_v54  ;;  %v3918_v53 = vld [vmem:[%s3721_s18 + $0x58] sm:$0xff] }
  0xd3   : > { %v3868_v10 = vadd.f32 1e-06, %v451_v45  ;;  %5763 = vst [vmem:[#allocation16_spill] sm:$0xff] %v3883_v20  ;;  %v450_v45 = vmul.f32 0.6931472, %v2961_v2 }
  0xd4   : > { %v565_v3 = vmax.f32 %v561_v49, %v553_v56  ;;  %v566_v4 = vmax.f32 %v562_v50, %v554_v58  ;;  %v563_v11 = vmax.f32 %v559_v61, %v551_v59  ;;  %v564_v15 = vmax.f32 %v560_v62, %v3855_v60  ;;  %v3915_v50 = vld [vmem:[%s3721_s18 + $0x50] sm:$0xff] }
  0xd5   : > { %5762 = vst [vmem:[#allocation15_spill] sm:$0xff] %v3868_v10  ;;  %2962 = vlog2.f32 %v3868_v10  ;;  %v879_v30 = vpop.permute.xlu0 %878 }
  0xd6   : > { %v3871_v22 = vsub.f32 %v487_v18, %v565_v3  ;;  %v3873_v13 = vsub.f32 %v488_v19, %v566_v4  ;;  %v3875_v25 = vsub.f32 %v509_v16, %v565_v3  ;;  %v3877_v31 = vsub.f32 %v510_v17, %v566_v4 }
  0xd7   : > { %v3879_v33 = vsub.f32 %v531_v34, %v565_v3  ;;  %v3881_v14 = vsub.f32 %v532_v35, %v566_v4  ;;  %v3889_v19 = vsub.f32 %v553_v56, %v565_v3  ;;  %v3892_v17 = vsub.f32 %v554_v58, %v566_v4  ;;  %v3929_v56 = vld [vmem:[%s3721_s18 + $0x48] sm:$0xff] }
  0xd8   : > { %v575_v36 = vmul.f32 1.442695, %v3871_v22  ;;  %v577_v37 = vmul.f32 1.442695, %v3873_v13  ;;  %v587_v18 = vmul.f32 1.442695, %v3875_v25  ;;  %v3894_v34 = vsub.f32 %v485_v28, %v563_v11 }
  0xd9   : > { %v589_v16 = vmul.f32 1.442695, %v3877_v31  ;;  %2964 = vlog2.f32 %v3883_v20  ;;  %v599_v35 = vmul.f32 1.442695, %v3879_v33  ;;  %v3901_v39 = vsub.f32 %v486_v29, %v564_v15  ;;  %v884_v29 = vpop.permute.xlu1 %883  ;;  %5764 = vst [vmem:[#allocation17_spill] sm:$0xff] %v3929_v56 }
  0xda   : > { %2966 = vpow2.f32 %v575_v36  ;;  %v601_v47 = vmul.f32 1.442695, %v3881_v14  ;;  %v3906_v28 = vrot.slane %v3834_v21, %v3796_v48  ;;  %v611_v49 = vmul.f32 1.442695, %v3889_v19 }
  0xdb   : > { %2968 = vpow2.f32 %v577_v37  ;;  %v3912_v8 = vsub.f32 %v3837_v26, %v563_v11  ;;  %v613_v54 = vmul.f32 1.442695, %v3892_v17  ;;  %v571_v21 = vmul.f32 1.442695, %v3894_v34 }
  0xdc   : > { %2970 = vpow2.f32 %v587_v18  ;;  %v3923_v55 = vsub.f32 %v3839_v27, %v564_v15  ;;  %v573_v26 = vmul.f32 1.442695, %v3901_v39  ;;  %v3933_v58 = vsub.f32 %v3842_v40, %v563_v11 }
  0xdd   : > { %2972 = vpow2.f32 %v589_v16  ;;  %v3936_v61 = vsub.f32 %v3844_v41, %v564_v15  ;;  %v3938_v62 = vsub.f32 %v551_v59, %v563_v11  ;;  %v3941_v27 = vadd.f32 %v884_v29, %v3915_v50 }
  0xde   : > { %2974 = vpow2.f32 %v599_v35  ;;  %v3944_v0 = vadd.f32 %v884_v29, %v3918_v53  ;;  %v583_v2 = vmul.f32 1.442695, %v3912_v8  ;;  %v3948_v3 = vadd.f32 %v879_v30, %v3926_v9 }
  0xdf   : > { %2976 = vpow2.f32 %v601_v47  ;;  %v3951_v40 = vadd.f32 %v879_v30, %v3929_v56  ;;  %v3953_v41 = vpop.eup %2962  ;;  %v454_v59 = vadd.f32 %v450_v45, %v422_v12  ;;  %v585_v4 = vmul.f32 1.442695, %v3923_v55 }
  0xe0   : > { %2978 = vpow2.f32 %v611_v49  ;;  %5765 = vst [vmem:[#allocation18_spill] sm:$0xff] %v3953_v41  ;;  %v3959_v7 = vsub.f32 %v3855_v60, %v564_v15  ;;  %v595_v11 = vmul.f32 1.442695, %v3933_v58  ;;  %v890_v36 = vmax.f32 %v3948_v3, %v3941_v27  ;;  %v1372_v15 = vpop.permute.xlu1 %1371 }
  0xe1   : > { %2980 = vpow2.f32 %v613_v54  ;;  %v897_v37 = vmax.f32 %v3951_v40, %v3944_v0  ;;  %v3976_v12 = vrot.slane %v3849_v42, %v3803_v52  ;;  %v597_v60 = vmul.f32 1.442695, %v3936_v61 }
  0xe2   : > { %2982 = vpow2.f32 %v571_v21  ;;  %v607_v35 = vmul.f32 1.442695, %v3938_v62  ;;  %v891_v45 = vrot.slane %v890_v36, 4  ;;  %v3987_v52 = vrot.slane %v733_v38, %v3810_v57 }
  0xe3   : > { %v3966_v18 = vpop.eup %2964  ;;  %2984 = vpow2.f32 %v573_v26  ;;  %v898_v47 = vrot.slane %v897_v37, 4  ;;  %v609_v42 = vmul.f32 1.442695, %v3959_v7  ;;  %v3990_v54 = vadd.f32 1e-06, %v453_v24  ;;  %v1367_v26 = vpop.permute.xlu0 %1366 }
  0xe4   : > { %5766 = vst [vmem:[#allocation19_spill] sm:$0xff] %v3966_v18  ;;  %v2967_v16 = vpop.eup %2966  ;;  %2986 = vpow2.f32 %v583_v2  ;;  %v3992_v21 = vadd.f32 1e-06, %v454_v59  ;;  %v892_v30 = vmax.f32 %v890_v36, %v891_v45  ;;  %v3995_v44 = vadd.f32 %v1372_v15, %v3915_v50 }
  0xe5   : > { %v2969_v49 = vpop.eup %2968  ;;  %2988 = vpow2.f32 %v585_v4  ;;  %v899_v1 = vmax.f32 %v897_v37, %v898_v47  ;;  %v3998_v46 = vadd.f32 %v1372_v15, %v3918_v53  ;;  %v4004_v36 = vadd.f32 %v1367_v26, %v3929_v56  ;;  %v4006_v37 = vpop.permute.xlu1 %1813 }
  0xe6   : > { %v2971_v29 = vpop.eup %2970  ;;  %2990 = vpow2.f32 %v595_v11  ;;  %5767 = vst [vmem:[#allocation20_spill] sm:$0xff] %v3995_v44  ;;  %v893_v4 = vrot.slane %v892_v30, 2  ;;  %v4001_v11 = vadd.f32 %v1367_v26, %v3926_v9  ;;  %5771 = vst [vmem:[#allocation24_spill] sm:$0xff] %v4006_v37  ;;  %v672_v47 = vmul.f32 %v2967_v16, %v3860_v63 }
  0xe7   : > { %v2973_v2 = vpop.eup %2972  ;;  %v617_v43 = vadd.f32 %v2971_v29, %v2967_v16  ;;  %2992 = vpow2.f32 %v597_v60  ;;  %5768 = vst [vmem:[#allocation21_spill] sm:$0xff] %v3998_v46  ;;  %5770 = vst [vmem:[#allocation23_spill] sm:$0xff] %v4004_v36  ;;  %v900_v18 = vrot.slane %v899_v1, 2 }
  0xe8   : > { %v2975_v57 = vpop.eup %2974  ;;  %v618_v38 = vadd.f32 %v2973_v2, %v2969_v49  ;;  %2994 = vpow2.f32 %v607_v35  ;;  %5769 = vst [vmem:[#allocation22_spill] sm:$0xff] %v4001_v11  ;;  %v694_v35 = vmul.f32 %v2971_v29, %v3866_v6  ;;  %v894_v48 = vmax.f32 %v892_v30, %v893_v4 }
  0xe9   : > { %v2977_v24 = vpop.eup %2976  ;;  %v621_v59 = vadd.f32 %v2975_v57, %v617_v43  ;;  %2996 = vpow2.f32 %v609_v42  ;;  %v673_v43 = vmul.f32 %v2969_v49, %v3863_v5  ;;  %v695_v42 = vmul.f32 %v2973_v2, %v3906_v28 }
  0xea   : > { %v2979_v60 = vpop.eup %2978  ;;  %v622_v45 = vadd.f32 %v2977_v24, %v618_v38  ;;  %2998 = vlog2.f32 %v3990_v54  ;;  %v895_v26 = vrot.slane %v894_v48, 1  ;;  %v4015_v38 = vadd.f32 %v4006_v37, %v3915_v50 }
  0xeb   : > { %v2981_v15 = vpop.eup %2980  ;;  %v625_v51 = vadd.f32 %v2979_v60, %v621_v59  ;;  %v901_v29 = vmax.f32 %v899_v1, %v900_v18  ;;  %v4019_v30 = vmax.f32 %v4001_v11, %v3995_v44  ;;  %v4023_v49 = vmax.f32 %v4004_v36, %v3998_v46  ;;  %v4026_v18 = vpop.permute.xlu0 %1808 }
  0xec   : > { %v2983_v41 = vpop.eup %2982  ;;  %v626_v20 = vadd.f32 %v2981_v15, %v622_v45  ;;  %v698_v4 = vadd.f32 %v694_v35, %v672_v47  ;;  %v720_v59 = vmul.f32 %v2975_v57, %v3972_v32  ;;  %v896_v45 = vmax.f32 %v894_v48, %v895_v26 }
  0xed   : > { %v2985_v16 = vpop.eup %2984  ;;  %3000 = vlog2.f32 %v625_v51  ;;  %v699_v50 = vadd.f32 %v695_v42, %v673_v43  ;;  %v902_v37 = vrot.slane %v901_v29, 1  ;;  %v670_v11 = vmul.f32 %v2983_v41, %v3860_v63 }
  0xee   : > { %v2987_v2 = vpop.eup %2986  ;;  %3002 = vlog2.f32 %v626_v20  ;;  %v721_v47 = vmul.f32 %v2977_v24, %v3976_v12  ;;  %v4032_v48 = vsub.f32 %v3948_v3, %v896_v45  ;;  %v724_v43 = vadd.f32 %v720_v59, %v698_v4 }
  0xef   : > { %v2989_v10 = vpop.eup %2988  ;;  %3004 = vrcp.f32 %v625_v51  ;;  %v615_v56 = vadd.f32 %v2987_v2, %v2983_v41  ;;  %v692_v46 = vmul.f32 %v2987_v2, %v3866_v6  ;;  %v903_v57 = vmax.f32 %v901_v29, %v902_v37 }
  0xf0   : > { %v2991_v1 = vpop.eup %2990  ;;  %3006 = vrcp.f32 %v626_v20  ;;  %v616_v44 = vadd.f32 %v2989_v10, %v2985_v16  ;;  %v746_v42 = vmul.f32 %v2979_v60, %v3984_v23  ;;  %v4037_v20 = vadd.f32 %v4026_v18, %v3926_v9 }
  0xf1   : > { %v2993_v36 = vpop.eup %2992  ;;  %v619_v35 = vadd.f32 %v2991_v1, %v615_v56  ;;  %v725_v41 = vadd.f32 %v721_v47, %v699_v50  ;;  %v671_v2 = vmul.f32 %v2985_v16, %v3863_v5  ;;  %v693_v56 = vmul.f32 %v2989_v10, %v3906_v28 }
  0xf2   : > { %v2995_v51 = vpop.eup %2994  ;;  %v620_v26 = vadd.f32 %v2993_v36, %v616_v44  ;;  %v747_v24 = vmul.f32 %v2981_v15, %v3987_v52  ;;  %v696_v37 = vadd.f32 %v692_v46, %v670_v11  ;;  %v4043_v29 = vsub.f32 %v3951_v40, %v903_v57 }
  0xf3   : > { %v2997_v63 = vpop.eup %2996  ;;  %v623_v6 = vadd.f32 %v2995_v51, %v619_v35  ;;  %v4046_v44 = vsub.f32 %v3941_v27, %v896_v45  ;;  %v4049_v9 = vsub.f32 %v3944_v0, %v903_v57  ;;  %v908_v60 = vmul.f32 1.442695, %v4032_v48 }
  0xf4   : > { %v624_v3 = vadd.f32 %v2997_v63, %v620_v26  ;;  %v4052_v4 = vpop.eup %2998  ;;  %v750_v5 = vadd.f32 %v746_v42, %v724_v43  ;;  %v718_v10 = vmul.f32 %v2991_v1, %v3972_v32  ;;  %v1379_v46 = vrot.slane %v4019_v30, 4 }
  0xf5   : > { %3008 = vlog2.f32 %v623_v6  ;;  %v751_v40 = vadd.f32 %v747_v24, %v725_v41  ;;  %v697_v11 = vadd.f32 %v693_v56, %v671_v2  ;;  %v719_v15 = vmul.f32 %v2993_v36, %v3976_v12  ;;  %v388_v2 = vld [vmem:[%s3721_s18 + $0x38] sm:$0xff] }
  0xf6   : > { %3010 = vlog2.f32 %v624_v3  ;;  %v722_v0 = vadd.f32 %v718_v10, %v696_v37  ;;  %v910_v59 = vmul.f32 1.442695, %v4043_v29  ;;  %v912_v32 = vmul.f32 1.442695, %v4046_v44 }
  0xf7   : > { %v3001_v28 = vpop.eup %3000  ;;  %3012 = vrcp.f32 %v623_v6  ;;  %v914_v1 = vmul.f32 1.442695, %v4049_v9  ;;  %v723_v6 = vadd.f32 %v719_v15, %v697_v11 }
  0xf8   : > { %v3003_v27 = vpop.eup %3002  ;;  %v632_v16 = vmul.f32 0.6931472, %v3001_v28  ;;  %3014 = vrcp.f32 %v624_v3 }
  0xf9   : > { %v3005_v45 = vpop.eup %3004  ;;  %v634_v50 = vmul.f32 0.6931472, %v3003_v27  ;;  %3016 = vpow2.f32 %v908_v60 }
  0xfa   : > { %v3007_v47 = vpop.eup %3006  ;;  %v4061_v35 = vsub.f32 %v3871_v22, %v632_v16  ;;  %v4064_v12 = vsub.f32 %v3875_v25, %v632_v16  ;;  %v4067_v36 = vsub.f32 %v3879_v33, %v632_v16  ;;  %v4070_v57 = vsub.f32 %v3889_v19, %v632_v16  ;;  %v387_v33 = vld [vmem:[%s3721_s18 + $0x30] sm:$0xff] }
  0xfb   : > { %v4073_v43 = vsub.f32 %v3873_v13, %v634_v50  ;;  %v4076_v42 = vsub.f32 %v3877_v31, %v634_v50  ;;  %v4079_v26 = vsub.f32 %v3881_v14, %v634_v50  ;;  %v4082_v22 = vsub.f32 %v3892_v17, %v634_v50  ;;  %v385_v50 = vld [vmem:[%s3721_s18 + $0x20] sm:$0xff] }
  0xfc   : > { %5772 = vst [vmem:[#allocation25_spill] sm:$0xff] %v4061_v35  ;;  %5773 = vst [vmem:[#allocation26_spill] sm:$0xff] %v4064_v12  ;;  %v757_v25 = vmul.f32 %v3005_v45, %v750_v5  ;;  %v759_v41 = vmul.f32 %v3007_v47, %v751_v40  ;;  %3018 = vpow2.f32 %v910_v59  ;;  %v744_v19 = vmul.f32 %v2995_v51, %v3984_v23 }
  0xfd   : > { %5774 = vst [vmem:[#allocation27_spill] sm:$0xff] %v4067_v36  ;;  %5775 = vst [vmem:[#allocation28_spill] sm:$0xff] %v4070_v57  ;;  %3020 = vpow2.f32 %v912_v32  ;;  %v1380_v13 = vmax.f32 %v4019_v30, %v1379_v46  ;;  %v1386_v31 = vrot.slane %v4023_v49, 4  ;;  %v745_v17 = vmul.f32 %v2997_v63, %v3987_v52 }
  0xfe   : > { %5776 = vst [vmem:[#allocation29_spill] sm:$0xff] %v4073_v43  ;;  %5777 = vst [vmem:[#allocation30_spill] sm:$0xff] %v4076_v42  ;;  %v762_v56 = vmul.f32 %v757_v25, %v3990_v54  ;;  %v763_v14 = vmul.f32 %v759_v41, %v3992_v21  ;;  %3022 = vpow2.f32 %v914_v1  ;;  %v748_v3 = vadd.f32 %v744_v19, %v722_v0 }
  0xff   : > { %5778 = vst [vmem:[#allocation31_spill] sm:$0xff] %v4079_v26  ;;  %5779 = vst [vmem:[#allocation32_spill] sm:$0xff] %v4082_v22  ;;  %v3009_v24 = vpop.eup %3008  ;;  %3024 = vlog2.f32 %v3992_v21  ;;  %v749_v30 = vadd.f32 %v745_v17, %v723_v6  ;;  %v1381_v46 = vrot.slane %v1380_v13, 2  ;;  %v1387_v54 = vmax.f32 %v4023_v49, %v1386_v31  ;;  %v5792_v31 = vld [vmem:[#allocation16_spill] sm:$0xff] }
 0x100   : > { %v3011_v37 = vpop.eup %3010  ;;  %v4093_v60 = vadd.f32 %v762_v56, %v387_v33  ;;  %v4095_v23 = vadd.f32 %v763_v14, %v388_v2  ;;  %v628_v51 = vmul.f32 0.6931472, %v3009_v24  ;;  %v1820_v52 = vmax.f32 %v4037_v20, %v4015_v38  ;;  %v5791_v2 = vld [vmem:[#allocation15_spill] sm:$0xff] }
 0x101   : > { %v3013_v5 = vpop.eup %3012  ;;  %v630_v10 = vmul.f32 0.6931472, %v3011_v37  ;;  %v1388_v14 = vrot.slane %v1387_v54, 2 }
 0x102   : > { %v3015_v63 = vpop.eup %3014  ;;  %v774_v21 = vand.u32 2147483647, %v4093_v60  ;;  %v775_v28 = vand.u32 2147483647, %v4095_v23  ;;  %v4103_v40 = vsub.f32 %v3894_v34, %v628_v51  ;;  %v4106_v11 = vsub.f32 %v3912_v8, %v628_v51 }
 0x103   : > { %v4108_v15 = vpop.eup %3016  ;;  %v4111_v49 = vsub.f32 %v3901_v39, %v630_v10  ;;  %v4114_v27 = vsub.f32 %v3923_v55, %v630_v10  ;;  %v4117_v16 = vsub.f32 %v3933_v58, %v628_v51  ;;  %v4120_v0 = vsub.f32 %v3936_v61, %v630_v10  ;;  %v386_v39 = vld [vmem:[%s3721_s18 + $0x28] sm:$0xff]  ;;  %v5788_v55 = vld [vmem:[#allocation24_spill] sm:$0xff] }
 0x104   : > { %5780 = vst [vmem:[#allocation33_spill] sm:$0xff] %v4103_v40  ;;  %5781 = vst [vmem:[#allocation34_spill] sm:$0xff] %v4106_v11  ;;  %v778_v59 = vsub.f32 0.0, %v774_v21  ;;  %v779_v34 = vsub.f32 0.0, %v775_v28  ;;  %v4123_v45 = vsub.f32 %v3938_v62, %v628_v51  ;;  %v4126_v8 = vsub.f32 %v3959_v7, %v630_v10  ;;  %v5790_v58 = vld [vmem:[#allocation17_spill] sm:$0xff] }
 0x105   : > { %5782 = vst [vmem:[#allocation35_spill] sm:$0xff] %v4111_v49  ;;  %5783 = vst [vmem:[#allocation36_spill] sm:$0xff] %v4114_v27  ;;  %v753_v32 = vmul.f32 %v3013_v5, %v748_v3  ;;  %v755_v1 = vmul.f32 %v3015_v63, %v749_v30  ;;  %v4132_v47 = vadd.f32 %v5788_v55, %v3918_v53  ;;  %v5680_v6 = vsub.f32 0.0, %v4093_v60 }
 0x106   : > { %5784 = vst [vmem:[#allocation37_spill] sm:$0xff] %v4117_v16  ;;  %5785 = vst [vmem:[#allocation38_spill] sm:$0xff] %v4120_v0  ;;  %v4136_v61 = vadd.f32 %v4026_v18, %v5790_v58  ;;  %v4138_v25 = vpop.eup %3018  ;;  %v784_v41 = vmul.f32 1.442695, %v778_v59  ;;  %v786_v62 = vmul.f32 1.442695, %v779_v34  ;;  %v1382_v53 = vmax.f32 %v1380_v13, %v1381_v46 }
 0x107   : > { %5786 = vst [vmem:[#allocation39_spill] sm:$0xff] %v4123_v45  ;;  %5787 = vst [vmem:[#allocation40_spill] sm:$0xff] %v4126_v8  ;;  %v5679_v7 = vsub.f32 0.0, %v4095_v23  ;;  %v4142_v33 = vpop.eup %3020  ;;  %v760_v19 = vmul.f32 %v753_v32, %v5791_v2  ;;  %v761_v56 = vmul.f32 %v755_v1, %v5792_v31  ;;  %v814_v18 = vand.u32 2147483647, %v5680_v6 }
 0x108   : > { %5789 = vst [vmem:[#allocation24_spill] sm:$0xff] %v4132_v47  ;;  %v4146_v17 = vpop.eup %3022  ;;  %3026 = vpow2.f32 %v784_v41  ;;  %v1821_v24 = vrot.slane %v1820_v52, 4  ;;  %v916_v13 = vadd.f32 %v4142_v33, %v4108_v15  ;;  %v1827_v46 = vmax.f32 %v4136_v61, %v4132_v47 }
 0x109   : > { %v4150_v3 = vpop.eup %3024  ;;  %3028 = vpow2.f32 %v786_v62  ;;  %v4152_v37 = vadd.f32 %v760_v19, %v385_v50  ;;  %v4154_v51 = vadd.f32 %v761_v56, %v386_v39  ;;  %v815_v30 = vand.u32 2147483647, %v5679_v7 }
 0x10a   : > { %v818_v5 = vsub.f32 0.0, %v814_v18  ;;  %v923_v10 = vadd.f32 %v4146_v17, %v4138_v25  ;;  %v1383_v28 = vrot.slane %v1382_v53, 1  ;;  %v1389_v59 = vmax.f32 %v1387_v54, %v1388_v14 }
 0x10b   : > { %v772_v63 = vand.u32 2147483647, %v4152_v37  ;;  %v773_v21 = vand.u32 2147483647, %v4154_v51  ;;  %v5682_v34 = vsub.f32 0.0, %v4152_v37  ;;  %v5685_v50 = vsub.f32 0.0, %v4154_v51 }
 0x10c   : > { %v819_v39 = vsub.f32 0.0, %v815_v30  ;;  %v824_v32 = vmul.f32 1.442695, %v818_v5  ;;  %v917_v58 = vrot.slane %v916_v13, 4  ;;  %v924_v41 = vrot.slane %v923_v10, 4 }
 0x10d   : > { %v776_v1 = vsub.f32 0.0, %v772_v63  ;;  %v777_v55 = vsub.f32 0.0, %v773_v21  ;;  %v812_v62 = vand.u32 2147483647, %v5682_v34  ;;  %v813_v2 = vand.u32 2147483647, %v5685_v50 }
 0x10e   : > { %v1822_v19 = vmax.f32 %v1820_v52, %v1821_v24  ;;  %v1828_v31 = vrot.slane %v1827_v46, 4  ;;  %3030 = vpow2.f32 %v824_v32  ;;  %v826_v14 = vmul.f32 1.442695, %v819_v39 }
 0x10f   : > { %v780_v56 = vmul.f32 1.442695, %v776_v1  ;;  %v782_v54 = vmul.f32 1.442695, %v777_v55  ;;  %v816_v18 = vsub.f32 0.0, %v812_v62  ;;  %v817_v7 = vsub.f32 0.0, %v813_v2 }
 0x110   : > { %v918_v30 = vadd.f32 %v917_v58, %v916_v13  ;;  %v925_v5 = vadd.f32 %v924_v41, %v923_v10  ;;  %v1384_v63 = vmax.f32 %v1382_v53, %v1383_v28  ;;  %v1390_v21 = vrot.slane %v1389_v59, 1  ;;  %v5793_v10 = vld [vmem:[#allocation22_spill] sm:$0xff] }
 0x111   : > { %3032 = vpow2.f32 %v780_v56  ;;  %v820_v22 = vmul.f32 1.442695, %v816_v18  ;;  %v1823_v57 = vrot.slane %v1822_v19, 2  ;;  %v822_v52 = vmul.f32 1.442695, %v817_v7 }
 0x112   : > { %v3027_v6 = vpop.eup %3026  ;;  %3034 = vpow2.f32 %v782_v54  ;;  %v919_v34 = vrot.slane %v918_v30, 2  ;;  %v926_v24 = vrot.slane %v925_v5, 2  ;;  %v1829_v32 = vmax.f32 %v1827_v46, %v1828_v31  ;;  %v5796_v31 = vld [vmem:[#allocation23_spill] sm:$0xff] }
 0x113   : > { %v3029_v47 = vpop.eup %3028  ;;  %v790_v50 = vadd.f32 1.0, %v3027_v6  ;;  %3036 = vpow2.f32 %v826_v14  ;;  %v4173_v55 = vsub.f32 %v5793_v10, %v1384_v63  ;;  %v1391_v28 = vmax.f32 %v1389_v59, %v1390_v21  ;;  %v5798_v59 = vld [vmem:[#allocation19_spill] sm:$0xff] }
 0x114   : > { %v791_v1 = vadd.f32 1.0, %v3029_v47  ;;  %3038 = vpow2.f32 %v820_v22  ;;  %v920_v39 = vadd.f32 %v919_v34, %v918_v30  ;;  %v927_v13 = vadd.f32 %v926_v24, %v925_v5  ;;  %v5795_v34 = vld [vmem:[#allocation18_spill] sm:$0xff]  ;;  %v5799_v5 = vld [vmem:[#allocation20_spill] sm:$0xff] }
 0x115   : > { %3040 = vlog2.f32 %v790_v50  ;;  %5794 = vst [vmem:[#allocation17_spill] sm:$0xff] %v4173_v55  ;;  %v1830_v58 = vrot.slane %v1829_v32, 2  ;;  %v1824_v6 = vmax.f32 %v1822_v19, %v1823_v57  ;;  %v1396_v47 = vmul.f32 1.442695, %v4173_v55 }
 0x116   : > { %3042 = vlog2.f32 %v791_v1  ;;  %v921_v53 = vrot.slane %v920_v39, 1  ;;  %v928_v41 = vrot.slane %v927_v13, 1  ;;  %v4177_v46 = vmul.f32 0.6931472, %v5795_v34 }
 0x117   : > { %3044 = vpow2.f32 %v822_v52  ;;  %v1831_v22 = vmax.f32 %v1829_v32, %v1830_v58  ;;  %v4180_v56 = vsub.f32 %v5796_v31, %v1391_v28  ;;  %v4183_v14 = vmul.f32 0.6931472, %v5798_v59 }
 0x118   : > { %v922_v62 = vadd.f32 %v921_v53, %v920_v39  ;;  %v3031_v7 = vpop.eup %3030  ;;  %v929_v2 = vadd.f32 %v928_v41, %v927_v13  ;;  %v4186_v18 = vmul.f32 0.6931472, %v4052_v4  ;;  %v4189_v57 = vmul.f32 0.6931472, %v4150_v3 }
 0x119   : > { %v830_v50 = vadd.f32 1.0, %v3031_v7  ;;  %5797 = vst [vmem:[#allocation15_spill] sm:$0xff] %v4180_v56  ;;  %v4192_v21 = vsub.f32 %v5799_v5, %v1384_v63  ;;  %v1825_v52 = vrot.slane %v1824_v6, 1  ;;  %v770_v1 = vmax.f32 %v4093_v60, 0.0  ;;  %v5802_v7 = vld [vmem:[#allocation21_spill] sm:$0xff] }
 0x11a   : > { %3046 = vlog2.f32 %v922_v62  ;;  %v1832_v32 = vrot.slane %v1831_v22, 1  ;;  %v771_v4 = vmax.f32 %v4095_v23, 0.0  ;;  %v1398_v10 = vmul.f32 1.442695, %v4180_v56 }
 0x11b   : > { %v3033_v54 = vpop.eup %3032  ;;  %3048 = vlog2.f32 %v929_v2  ;;  %5800 = vst [vmem:[#allocation16_spill] sm:$0xff] %v4192_v21  ;;  %v5801_v58 = vsub.f32 0.0, %v4093_v60  ;;  %v4200_v34 = vsub.f32 %v5802_v7, %v1391_v28  ;;  %v1826_v59 = vmax.f32 %v1824_v6, %v1825_v52 }
 0x11c   : > { %v3035_v19 = vpop.eup %3034  ;;  %v788_v30 = vadd.f32 1.0, %v3033_v54  ;;  %3050 = vlog2.f32 %v830_v50  ;;  %v1400_v28 = vmul.f32 1.442695, %v4192_v21 }
 0x11d   : > { %v3037_v24 = vpop.eup %3036  ;;  %v789_v39 = vadd.f32 1.0, %v3035_v19  ;;  %3052 = vpow2.f32 %v1396_v47  ;;  %v810_v63 = vmax.f32 %v5801_v58, 0.0  ;;  %5803 = vst [vmem:[#allocation22_spill] sm:$0xff] %v4200_v34  ;;  %v5804_v47 = vsub.f32 0.0, %v4095_v23 }
 0x11e   : > { %v3039_v13 = vpop.eup %3038  ;;  %3054 = vlog2.f32 %v788_v30  ;;  %v831_v3 = vadd.f32 1.0, %v3037_v24  ;;  %v768_v30 = vmax.f32 %v4152_v37, 0.0  ;;  %v4205_v24 = vmax.f32 %v1831_v22, %v1832_v32 }
 0x11f   : > { %v3041_v53 = vpop.eup %3040  ;;  %3056 = vlog2.f32 %v789_v39  ;;  %v828_v41 = vadd.f32 1.0, %v3039_v13  ;;  %v811_v54 = vmax.f32 %v5804_v47, 0.0  ;;  %v769_v13 = vmax.f32 %v4154_v51, 0.0 }
 0x120   : > { %v3043_v50 = vpop.eup %3042  ;;  %v797_v31 = vmul.f32 0.6931472, %v3041_v53  ;;  %3058 = vlog2.f32 %v831_v3  ;;  %v5805_v23 = vsub.f32 0.0, %v4152_v37  ;;  %v1402_v58 = vmul.f32 1.442695, %v4200_v34 }
 0x121   : > { %v3045_v19 = vpop.eup %3044  ;;  %v799_v5 = vmul.f32 0.6931472, %v3043_v50  ;;  %3060 = vlog2.f32 %v828_v41  ;;  %v4215_v22 = vsub.f32 %v4037_v20, %v1826_v59 }
 0x122   : > { %v802_v60 = vadd.f32 %v797_v31, %v770_v1  ;;  %v829_v39 = vadd.f32 1.0, %v3045_v19  ;;  %3062 = vpow2.f32 %v1398_v10  ;;  %v808_v3 = vmax.f32 %v5805_v23, 0.0 }
 0x123   : > { %v4209_v53 = vadd.f32 %v799_v5, %v771_v4  ;;  %3064 = vrcp.f32 %v922_v62  ;;  %5806 = vst [vmem:[#allocation18_spill] sm:$0xff] %v4215_v22  ;;  %v4222_v4 = vsub.f32 %v4136_v61, %v4205_v24  ;;  %v1838_v5 = vmul.f32 1.442695, %v4215_v22 }
 0x124   : > { %v3047_v6 = vpop.eup %3046  ;;  %3066 = vlog2.f32 %v829_v39  ;;  %v858_v52 = vsub.f32 0.0, %v802_v60  ;;  %v870_v41 = vsub.f32 %v4186_v18, %v802_v60 }
 0x125   : > { %v3049_v1 = vpop.eup %3048  ;;  %v859_v32 = vsub.f32 0.0, %v4209_v53  ;;  %v4218_v10 = vmul.f32 0.6931472, %v3047_v6  ;;  %3068 = vrcp.f32 %v929_v2  ;;  %5807 = vst [vmem:[#allocation23_spill] sm:$0xff] %v4222_v4 }
 0x126   : > { %v3051_v37 = vpop.eup %3050  ;;  %v864_v62 = vmul.f32 1.442695, %v858_v52  ;;  %v4225_v7 = vmul.f32 0.6931472, %v3049_v1  ;;  %3070 = vpow2.f32 %v1400_v28  ;;  %v5808_v28 = vsub.f32 0.0, %v4154_v51 }
 0x127   : > { %v4227_v50 = vpop.eup %3052  ;;  %v837_v20 = vmul.f32 0.6931472, %v3051_v37  ;;  %v866_v31 = vmul.f32 1.442695, %v859_v32  ;;  %v934_v47 = vsub.f32 %v4032_v48, %v4218_v10  ;;  %v936_v2 = vsub.f32 %v4046_v44, %v4218_v10 }
 0x128   : > { %v3055_v19 = vpop.eup %3054  ;;  %3072 = vpow2.f32 %v864_v62  ;;  %v935_v61 = vsub.f32 %v4043_v29, %v4225_v7  ;;  %v937_v18 = vsub.f32 %v4049_v9, %v4225_v7  ;;  %v809_v23 = vmax.f32 %v5808_v28, 0.0 }
 0x129   : > { %v3057_v60 = vpop.eup %3056  ;;  %v793_v39 = vmul.f32 0.6931472, %v3055_v19  ;;  %v842_v6 = vadd.f32 %v837_v20, %v810_v63  ;;  %3074 = vpow2.f32 %v866_v31  ;;  %v4241_v44 = vsub.f32 %v4015_v38, %v1826_v59 }
 0x12a   : > { %v3059_v48 = vpop.eup %3058  ;;  %v795_v52 = vmul.f32 0.6931472, %v3057_v60  ;;  %3076 = vpow2.f32 %v1402_v58  ;;  %v4244_v1 = vmul.f32 1.442695, %v4222_v4  ;;  %v871_v20 = vsub.f32 %v4189_v57, %v4209_v53 }
 0x12b   : > { %v3061_v32 = vpop.eup %3060  ;;  %v800_v9 = vadd.f32 %v793_v39, %v768_v30  ;;  %v839_v10 = vmul.f32 0.6931472, %v3059_v48  ;;  %v846_v37 = vsub.f32 0.0, %v842_v6  ;;  %v4246_v62 = vsub.f32 %v870_v41, %v842_v6 }
 0x12c   : > { %v4248_v19 = vpop.eup %3062  ;;  %v801_v51 = vadd.f32 %v795_v52, %v769_v13  ;;  %v833_v63 = vmul.f32 0.6931472, %v3061_v32  ;;  %3078 = vpow2.f32 %v1838_v5 }
 0x12d   : > { %5809 = vst [vmem:[#allocation19_spill] sm:$0xff] %v4246_v62  ;;  %v4252_v58 = vpop.eup %3064  ;;  %v843_v38 = vadd.f32 %v839_v10, %v811_v54  ;;  %v852_v59 = vmul.f32 1.442695, %v846_v37  ;;  %v856_v31 = vsub.f32 0.0, %v800_v9  ;;  %v868_v60 = vsub.f32 %v4177_v46, %v800_v9 }
 0x12e   : > { %v3067_v30 = vpop.eup %3066  ;;  %v840_v39 = vadd.f32 %v833_v63, %v808_v3  ;;  %v857_v28 = vsub.f32 0.0, %v801_v51  ;;  %v869_v41 = vsub.f32 %v4183_v14, %v801_v51  ;;  %v4257_v6 = vadd.f32 %v936_v2, %v4246_v62 }
 0x12f   : > { %v4259_v13 = vpop.eup %3068  ;;  %v835_v48 = vmul.f32 0.6931472, %v3067_v30  ;;  %v847_v57 = vsub.f32 0.0, %v843_v38  ;;  %3080 = vpow2.f32 %v852_v59  ;;  %v860_v53 = vmul.f32 1.442695, %v856_v31 }
 0x130   : > { %v4261_v5 = vpop.eup %3070  ;;  %v844_v54 = vsub.f32 0.0, %v840_v39  ;;  %v862_v52 = vmul.f32 1.442695, %v857_v28  ;;  %v4263_v32 = vsub.f32 %v868_v60, %v840_v39  ;;  %v4265_v46 = vsub.f32 %v871_v20, %v843_v38 }
 0x131   : > { %v841_v3 = vadd.f32 %v835_v48, %v809_v23  ;;  %v854_v9 = vmul.f32 1.442695, %v847_v57  ;;  %3082 = vpow2.f32 %v860_v53  ;;  %v4269_v14 = vadd.f32 %v4257_v6, %v4061_v35 }
 0x132   : > { %5810 = vst [vmem:[#allocation20_spill] sm:$0xff] %v4263_v32  ;;  %5811 = vst [vmem:[#allocation21_spill] sm:$0xff] %v4265_v46  ;;  %v4271_v2 = vpop.eup %3072  ;;  %v848_v10 = vmul.f32 1.442695, %v844_v54  ;;  %3084 = vpow2.f32 %v862_v52  ;;  %v1023_v37 = vadd.f32 %v934_v47, %v4263_v32  ;;  %v4275_v51 = vadd.f32 %v937_v18, %v4265_v46 }
 0x133   : > { %v4277_v63 = vpop.eup %3074  ;;  %v845_v20 = vsub.f32 0.0, %v841_v3  ;;  %3086 = vpow2.f32 %v854_v9  ;;  %v4279_v23 = vsub.f32 %v869_v41, %v841_v3  ;;  %v964_v38 = vmul.f32 %v4271_v2, %v4142_v33 }
 0x134   : > { %v4283_v59 = vpop.eup %3076  ;;  %3088 = vpow2.f32 %v848_v10  ;;  %v965_v31 = vmul.f32 %v4277_v63, %v4146_v17  ;;  %v4288_v47 = vadd.f32 %v1023_v37, %v4103_v40  ;;  %v4292_v18 = vadd.f32 %v4275_v51, %v4073_v43 }
 0x135   : > { %5812 = vst [vmem:[#allocation41_spill] sm:$0xff] %v4279_v23  ;;  %v850_v60 = vmul.f32 1.442695, %v845_v20  ;;  %v1024_v30 = vadd.f32 %v935_v61, %v4279_v23  ;;  %v4299_v39 = vadd.f32 %v1023_v37, %v4106_v11  ;;  %v4303_v28 = vadd.f32 %v4257_v6, %v4064_v12 }
 0x136   : > { %v4305_v41 = vpop.eup %3078  ;;  %v1031_v48 = vmax.f32 %v4288_v47, %v4269_v14  ;;  %v4311_v57 = vadd.f32 %v4275_v51, %v4076_v42  ;;  %v4314_v53 = vadd.f32 %v1023_v37, %v4117_v16  ;;  %v4318_v29 = vadd.f32 %v4257_v6, %v4067_v36 }
 0x137   : > { %5813 = vst [vmem:[#allocation42_spill] sm:$0xff] %v4305_v41  ;;  %3090 = vpow2.f32 %v850_v60  ;;  %v4321_v7 = vadd.f32 %v1024_v30, %v4111_v49  ;;  %v4324_v61 = vadd.f32 %v1024_v30, %v4114_v27  ;;  %v1087_v54 = vmax.f32 %v4299_v39, %v4303_v28 }
 0x138   : > { %v1032_v52 = vrot.slane %v1031_v48, 4  ;;  %v4329_v3 = vadd.f32 %v1024_v30, %v4120_v0  ;;  %v4333_v9 = vadd.f32 %v4275_v51, %v4079_v26  ;;  %v1143_v10 = vmax.f32 %v4314_v53, %v4318_v29 }
 0x139   : > { %v4337_v20 = vpop.eup %3080  ;;  %v1038_v60 = vmax.f32 %v4321_v7, %v4292_v18  ;;  %v1088_v4 = vrot.slane %v1087_v54, 4  ;;  %v1094_v22 = vmax.f32 %v4324_v61, %v4311_v57  ;;  %v4344_v41 = vadd.f32 %v1023_v37, %v4123_v45 }
 0x13a   : > { %5814 = vst [vmem:[#allocation43_spill] sm:$0xff] %v4337_v20  ;;  %v944_v36 = vmul.f32 %v4337_v20, %v4142_v33  ;;  %v1033_v26 = vmax.f32 %v1031_v48, %v1032_v52  ;;  %v1144_v0 = vrot.slane %v1143_v10, 4  ;;  %v4350_v16 = vmax.f32 %v4329_v3, %v4333_v9 }
 0x13b   : > { %v4352_v42 = vpop.eup %3082  ;;  %v1039_v12 = vrot.slane %v1038_v60, 4  ;;  %v1089_v27 = vmax.f32 %v1087_v54, %v1088_v4  ;;  %v1095_v11 = vrot.slane %v1094_v22, 4  ;;  %v4355_v43 = vadd.f32 %v1024_v30, %v4126_v8 }
 0x13c   : > { %5815 = vst [vmem:[#allocation44_spill] sm:$0xff] %v4352_v42  ;;  %v4357_v35 = vpop.eup %3084  ;;  %v962_v37 = vmul.f32 %v4352_v42, %v4108_v15  ;;  %v1034_v33 = vrot.slane %v1033_v26, 2  ;;  %v1145_v48 = vmax.f32 %v1143_v10, %v1144_v0 }
 0x13d   : > { %v4362_v45 = vpop.eup %3086  ;;  %v963_v49 = vmul.f32 %v4357_v35, %v4138_v25  ;;  %v1040_v40 = vmax.f32 %v1038_v60, %v1039_v12  ;;  %v1090_v4 = vrot.slane %v1089_v27, 2  ;;  %v1096_v54 = vmax.f32 %v1094_v22, %v1095_v11 }
 0x13e   : > { %v4366_v46 = vpop.eup %3088  ;;  %v945_v30 = vmul.f32 %v4362_v45, %v4146_v17  ;;  %v966_v8 = vadd.f32 %v964_v38, %v962_v37  ;;  %v1035_v62 = vmax.f32 %v1033_v26, %v1034_v33  ;;  %v1146_v23 = vrot.slane %v1145_v48, 2 }
 0x13f   : > { %5816 = vst [vmem:[#allocation45_spill] sm:$0xff] %v4366_v46  ;;  %v942_v0 = vmul.f32 %v4366_v46, %v4108_v15  ;;  %v973_v10 = vadd.f32 %v965_v31, %v963_v49  ;;  %v1041_v52 = vrot.slane %v1040_v40, 2  ;;  %v1091_v34 = vmax.f32 %v1089_v27, %v1090_v4 }
 0x140   : > { %v967_v32 = vrot.slane %v966_v8, 4  ;;  %v1036_v56 = vrot.slane %v1035_v62, 1  ;;  %v1097_v21 = vrot.slane %v1096_v54, 2  ;;  %v4372_v12 = vmax.f32 %v1145_v48, %v1146_v23 }
 0x141   : > { %v4374_v11 = vpop.eup %3090  ;;  %v946_v22 = vadd.f32 %v944_v36, %v942_v0  ;;  %v974_v60 = vrot.slane %v973_v10, 4  ;;  %v1042_v55 = vmax.f32 %v1040_v40, %v1041_v52  ;;  %v1092_v17 = vrot.slane %v1091_v34, 1 }
 0x142   : > { %5817 = vst [vmem:[#allocation46_spill] sm:$0xff] %v4374_v11  ;;  %v943_v26 = vmul.f32 %v4374_v11, %v4138_v25  ;;  %v968_v38 = vadd.f32 %v967_v32, %v966_v8  ;;  %v4378_v37 = vmax.f32 %v1035_v62, %v1036_v56  ;;  %v1098_v15 = vmax.f32 %v1096_v54, %v1097_v21 }
 0x143   : > { %v947_v49 = vrot.slane %v946_v22, 4  ;;  %v975_v27 = vadd.f32 %v974_v60, %v973_v10  ;;  %v1043_v31 = vrot.slane %v1042_v55, 1  ;;  %v4380_v33 = vmax.f32 %v1091_v34, %v1092_v17 }
 0x144   : > { %v953_v23 = vadd.f32 %v945_v30, %v943_v26  ;;  %v969_v48 = vrot.slane %v968_v38, 2  ;;  %v1045_v36 = vsub.f32 %v4288_v47, %v4378_v37  ;;  %v1047_v40 = vsub.f32 %v4269_v14, %v4378_v37 }
 0x145   : > { %v948_v52 = vadd.f32 %v947_v49, %v946_v22  ;;  %v976_v4 = vrot.slane %v975_v27, 2  ;;  %v4386_v25 = vmax.f32 %v1042_v55, %v1043_v31  ;;  %v1099_v8 = vrot.slane %v1098_v15, 1 }
 0x146   : > { %v954_v56 = vrot.slane %v953_v23, 4  ;;  %v970_v21 = vadd.f32 %v969_v48, %v968_v38  ;;  %v1049_v62 = vmul.f32 1.442695, %v1045_v36  ;;  %v1053_v32 = vmul.f32 1.442695, %v1047_v40 }
 0x147   : > { %v949_v54 = vrot.slane %v948_v52, 2  ;;  %v977_v34 = vadd.f32 %v976_v4, %v975_v27  ;;  %v1046_v30 = vsub.f32 %v4321_v7, %v4386_v25  ;;  %v1048_v47 = vsub.f32 %v4292_v18, %v4386_v25 }
 0x148   : > { %v955_v0 = vadd.f32 %v954_v56, %v953_v23  ;;  %v971_v10 = vrot.slane %v970_v21, 1  ;;  %3092 = vpow2.f32 %v1049_v62  ;;  %v4392_v14 = vmax.f32 %v1098_v15, %v1099_v8 }
 0x149   : > { %v950_v55 = vadd.f32 %v949_v54, %v948_v52  ;;  %v978_v22 = vrot.slane %v977_v34, 1  ;;  %v1051_v60 = vmul.f32 1.442695, %v1046_v30  ;;  %3094 = vpow2.f32 %v1053_v32  ;;  %v5818_v30 = vld [vmem:[#allocation24_spill] sm:$0xff] }
 0x14a   : > { %v956_v17 = vrot.slane %v955_v0, 2  ;;  %v972_v26 = vadd.f32 %v971_v10, %v970_v21  ;;  %v1055_v38 = vmul.f32 1.442695, %v1048_v47  ;;  %v1101_v49 = vsub.f32 %v4299_v39, %v4380_v33 }
 0x14b   : > { %v951_v27 = vrot.slane %v950_v55, 1  ;;  %v979_v7 = vadd.f32 %v978_v22, %v977_v34  ;;  %3096 = vpow2.f32 %v1051_v60  ;;  %v1102_v18 = vsub.f32 %v4324_v61, %v4392_v14  ;;  %v5820_v60 = vld [vmem:[#allocation28_spill] sm:$0xff] }
 0x14c   : > { %v957_v31 = vadd.f32 %v956_v17, %v955_v0  ;;  %v980_v15 = vmul.f32 %v4252_v58, %v972_v26  ;;  %3098 = vpow2.f32 %v1055_v38  ;;  %v1103_v23 = vsub.f32 %v4303_v28, %v4380_v33 }
 0x14d   : > { %v952_v48 = vadd.f32 %v951_v27, %v950_v55  ;;  %v981_v36 = vmul.f32 %v4259_v13, %v979_v7  ;;  %v1104_v40 = vsub.f32 %v4311_v57, %v4392_v14  ;;  %v1105_v39 = vmul.f32 1.442695, %v1101_v49 }
 0x14e   : > { %v958_v52 = vrot.slane %v957_v31, 1  ;;  %v986_v4 = vmul.f32 0.999999, %v980_v15  ;;  %v1107_v8 = vmul.f32 1.442695, %v1102_v18  ;;  %v1148_v56 = vrot.slane %v4372_v12, 1 }
 0x14f   : > { %v960_v61 = vmul.f32 %v4252_v58, %v952_v48  ;;  %v987_v21 = vmul.f32 0.999999, %v981_v36  ;;  %3100 = vpow2.f32 %v1105_v39  ;;  %v1109_v62 = vmul.f32 1.442695, %v1103_v23 }
 0x150   : > { %v959_v32 = vadd.f32 %v958_v52, %v957_v31  ;;  %3102 = vpow2.f32 %v1107_v8  ;;  %v1111_v28 = vmul.f32 1.442695, %v1104_v40  ;;  %v4407_v54 = vmul.f32 1.442695, %v4241_v44 }
 0x151   : > { %v988_v34 = vadd.f32 5e-07, %v986_v4  ;;  %3104 = vpow2.f32 %v1109_v62  ;;  %v4410_v57 = vmax.f32 %v4372_v12, %v1148_v56  ;;  %v4414_v47 = vsub.f32 %v5818_v30, %v4205_v24 }
 0x152   : > { %v3093_v0 = vpop.eup %3092  ;;  %v961_v58 = vmul.f32 %v4259_v13, %v959_v32  ;;  %v982_v10 = vmul.f32 0.999999, %v960_v61  ;;  %v5819_v55 = vrot.slane %v4350_v16, 4  ;;  %v4422_v17 = vadd.f32 %v4257_v6, %v5820_v60  ;;  %v5821_v6 = vld [vmem:[#allocation32_spill] sm:$0xff] }
 0x153   : > { %v3095_v26 = vpop.eup %3094  ;;  %v989_v38 = vadd.f32 5e-07, %v987_v21  ;;  %v1157_v12 = vsub.f32 %v4314_v53, %v4410_v57  ;;  %v1159_v24 = vsub.f32 %v4318_v29, %v4410_v57  ;;  %3106 = vpow2.f32 %v4244_v1 }
 0x154   : > { %v1152_v22 = vmax.f32 %v4350_v16, %v5819_v55  ;;  %v983_v13 = vmul.f32 0.999999, %v961_v58  ;;  %v1057_v49 = vadd.f32 %v3095_v26, %v3093_v0  ;;  %3108 = vpow2.f32 %v1111_v28 }
 0x155   : > { %v3097_v7 = vpop.eup %3096  ;;  %3110 = vlog2.f32 %v988_v34  ;;  %v1161_v16 = vmul.f32 1.442695, %v1157_v12  ;;  %v1165_v18 = vmul.f32 1.442695, %v1159_v24  ;;  %v4431_v31 = vadd.f32 %v4275_v51, %v5821_v6 }
 0x156   : > { %v1153_v27 = vrot.slane %v1152_v22, 2  ;;  %v3099_v15 = vpop.eup %3098  ;;  %v984_v23 = vadd.f32 5e-07, %v982_v10  ;;  %v1058_v53 = vrot.slane %v1057_v49, 4  ;;  %v1199_v29 = vmax.f32 %v4344_v41, %v4422_v17 }
 0x157   : > { %v1064_v1 = vadd.f32 %v3099_v15, %v3097_v7  ;;  %3112 = vpow2.f32 %v1161_v16  ;;  %v1206_v36 = vmax.f32 %v4355_v43, %v4431_v31  ;;  %v1404_v40 = vadd.f32 %v4261_v5, %v4227_v50 }
 0x158   : > { %v1154_v48 = vmax.f32 %v1152_v22, %v1153_v27  ;;  %v985_v39 = vadd.f32 5e-07, %v983_v13  ;;  %v1059_v52 = vadd.f32 %v1058_v53, %v1057_v49  ;;  %v1200_v51 = vrot.slane %v1199_v29, 4 }
 0x159   : > { %v3101_v8 = vpop.eup %3100  ;;  %v1065_v56 = vrot.slane %v1064_v1, 4  ;;  %3114 = vpow2.f32 %v1165_v18  ;;  %v1207_v61 = vrot.slane %v1206_v36, 4  ;;  %v1405_v21 = vrot.slane %v1404_v40, 4 }
 0x15a   : > { %v1155_v4 = vrot.slane %v1154_v48, 1  ;;  %v3103_v62 = vpop.eup %3102  ;;  %3116 = vlog2.f32 %v989_v38  ;;  %v1060_v32 = vrot.slane %v1059_v52, 2  ;;  %v1201_v34 = vmax.f32 %v1199_v29, %v1200_v51 }
 0x15b   : > { %v3105_v30 = vpop.eup %3104  ;;  %3118 = vlog2.f32 %v984_v23  ;;  %v1066_v0 = vadd.f32 %v1065_v56, %v1064_v1  ;;  %v1208_v58 = vmax.f32 %v1206_v36, %v1207_v61  ;;  %v4442_v10 = vmul.f32 1.442695, %v4414_v47 }
 0x15c   : > { %v4439_v28 = vmax.f32 %v1154_v48, %v1155_v4  ;;  %v1061_v55 = vadd.f32 %v1060_v32, %v1059_v52  ;;  %v1113_v22 = vadd.f32 %v3105_v30, %v3101_v8  ;;  %3120 = vlog2.f32 %v985_v39 }
 0x15d   : > { %v4448_v38 = vpop.eup %3106  ;;  %v1067_v24 = vrot.slane %v1066_v0, 2  ;;  %v1202_v13 = vrot.slane %v1201_v34, 2  ;;  %v1406_v49 = vadd.f32 %v1405_v21, %v1404_v40  ;;  %v1209_v15 = vrot.slane %v1208_v58, 2 }
 0x15e   : > { %v1158_v26 = vsub.f32 %v4329_v3, %v4439_v28  ;;  %v1160_v12 = vsub.f32 %v4333_v9, %v4439_v28  ;;  %v3109_v27 = vpop.eup %3108  ;;  %v1062_v7 = vrot.slane %v1061_v55, 1  ;;  %v1114_v16 = vrot.slane %v1113_v22, 4 }
 0x15f   : > { %v4450_v23 = vpop.eup %3110  ;;  %v1068_v53 = vadd.f32 %v1067_v24, %v1066_v0  ;;  %v1120_v48 = vadd.f32 %v3109_v27, %v3103_v62  ;;  %v1203_v3 = vmax.f32 %v1201_v34, %v1202_v13  ;;  %v1411_v9 = vadd.f32 %v4283_v59, %v4248_v19 }
 0x160   : > { %v1163_v18 = vmul.f32 1.442695, %v1158_v26  ;;  %v1167_v29 = vmul.f32 1.442695, %v1160_v12  ;;  %v1063_v1 = vadd.f32 %v1062_v7, %v1061_v55  ;;  %v1115_v36 = vadd.f32 %v1114_v16, %v1113_v22 }
 0x161   : > { %v3113_v39 = vpop.eup %3112  ;;  %v1069_v52 = vrot.slane %v1068_v53, 1  ;;  %v1121_v40 = vrot.slane %v1120_v48, 4  ;;  %v1204_v4 = vrot.slane %v1203_v3, 1  ;;  %v1210_v8 = vmax.f32 %v1208_v58, %v1209_v15 }
 0x162   : > { %3122 = vpow2.f32 %v1163_v18  ;;  %v1116_v51 = vrot.slane %v1115_v36, 2  ;;  %v1407_v56 = vrot.slane %v1406_v49, 2  ;;  %v1430_v34 = vmul.f32 %v4366_v46, %v4227_v50 }
 0x163   : > { %3124 = vpow2.f32 %v1167_v29  ;;  %v3115_v61 = vpop.eup %3114  ;;  %v1070_v21 = vadd.f32 %v1069_v52, %v1068_v53  ;;  %v1122_v62 = vadd.f32 %v1121_v40, %v1120_v48  ;;  %v4454_v32 = vmax.f32 %v1203_v3, %v1204_v4 }
 0x164   : > { %3126 = vlog2.f32 %v1063_v1  ;;  %v4458_v30 = vpop.eup %3116  ;;  %v1117_v0 = vadd.f32 %v1116_v51, %v1115_v36  ;;  %v1169_v55 = vadd.f32 %v3115_v61, %v3113_v39  ;;  %v1211_v22 = vrot.slane %v1210_v8, 1 }
 0x165   : > { %v1408_v26 = vadd.f32 %v1407_v56, %v1406_v49  ;;  %v4460_v12 = vpop.eup %3118  ;;  %3128 = vlog2.f32 %v1070_v21  ;;  %v1123_v24 = vrot.slane %v1122_v62, 2  ;;  %v1213_v58 = vsub.f32 %v4344_v41, %v4454_v32 }
 0x166   : > { %v1215_v13 = vsub.f32 %v4422_v17, %v4454_v32  ;;  %v1118_v27 = vrot.slane %v1117_v0, 1  ;;  %v1170_v7 = vrot.slane %v1169_v55, 4  ;;  %v4466_v16 = vmax.f32 %v1210_v8, %v1211_v22  ;;  %v4468_v15 = vpop.eup %3120 }
 0x167   : > { %v1409_v18 = vrot.slane %v1408_v26, 1  ;;  %v1124_v53 = vadd.f32 %v1123_v24, %v1122_v62  ;;  %v1217_v48 = vmul.f32 1.442695, %v1213_v58  ;;  %v1412_v29 = vrot.slane %v1411_v9, 4 }
 0x168   : > { %v1221_v49 = vmul.f32 1.442695, %v1215_v13  ;;  %v1119_v3 = vadd.f32 %v1118_v27, %v1117_v0  ;;  %v1171_v1 = vadd.f32 %v1170_v7, %v1169_v55  ;;  %v1214_v36 = vsub.f32 %v4355_v43, %v4466_v16 }
 0x169   : > { %v1216_v41 = vsub.f32 %v4431_v31, %v4466_v16  ;;  %v1125_v17 = vrot.slane %v1124_v53, 1  ;;  %3130 = vpow2.f32 %v1217_v48  ;;  %v1410_v39 = vadd.f32 %v1409_v18, %v1408_v26 }
 0x16a   : > { %v1413_v52 = vadd.f32 %v1412_v29, %v1411_v9  ;;  %3132 = vlog2.f32 %v1119_v3  ;;  %v1172_v4 = vrot.slane %v1171_v1, 2  ;;  %v1219_v51 = vmul.f32 1.442695, %v1214_v36 }
 0x16b   : > { %v1223_v8 = vmul.f32 1.442695, %v1216_v41  ;;  %v1126_v61 = vadd.f32 %v1125_v17, %v1124_v53  ;;  %3134 = vpow2.f32 %v1221_v49  ;;  %v1431_v62 = vmul.f32 %v4374_v11, %v4248_v19 }
 0x16c   : > { %v3123_v40 = vpop.eup %3122  ;;  %v1414_v21 = vrot.slane %v1413_v52, 2  ;;  %v1173_v0 = vadd.f32 %v1172_v4, %v1171_v1  ;;  %3136 = vpow2.f32 %v1219_v51  ;;  %v1432_v31 = vmul.f32 %v4337_v20, %v4261_v5 }
 0x16d   : > { %v3125_v56 = vpop.eup %3124  ;;  %3138 = vlog2.f32 %v1126_v61  ;;  %v1433_v26 = vmul.f32 %v4362_v45, %v4283_v59  ;;  %v4483_v41 = vmul.f32 0.6931472, %v4450_v23 }
 0x16e   : > { %v3127_v43 = vpop.eup %3126  ;;  %v1176_v55 = vadd.f32 %v3125_v56, %v3123_v40  ;;  %v1415_v22 = vadd.f32 %v1414_v21, %v1413_v52  ;;  %v1174_v24 = vrot.slane %v1173_v0, 1  ;;  %3140 = vpow2.f32 %v1223_v8 }
 0x16f   : > { %v1072_v9 = vmul.f32 0.6931472, %v3127_v43  ;;  %v1434_v13 = vadd.f32 %v1432_v31, %v1430_v34  ;;  %v3129_v27 = vpop.eup %3128  ;;  %3142 = vlog2.f32 %v1410_v39  ;;  %v1441_v53 = vadd.f32 %v1433_v26, %v1431_v62 }
 0x170   : > { %v1177_v58 = vrot.slane %v1176_v55, 4  ;;  %v1416_v18 = vrot.slane %v1415_v22, 1  ;;  %v1074_v48 = vmul.f32 0.6931472, %v3129_v27  ;;  %v1175_v49 = vadd.f32 %v1174_v24, %v1173_v0 }
 0x171   : > { %v1075_v7 = vadd.f32 %v1072_v9, %v4378_v37  ;;  %3144 = vpow2.f32 %v4407_v54  ;;  %v1435_v1 = vrot.slane %v1434_v13, 4  ;;  %v1442_v36 = vrot.slane %v1441_v53, 4 }
 0x172   : > { %v1178_v29 = vadd.f32 %v1177_v58, %v1176_v55  ;;  %v1417_v3 = vadd.f32 %v1416_v18, %v1415_v22  ;;  %3146 = vrcp.f32 %v1410_v39  ;;  %v1076_v34 = vadd.f32 %v1074_v48, %v4386_v25 }
 0x173   : > { %3148 = vlog2.f32 %v1175_v49  ;;  %v3131_v37 = vpop.eup %3130  ;;  %v1077_v52 = vadd.f32 -1.0000005e-06, %v1075_v7  ;;  %v1436_v40 = vadd.f32 %v1435_v1, %v1434_v13  ;;  %v1443_v4 = vadd.f32 %v1442_v36, %v1441_v53 }
 0x174   : > { %v1179_v17 = vrot.slane %v1178_v29, 2  ;;  %3150 = vlog2.f32 %v1417_v3  ;;  %v3133_v51 = vpop.eup %3132  ;;  %v4487_v8 = vmul.f32 0.6931472, %v4460_v12  ;;  %v4490_v54 = vmul.f32 0.6931472, %v4458_v30 }
 0x175   : > { %3152 = vrcp.f32 %v1417_v3  ;;  %v3135_v23 = vpop.eup %3134  ;;  %v1078_v56 = vadd.f32 -1.0000005e-06, %v1076_v34  ;;  %v1128_v61 = vmul.f32 0.6931472, %v3133_v51  ;;  %v1437_v25 = vrot.slane %v1436_v40, 2 }
 0x176   : > { %v1180_v39 = vadd.f32 %v1179_v17, %v1178_v29  ;;  %v1444_v21 = vrot.slane %v1443_v4, 2  ;;  %v3137_v62 = vpop.eup %3136  ;;  %v4493_v43 = vmul.f32 0.6931472, %v4468_v15  ;;  %v1225_v55 = vadd.f32 %v3135_v23, %v3131_v37 }
 0x177   : > { %v1450_v12 = vmul.f32 %v4352_v42, %v4227_v50  ;;  %v3139_v31 = vpop.eup %3138  ;;  %v1079_v30 = vsub.f32 %v1077_v52, %v4487_v8  ;;  %v1131_v9 = vadd.f32 %v1128_v61, %v4380_v33  ;;  %v1438_v22 = vadd.f32 %v1437_v25, %v1436_v40 }
 0x178   : > { %v1181_v0 = vrot.slane %v1180_v39, 1  ;;  %v1445_v26 = vadd.f32 %v1444_v21, %v1443_v4  ;;  %v3141_v24 = vpop.eup %3140  ;;  %v1130_v58 = vmul.f32 0.6931472, %v3139_v31  ;;  %v1226_v27 = vrot.slane %v1225_v55, 4 }
 0x179   : > { %v1451_v15 = vmul.f32 %v4357_v35, %v4248_v19  ;;  %v3143_v7 = vpop.eup %3142  ;;  %v1080_v18 = vsub.f32 %v1078_v56, %v4493_v43  ;;  %v1232_v53 = vadd.f32 %v3141_v24, %v3137_v62  ;;  %v1439_v48 = vrot.slane %v1438_v22, 1 }
 0x17a   : > { %v1182_v13 = vadd.f32 %v1181_v0, %v1180_v39  ;;  %v1446_v50 = vrot.slane %v1445_v26, 1  ;;  %v1132_v29 = vadd.f32 %v1130_v58, %v4392_v14  ;;  %v1227_v33 = vadd.f32 %v1226_v27, %v1225_v55  ;;  %v5825_v58 = vld [vmem:[#allocation16_spill] sm:$0xff] }
 0x17b   : > { %v4502_v49 = vpop.eup %3144  ;;  %v1452_v3 = vmul.f32 %v4271_v2, %v4261_v5  ;;  %v1233_v36 = vrot.slane %v1232_v53, 4  ;;  %v1440_v34 = vadd.f32 %v1439_v48, %v1438_v22  ;;  %v1453_v17 = vmul.f32 %v4283_v59, %v4277_v63 }
 0x17c   : > { %3154 = vlog2.f32 %v1182_v13  ;;  %v4507_v1 = vpop.eup %3146  ;;  %v1447_v19 = vadd.f32 %v1446_v50, %v1445_v26  ;;  %v4512_v52 = vsub.f32 %v1079_v30, %v4483_v41  ;;  %v4514_v40 = vadd.f32 -1.0000005e-06, %v1131_v9  ;;  %v5824_v26 = vld [vmem:[#allocation17_spill] sm:$0xff] }
 0x17d   : > { %v3149_v37 = vpop.eup %3148  ;;  %v1228_v14 = vrot.slane %v1227_v33, 2  ;;  %v1419_v4 = vmul.f32 0.6931472, %v3143_v7  ;;  %v4517_v39 = vsub.f32 %v1080_v18, %v4490_v54  ;;  %v4519_v5 = vadd.f32 -1.0000005e-06, %v1132_v29 }
 0x17e   : > { %5822 = vst [vmem:[#allocation24_spill] sm:$0xff] %v4512_v52  ;;  %v3151_v51 = vpop.eup %3150  ;;  %v1184_v23 = vmul.f32 0.6931472, %v3149_v37  ;;  %v1234_v56 = vadd.f32 %v1233_v36, %v1232_v53  ;;  %v1448_v21 = vmul.f32 %v4507_v1, %v1440_v34  ;;  %v1454_v62 = vadd.f32 %v1452_v3, %v1450_v12  ;;  %v5827_v36 = vld [vmem:[#allocation20_spill] sm:$0xff] }
 0x17f   : > { %5823 = vst [vmem:[#allocation47_spill] sm:$0xff] %v4517_v39  ;;  %v4521_v61 = vpop.eup %3152  ;;  %v1229_v25 = vadd.f32 %v1228_v14, %v1227_v33  ;;  %v1421_v59 = vmul.f32 0.6931472, %v3151_v51  ;;  %v1461_v30 = vadd.f32 %v1453_v17, %v1451_v15  ;;  %v1422_v24 = vsub.f32 %v5824_v26, %v1419_v4  ;;  %v5828_v17 = vld [vmem:[#allocation22_spill] sm:$0xff]  ;;  %v5840_v39 = vld [vmem:[#allocation37_spill] sm:$0xff] }
 0x180   : > { %v1187_v0 = vadd.f32 %v1184_v23, %v4410_v57  ;;  %v1235_v55 = vrot.slane %v1234_v56, 2  ;;  %v1449_v31 = vmul.f32 %v4521_v61, %v1447_v19  ;;  %v1424_v13 = vsub.f32 %v5825_v58, %v1419_v4  ;;  %v5826_v57 = vld [vmem:[#allocation15_spill] sm:$0xff]  ;;  %v5829_v4 = vld [vmem:[#allocation41_spill] sm:$0xff] }
 0x181   : > { %v1230_v22 = vrot.slane %v1229_v25, 1  ;;  %v1455_v18 = vrot.slane %v1454_v62, 4  ;;  %v1462_v12 = vrot.slane %v1461_v30, 4  ;;  %v1423_v48 = vsub.f32 %v5826_v57, %v1421_v59  ;;  %v5834_v57 = vld [vmem:[#allocation25_spill] sm:$0xff] }
 0x182   : > { %v1236_v7 = vadd.f32 %v1235_v55, %v1234_v56  ;;  %v1470_v50 = vmul.f32 0.999999, %v1448_v21  ;;  %v1471_v29 = vmul.f32 0.999999, %v1449_v31  ;;  %v4534_v34 = vadd.f32 %v1422_v24, %v5827_v36  ;;  %v5830_v31 = vld [vmem:[#allocation19_spill] sm:$0xff]  ;;  %v5832_v24 = vld [vmem:[#allocation33_spill] sm:$0xff] }
 0x183   : > { %v1231_v53 = vadd.f32 %v1230_v22, %v1229_v25  ;;  %v1456_v33 = vadd.f32 %v1455_v18, %v1454_v62  ;;  %v1463_v3 = vadd.f32 %v1462_v12, %v1461_v30  ;;  %v1425_v37 = vsub.f32 %v5828_v17, %v1421_v59  ;;  %v5831_v30 = vld [vmem:[#allocation21_spill] sm:$0xff]  ;;  %v5833_v12 = vld [vmem:[#allocation35_spill] sm:$0xff]  ;;  %v5838_v17 = vld [vmem:[#allocation26_spill] sm:$0xff] }
 0x184   : > { %v1237_v15 = vrot.slane %v1236_v7, 1  ;;  %v1472_v14 = vadd.f32 5e-07, %v1470_v50  ;;  %v4538_v51 = vadd.f32 %v1423_v48, %v5829_v4  ;;  %v1473_v55 = vadd.f32 5e-07, %v1471_v29  ;;  %v5835_v50 = vld [vmem:[#allocation29_spill] sm:$0xff] }
 0x185   : > { %3156 = vlog2.f32 %v1231_v53  ;;  %v1457_v25 = vrot.slane %v1456_v33, 2  ;;  %v1464_v21 = vrot.slane %v1463_v3, 2  ;;  %v4541_v62 = vadd.f32 %v1424_v13, %v5830_v31  ;;  %v5836_v29 = vld [vmem:[#allocation34_spill] sm:$0xff] }
 0x186   : > { %v3155_v19 = vpop.eup %3154  ;;  %v1238_v56 = vadd.f32 %v1237_v15, %v1236_v7  ;;  %3158 = vlog2.f32 %v1472_v14  ;;  %v4544_v22 = vadd.f32 %v1425_v37, %v5831_v30  ;;  %v4549_v58 = vadd.f32 %v4534_v34, %v5832_v24 }
 0x187   : > { %v1186_v23 = vmul.f32 0.6931472, %v3155_v19  ;;  %v1458_v59 = vadd.f32 %v1457_v25, %v1456_v33  ;;  %v1189_v18 = vadd.f32 -1.0000005e-06, %v1187_v0  ;;  %v1465_v7 = vadd.f32 %v1464_v21, %v1463_v3  ;;  %v5837_v3 = vld [vmem:[#allocation36_spill] sm:$0xff]  ;;  %v5839_v25 = vld [vmem:[#allocation30_spill] sm:$0xff] }
 0x188   : > { %3160 = vlog2.f32 %v1238_v56  ;;  %v4553_v53 = vadd.f32 %v4538_v51, %v5833_v12  ;;  %v4557_v13 = vadd.f32 %v4541_v62, %v5834_v57  ;;  %v4565_v15 = vadd.f32 %v4534_v34, %v5836_v29  ;;  %v5841_v29 = vld [vmem:[#allocation38_spill] sm:$0xff] }
 0x189   : > { %v1188_v26 = vadd.f32 %v1186_v23, %v4439_v28  ;;  %v1459_v48 = vrot.slane %v1458_v59, 1  ;;  %3162 = vlog2.f32 %v1473_v55  ;;  %v4561_v28 = vadd.f32 %v4544_v22, %v5835_v50 }
 0x18a   : > { %v1466_v0 = vrot.slane %v1465_v7, 1  ;;  %v1516_v33 = vmax.f32 %v4549_v58, %v4557_v13  ;;  %v4571_v19 = vadd.f32 %v4538_v51, %v5837_v3  ;;  %v4575_v37 = vadd.f32 %v4541_v62, %v5838_v17 }
 0x18b   : > { %v1190_v14 = vadd.f32 -1.0000005e-06, %v1188_v26  ;;  %v1460_v23 = vadd.f32 %v1459_v48, %v1458_v59  ;;  %v1523_v56 = vmax.f32 %v4553_v53, %v4561_v28  ;;  %v4581_v55 = vadd.f32 %v4544_v22, %v5839_v25 }
 0x18c   : > { %v1467_v21 = vadd.f32 %v1466_v0, %v1465_v7  ;;  %v1517_v27 = vrot.slane %v1516_v33, 4  ;;  %v1572_v9 = vmax.f32 %v4565_v15, %v4575_v37  ;;  %v4587_v52 = vadd.f32 %v4534_v34, %v5840_v39 }
 0x18d   : > { %v1191_v17 = vsub.f32 %v1189_v18, %v4487_v8  ;;  %v1468_v26 = vmul.f32 %v4507_v1, %v1460_v23  ;;  %v1524_v59 = vrot.slane %v1523_v56, 4  ;;  %v1579_v48 = vmax.f32 %v4571_v19, %v4581_v55 }
 0x18e   : > { %v1469_v25 = vmul.f32 %v4521_v61, %v1467_v21  ;;  %v1518_v7 = vmax.f32 %v1516_v33, %v1517_v27  ;;  %v1573_v0 = vrot.slane %v1572_v9, 4  ;;  %v4596_v50 = vadd.f32 %v4538_v51, %v5841_v29  ;;  %v5844_v27 = vld [vmem:[#allocation27_spill] sm:$0xff] }
 0x18f   : > { %v3157_v3 = vpop.eup %3156  ;;  %v1192_v39 = vsub.f32 %v1190_v14, %v4493_v43  ;;  %v1474_v12 = vmul.f32 0.999999, %v1468_v26  ;;  %v1525_v18 = vmax.f32 %v1523_v56, %v1524_v59  ;;  %v5842_v1 = vsub.f32 %v4514_v40, %v4487_v8 }
 0x190   : > { %v1240_v57 = vmul.f32 0.6931472, %v3157_v3  ;;  %v3159_v24 = vpop.eup %3158  ;;  %v1519_v30 = vrot.slane %v1518_v7, 2  ;;  %v1574_v61 = vmax.f32 %v1572_v9, %v1573_v0  ;;  %v4607_v33 = vadd.f32 %v4541_v62, %v5844_v27 }
 0x191   : > { %v4603_v23 = vsub.f32 %v5842_v1, %v4483_v41  ;;  %v1475_v14 = vmul.f32 0.999999, %v1469_v25  ;;  %v1526_v3 = vrot.slane %v1525_v18, 2  ;;  %v1580_v26 = vrot.slane %v1579_v48, 4 }
 0x192   : > { %v3161_v21 = vpop.eup %3160  ;;  %v1243_v29 = vadd.f32 %v1240_v57, %v4454_v32  ;;  %v5845_v56 = vsub.f32 %v4519_v5, %v4493_v43  ;;  %v1520_v1 = vmax.f32 %v1518_v7, %v1519_v30  ;;  %v4617_v0 = vsub.f32 %v1191_v17, %v4483_v41  ;;  %v5849_v30 = vld [vmem:[#allocation31_spill] sm:$0xff] }
 0x193   : > { %5843 = vst [vmem:[#allocation17_spill] sm:$0xff] %v4603_v23  ;;  %v1242_v40 = vmul.f32 0.6931472, %v3161_v21  ;;  %v1575_v23 = vrot.slane %v1574_v61, 2  ;;  %v3163_v9 = vpop.eup %3162  ;;  %v4620_v27 = vsub.f32 %v1192_v39, %v4490_v54  ;;  %v1476_v32 = vadd.f32 5e-07, %v1474_v12 }
 0x194   : > { %v4614_v59 = vsub.f32 %v5845_v56, %v4490_v54  ;;  %5847 = vst [vmem:[#allocation15_spill] sm:$0xff] %v4617_v0  ;;  %v1527_v57 = vmax.f32 %v1525_v18, %v1526_v3  ;;  %v4623_v31 = vmul.f32 0.6931472, %v3159_v24  ;;  %v1521_v4 = vrot.slane %v1520_v1, 1 }
 0x195   : > { %5848 = vst [vmem:[#allocation22_spill] sm:$0xff] %v4620_v27  ;;  %v1244_v25 = vadd.f32 %v1242_v40, %v4466_v16  ;;  %v1576_v5 = vmax.f32 %v1574_v61, %v1575_v23  ;;  %v1477_v56 = vadd.f32 5e-07, %v1475_v14  ;;  %v1581_v21 = vmax.f32 %v1579_v48, %v1580_v26 }
 0x196   : > { %5846 = vst [vmem:[#allocation16_spill] sm:$0xff] %v4614_v59  ;;  %v1528_v59 = vrot.slane %v1527_v57, 1  ;;  %v4627_v7 = vadd.f32 %v4544_v22, %v5849_v30  ;;  %v4629_v17 = vadd.f32 -1.0000005e-06, %v1243_v29  ;;  %v4631_v0 = vmax.f32 %v1520_v1, %v1521_v4 }
 0x197   : > { %v1577_v39 = vrot.slane %v1576_v5, 1  ;;  %v1628_v12 = vmax.f32 %v4587_v52, %v4607_v33  ;;  %v4635_v16 = vmul.f32 0.6931472, %v3163_v9  ;;  %v1582_v18 = vrot.slane %v1581_v21, 2 }
 0x198   : > { %v4637_v24 = vmax.f32 %v1527_v57, %v1528_v59  ;;  %v1635_v48 = vmax.f32 %v4596_v50, %v4627_v7  ;;  %3164 = vlog2.f32 %v1476_v32  ;;  %v1530_v23 = vsub.f32 %v4549_v58, %v4631_v0 }
 0x199   : > { %v1532_v4 = vsub.f32 %v4557_v13, %v4631_v0  ;;  %v4645_v29 = vmax.f32 %v1576_v5, %v1577_v39  ;;  %v1583_v3 = vmax.f32 %v1581_v21, %v1582_v18  ;;  %v1629_v26 = vrot.slane %v1628_v12, 4 }
 0x19a   : > { %v1531_v61 = vsub.f32 %v4553_v53, %v4637_v24  ;;  %v1533_v14 = vsub.f32 %v4561_v28, %v4637_v24  ;;  %3166 = vlog2.f32 %v1477_v56  ;;  %v1534_v59 = vmul.f32 1.442695, %v1530_v23  ;;  %v5850_v56 = vld [vmem:[#allocation39_spill] sm:$0xff] }
 0x19b   : > { %v1538_v40 = vmul.f32 1.442695, %v1532_v4  ;;  %v1586_v1 = vsub.f32 %v4565_v15, %v4645_v29  ;;  %v1584_v32 = vrot.slane %v1583_v3, 1  ;;  %v1588_v13 = vsub.f32 %v4575_v37, %v4645_v29 }
 0x19c   : > { %v1536_v58 = vmul.f32 1.442695, %v1531_v61  ;;  %v1540_v9 = vmul.f32 1.442695, %v1533_v14  ;;  %3168 = vpow2.f32 %v1534_v59  ;;  %v1630_v53 = vmax.f32 %v1628_v12, %v1629_v26 }
 0x19d   : > { %v1590_v57 = vmul.f32 1.442695, %v1586_v1  ;;  %v1636_v5 = vrot.slane %v1635_v48, 4  ;;  %v4655_v28 = vmax.f32 %v1583_v3, %v1584_v32  ;;  %v1594_v21 = vmul.f32 1.442695, %v1588_v13  ;;  %v5852_v1 = vld [vmem:[#allocation42_spill] sm:$0xff] }
 0x19e   : > { %3170 = vpow2.f32 %v1536_v58  ;;  %v4659_v39 = vadd.f32 %v4534_v34, %v5850_v56  ;;  %v1631_v18 = vrot.slane %v1630_v53, 2  ;;  %v4663_v4 = vadd.f32 -1.0000005e-06, %v1244_v25  ;;  %v5851_v34 = vld [vmem:[#allocation40_spill] sm:$0xff] }
 0x19f   : > { %3172 = vpow2.f32 %v1538_v40  ;;  %v1637_v23 = vmax.f32 %v1635_v48, %v1636_v5  ;;  %v1587_v37 = vsub.f32 %v4571_v19, %v4655_v28  ;;  %v1589_v12 = vsub.f32 %v4581_v55, %v4655_v28 }
 0x1a0   : > { %3174 = vpow2.f32 %v1540_v9  ;;  %v1632_v61 = vmax.f32 %v1630_v53, %v1631_v18  ;;  %v4671_v3 = vadd.f32 %v4538_v51, %v5851_v34  ;;  %v4675_v25 = vadd.f32 %v4541_v62, %v5820_v60 }
 0x1a1   : > { %3176 = vpow2.f32 %v1590_v57  ;;  %v1638_v14 = vrot.slane %v1637_v23, 2  ;;  %v1592_v26 = vmul.f32 1.442695, %v1587_v37  ;;  %v1596_v59 = vmul.f32 1.442695, %v1589_v12 }
 0x1a2   : > { %3178 = vpow2.f32 %v1594_v21  ;;  %v4677_v48 = vpop.eup %3164  ;;  %v1633_v19 = vrot.slane %v1632_v61, 1  ;;  %v4681_v55 = vadd.f32 %v4544_v22, %v5821_v6  ;;  %v1684_v51 = vmax.f32 %v4659_v39, %v4675_v25 }
 0x1a3   : > { %v1639_v40 = vmax.f32 %v1637_v23, %v1638_v14  ;;  %3180 = vpow2.f32 %v4442_v10  ;;  %v1846_v58 = vadd.f32 %v4502_v49, %v5852_v1  ;;  %v1872_v62 = vmul.f32 %v4366_v46, %v5852_v1 }
 0x1a4   : > { %3182 = vpow2.f32 %v1592_v26  ;;  %v4690_v9 = vpop.eup %3166  ;;  %v4692_v32 = vmax.f32 %v1632_v61, %v1633_v19  ;;  %v1691_v22 = vmax.f32 %v4671_v3, %v4681_v55  ;;  %v1685_v10 = vrot.slane %v1684_v51, 4 }
 0x1a5   : > { %3184 = vpow2.f32 %v1596_v59  ;;  %v1640_v13 = vrot.slane %v1639_v40, 1  ;;  %v1847_v57 = vrot.slane %v1846_v58, 4  ;;  %v4698_v53 = vmul.f32 %v4448_v38, %v4374_v11 }
 0x1a6   : > { %v1874_v5 = vmul.f32 %v4502_v49, %v4337_v20  ;;  %v3169_v21 = vpop.eup %3168  ;;  %v1642_v23 = vsub.f32 %v4587_v52, %v4692_v32  ;;  %v1644_v37 = vsub.f32 %v4607_v33, %v4692_v32  ;;  %v1692_v12 = vrot.slane %v1691_v22, 4 }
 0x1a7   : > { %v4702_v18 = vmax.f32 %v1639_v40, %v1640_v13  ;;  %v1686_v14 = vmax.f32 %v1684_v51, %v1685_v10  ;;  %v1848_v26 = vadd.f32 %v1847_v57, %v1846_v58  ;;  %v4712_v19 = vmul.f32 %v4352_v42, %v5852_v1 }
 0x1a8   : > { %v3171_v61 = vpop.eup %3170  ;;  %v4708_v59 = vadd.f32 %v1874_v5, %v1872_v62  ;;  %v1646_v13 = vmul.f32 1.442695, %v1642_v23  ;;  %v1650_v27 = vmul.f32 1.442695, %v1644_v37  ;;  %v1693_v51 = vmax.f32 %v1691_v22, %v1692_v12 }
 0x1a9   : > { %v3173_v15 = vpop.eup %3172  ;;  %v1643_v40 = vsub.f32 %v4596_v50, %v4702_v18  ;;  %v1645_v52 = vsub.f32 %v4627_v7, %v4702_v18  ;;  %v1687_v11 = vrot.slane %v1686_v14, 2  ;;  %v1849_v58 = vrot.slane %v1848_v26, 2 }
 0x1aa   : > { %v3175_v33 = vpop.eup %3174  ;;  %v1542_v20 = vadd.f32 %v3173_v15, %v3169_v21  ;;  %3186 = vpow2.f32 %v1646_v13  ;;  %v1694_v50 = vrot.slane %v1693_v51, 2 }
 0x1ab   : > { %v3177_v62 = vpop.eup %3176  ;;  %v1549_v10 = vadd.f32 %v3175_v33, %v3171_v61  ;;  %v1648_v57 = vmul.f32 1.442695, %v1643_v40  ;;  %v1652_v1 = vmul.f32 1.442695, %v1645_v52  ;;  %3188 = vpow2.f32 %v1650_v27 }
 0x1ac   : > { %v3179_v5 = vpop.eup %3178  ;;  %v1543_v42 = vrot.slane %v1542_v20, 4  ;;  %v1688_v46 = vmax.f32 %v1686_v14, %v1687_v11  ;;  %v1850_v37 = vadd.f32 %v1849_v58, %v1848_v26  ;;  %v1695_v12 = vmax.f32 %v1693_v51, %v1694_v50 }
 0x1ad   : > { %v4718_v6 = vpop.eup %3180  ;;  %v1550_v7 = vrot.slane %v1549_v10, 4  ;;  %v1598_v23 = vadd.f32 %v3179_v5, %v3177_v62  ;;  %3190 = vpow2.f32 %v1648_v57 }
 0x1ae   : > { %v3183_v15 = vpop.eup %3182  ;;  %v1544_v21 = vadd.f32 %v1543_v42, %v1542_v20  ;;  %3192 = vpow2.f32 %v1652_v1  ;;  %v1689_v22 = vrot.slane %v1688_v46, 1  ;;  %v1851_v52 = vrot.slane %v1850_v37, 1 }
 0x1af   : > { %v3185_v61 = vpop.eup %3184  ;;  %v1551_v13 = vadd.f32 %v1550_v7, %v1549_v10  ;;  %v1599_v40 = vrot.slane %v1598_v23, 4  ;;  %v1853_v27 = vadd.f32 %v4718_v6, %v4448_v38  ;;  %v1696_v60 = vrot.slane %v1695_v12, 1 }
 0x1b0   : > { %v1545_v11 = vrot.slane %v1544_v21, 2  ;;  %v1605_v14 = vadd.f32 %v3185_v61, %v3183_v15  ;;  %v4722_v33 = vmax.f32 %v1688_v46, %v1689_v22  ;;  %v4724_v26 = vadd.f32 %v1851_v52, %v1850_v37 }
 0x1b1   : > { %v1552_v62 = vrot.slane %v1551_v13, 2  ;;  %v1600_v57 = vadd.f32 %v1599_v40, %v1598_v23  ;;  %v1854_v42 = vrot.slane %v1853_v27, 4  ;;  %v4726_v51 = vmax.f32 %v1695_v12, %v1696_v60 }
 0x1b2   : > { %v1546_v20 = vadd.f32 %v1545_v11, %v1544_v21  ;;  %v1606_v58 = vrot.slane %v1605_v14, 4  ;;  %v1698_v10 = vsub.f32 %v4659_v39, %v4722_v33  ;;  %v1700_v50 = vsub.f32 %v4675_v25, %v4722_v33 }
 0x1b3   : > { %v1553_v1 = vadd.f32 %v1552_v62, %v1551_v13  ;;  %v1601_v5 = vrot.slane %v1600_v57, 2  ;;  %v1855_v46 = vadd.f32 %v1854_v42, %v1853_v27  ;;  %v1699_v23 = vsub.f32 %v4671_v3, %v4726_v51 }
 0x1b4   : > { %v1547_v7 = vrot.slane %v1546_v20, 1  ;;  %v1607_v15 = vadd.f32 %v1606_v58, %v1605_v14  ;;  %v1701_v37 = vsub.f32 %v4681_v55, %v4726_v51  ;;  %v3187_v21 = vpop.eup %3186  ;;  %v1702_v12 = vmul.f32 1.442695, %v1698_v10 }
 0x1b5   : > { %v1554_v60 = vrot.slane %v1553_v1, 1  ;;  %v1602_v22 = vadd.f32 %v1601_v5, %v1600_v57  ;;  %v1706_v61 = vmul.f32 1.442695, %v1700_v50  ;;  %v3189_v39 = vpop.eup %3188  ;;  %v1704_v52 = vmul.f32 1.442695, %v1699_v23 }
 0x1b6   : > { %v1548_v13 = vadd.f32 %v1547_v7, %v1546_v20  ;;  %v1608_v40 = vrot.slane %v1607_v15, 2  ;;  %v1708_v11 = vmul.f32 1.442695, %v1701_v37  ;;  %v1654_v14 = vadd.f32 %v3189_v39, %v3187_v21 }
 0x1b7   : > { %v3191_v25 = vpop.eup %3190  ;;  %v1555_v27 = vadd.f32 %v1554_v60, %v1553_v1  ;;  %v1603_v62 = vrot.slane %v1602_v22, 1  ;;  %3194 = vpow2.f32 %v1702_v12  ;;  %v1856_v58 = vrot.slane %v1855_v46, 2 }
 0x1b8   : > { %v3193_v42 = vpop.eup %3192  ;;  %3196 = vlog2.f32 %v1548_v13  ;;  %v1609_v3 = vadd.f32 %v1608_v40, %v1607_v15  ;;  %v1875_v55 = vmul.f32 %v4718_v6, %v4362_v45  ;;  %v1655_v10 = vrot.slane %v1654_v14, 4 }
 0x1b9   : > { %3198 = vlog2.f32 %v1555_v27  ;;  %v1604_v57 = vadd.f32 %v1603_v62, %v1602_v22  ;;  %v1661_v5 = vadd.f32 %v3193_v42, %v3191_v25  ;;  %v1857_v50 = vadd.f32 %v1856_v58, %v1855_v46 }
 0x1ba   : > { %v1610_v20 = vrot.slane %v1609_v3, 1  ;;  %3200 = vpow2.f32 %v1704_v52  ;;  %v1877_v7 = vrot.slane %v4708_v59, 4  ;;  %v1656_v1 = vadd.f32 %v1655_v10, %v1654_v14 }
 0x1bb   : > { %3202 = vlog2.f32 %v1604_v57  ;;  %v1662_v23 = vrot.slane %v1661_v5, 4  ;;  %v1883_v37 = vadd.f32 %v1875_v55, %v4698_v53  ;;  %v1858_v15 = vrot.slane %v1857_v50, 1 }
 0x1bc   : > { %v1611_v21 = vadd.f32 %v1610_v20, %v1609_v3  ;;  %3204 = vpow2.f32 %v1706_v61  ;;  %v1878_v60 = vadd.f32 %v1877_v7, %v4708_v59  ;;  %v1657_v12 = vrot.slane %v1656_v1, 2 }
 0x1bd   : > { %v1663_v39 = vadd.f32 %v1662_v23, %v1661_v5  ;;  %3206 = vpow2.f32 %v1708_v11  ;;  %v1884_v22 = vrot.slane %v1883_v37, 4  ;;  %v1859_v13 = vadd.f32 %v1858_v15, %v1857_v50 }
 0x1be   : > { %3208 = vlog2.f32 %v1611_v21  ;;  %v1879_v40 = vrot.slane %v1878_v60, 2  ;;  %v1893_v46 = vmul.f32 %v4448_v38, %v4357_v35  ;;  %v1658_v52 = vadd.f32 %v1657_v12, %v1656_v1 }
 0x1bf   : > { %v1664_v25 = vrot.slane %v1663_v39, 2  ;;  %3210 = vlog2.f32 %v4724_v26  ;;  %v1885_v53 = vadd.f32 %v1884_v22, %v1883_v37  ;;  %v5853_v61 = vsub.f32 %v4629_v17, %v4487_v8 }
 0x1c0   : > { %3212 = vlog2.f32 %v1859_v13  ;;  %v1894_v11 = vmul.f32 %v4502_v49, %v4271_v2  ;;  %v1895_v27 = vmul.f32 %v4718_v6, %v4277_v63  ;;  %v1659_v38 = vrot.slane %v1658_v52, 1 }
 0x1c1   : > { %v4748_v59 = vsub.f32 %v5853_v61, %v4483_v41  ;;  %v3195_v62 = vpop.eup %3194  ;;  %v1665_v14 = vadd.f32 %v1664_v25, %v1663_v39  ;;  %v1880_v42 = vadd.f32 %v1879_v40, %v1878_v60  ;;  %v1886_v3 = vrot.slane %v1885_v53, 2 }
 0x1c2   : > { %v3197_v58 = vpop.eup %3196  ;;  %v1248_v55 = vsub.f32 %v4663_v4, %v4493_v43  ;;  %3214 = vrcp.f32 %v4724_v26  ;;  %v1896_v17 = vadd.f32 %v1894_v11, %v4712_v19  ;;  %v1903_v57 = vadd.f32 %v1895_v27, %v1893_v46 }
 0x1c3   : > { %v3199_v10 = vpop.eup %3198  ;;  %v1557_v5 = vmul.f32 0.6931472, %v3197_v58  ;;  %v1660_v49 = vadd.f32 %v1659_v38, %v1658_v52  ;;  %v1666_v20 = vrot.slane %v1665_v14, 1  ;;  %v1887_v50 = vadd.f32 %v1886_v3, %v1885_v53 }
 0x1c4   : > { %v3201_v6 = vpop.eup %3200  ;;  %v1559_v7 = vmul.f32 0.6931472, %v3199_v10  ;;  %3216 = vrcp.f32 %v1859_v13  ;;  %v1897_v1 = vrot.slane %v1896_v17, 4  ;;  %v1904_v23 = vrot.slane %v1903_v57, 4 }
 0x1c5   : > { %v3203_v37 = vpop.eup %3202  ;;  %v1560_v21 = vadd.f32 %v1557_v5, %v4631_v0  ;;  %v1667_v15 = vadd.f32 %v1666_v20, %v1665_v14  ;;  %3218 = vlog2.f32 %v1660_v49  ;;  %v1881_v4 = vrot.slane %v1880_v42, 1 }
 0x1c6   : > { %v3205_v26 = vpop.eup %3204  ;;  %v4760_v19 = vsub.f32 %v1248_v55, %v4490_v54  ;;  %v1561_v60 = vadd.f32 %v1559_v7, %v4637_v24  ;;  %v1613_v12 = vmul.f32 0.6931472, %v3203_v37  ;;  %v1888_v39 = vrot.slane %v1887_v50, 1 }
 0x1c7   : > { %v3207_v22 = vpop.eup %3206  ;;  %v4764_v40 = vmul.f32 0.6931472, %v4677_v48  ;;  %3220 = vlog2.f32 %v1667_v15  ;;  %v1710_v13 = vadd.f32 %v3205_v26, %v3195_v62  ;;  %v1898_v46 = vadd.f32 %v1897_v1, %v1896_v17 }
 0x1c8   : > { %v3209_v52 = vpop.eup %3208  ;;  %v4766_v0 = vadd.f32 -1.0000005e-06, %v1560_v21  ;;  %v1616_v25 = vadd.f32 %v1613_v12, %v4645_v29  ;;  %v1717_v53 = vadd.f32 %v3207_v22, %v3201_v6  ;;  %v1905_v61 = vadd.f32 %v1904_v23, %v1903_v57 }
 0x1c9   : > { %v3211_v11 = vpop.eup %3210  ;;  %v1563_v27 = vadd.f32 -1.0000005e-06, %v1561_v60  ;;  %v1615_v38 = vmul.f32 0.6931472, %v3209_v52  ;;  %v1711_v24 = vrot.slane %v1710_v13, 4  ;;  %v1882_v14 = vadd.f32 %v1881_v4, %v1880_v42  ;;  %v5855_v4 = vld [vmem:[#allocation23_spill] sm:$0xff] }
 0x1ca   : > { %v3213_v3 = vpop.eup %3212  ;;  %v1618_v58 = vadd.f32 -1.0000005e-06, %v1616_v25  ;;  %v1718_v55 = vrot.slane %v1717_v53, 4  ;;  %v1861_v48 = vmul.f32 0.6931472, %v3211_v11  ;;  %v1889_v10 = vadd.f32 %v1888_v39, %v1887_v50  ;;  %v5854_v50 = vld [vmem:[#allocation18_spill] sm:$0xff] }
 0x1cb   : > { %v1617_v62 = vadd.f32 %v1615_v38, %v4655_v28  ;;  %v1712_v17 = vadd.f32 %v1711_v24, %v1710_v13  ;;  %v1863_v5 = vmul.f32 0.6931472, %v3213_v3  ;;  %v1899_v49 = vrot.slane %v1898_v46, 2 }
 0x1cc   : > { %v3215_v20 = vpop.eup %3214  ;;  %v4771_v29 = vmul.f32 0.6931472, %v4690_v9  ;;  %v1564_v57 = vsub.f32 %v4766_v0, %v4623_v31  ;;  %v1719_v6 = vadd.f32 %v1718_v55, %v1717_v53  ;;  %v1906_v7 = vrot.slane %v1905_v61, 2 }
 0x1cd   : > { %v1565_v42 = vsub.f32 %v1563_v27, %v4635_v16  ;;  %v1620_v1 = vsub.f32 %v1618_v58, %v4623_v31  ;;  %v1713_v23 = vrot.slane %v1712_v17, 2  ;;  %v1864_v37 = vsub.f32 %v5854_v50, %v1861_v48 }
 0x1ce   : > { %v3217_v28 = vpop.eup %3216  ;;  %v1619_v21 = vadd.f32 -1.0000005e-06, %v1617_v62  ;;  %v1720_v15 = vrot.slane %v1719_v6, 2  ;;  %v1865_v26 = vsub.f32 %v5855_v4, %v1863_v5  ;;  %v1890_v60 = vmul.f32 %v3215_v20, %v1882_v14  ;;  %v5859_v4 = vld [vmem:[#allocation19_spill] sm:$0xff] }
 0x1cf   : > { %v3219_v9 = vpop.eup %3218  ;;  %v1714_v12 = vadd.f32 %v1713_v23, %v1712_v17  ;;  %v1866_v39 = vsub.f32 %v4241_v44, %v1861_v48  ;;  %v1891_v22 = vmul.f32 %v3217_v28, %v1889_v10  ;;  %v1900_v13 = vadd.f32 %v1899_v49, %v1898_v46 }
 0x1d0   : > { %v1669_v52 = vmul.f32 0.6931472, %v3219_v9  ;;  %v1721_v0 = vadd.f32 %v1720_v15, %v1719_v6  ;;  %v1907_v25 = vadd.f32 %v1906_v7, %v1905_v61  ;;  %v1912_v53 = vmul.f32 0.999999, %v1890_v60  ;;  %v5856_v7 = vld [vmem:[#allocation41_spill] sm:$0xff] }
 0x1d1   : > { %v3221_v11 = vpop.eup %3220  ;;  %v1715_v27 = vrot.slane %v1714_v12, 1  ;;  %v1867_v38 = vsub.f32 %v4414_v47, %v1863_v5  ;;  %v1901_v24 = vrot.slane %v1900_v13, 1  ;;  %v1913_v3 = vmul.f32 0.999999, %v1891_v22  ;;  %v5860_v9 = vld [vmem:[#allocation21_spill] sm:$0xff] }
 0x1d2   : > { %v1671_v58 = vmul.f32 0.6931472, %v3221_v11  ;;  %v1672_v55 = vadd.f32 %v1669_v52, %v4692_v32  ;;  %v1722_v14 = vrot.slane %v1721_v0, 1  ;;  %v1908_v62 = vrot.slane %v1907_v25, 1 }
 0x1d3   : > { %v1621_v17 = vsub.f32 %v1619_v21, %v4635_v16  ;;  %v1716_v44 = vadd.f32 %v1715_v27, %v1714_v12  ;;  %v1902_v48 = vadd.f32 %v1901_v24, %v1900_v13  ;;  %v1914_v46 = vadd.f32 5e-07, %v1912_v53  ;;  %v5865_v13 = vld [vmem:[#allocation25_spill] sm:$0xff]  ;;  %v5867_v53 = vld [vmem:[#allocation34_spill] sm:$0xff]  ;;  %v5868_v24 = vld [vmem:[#allocation36_spill] sm:$0xff] }
 0x1d4   : > { %v1673_v10 = vadd.f32 %v1671_v58, %v4702_v18  ;;  %v4784_v61 = vadd.f32 -1.0000005e-06, %v1672_v55  ;;  %v1723_v49 = vadd.f32 %v1722_v14, %v1721_v0  ;;  %v1909_v6 = vadd.f32 %v1908_v62, %v1907_v25  ;;  %v5866_v0 = vld [vmem:[#allocation29_spill] sm:$0xff]  ;;  %v5869_v58 = vld [vmem:[#allocation26_spill] sm:$0xff] }
 0x1d5   : > { %3222 = vlog2.f32 %v1716_v44  ;;  %v1910_v47 = vmul.f32 %v3215_v20, %v1902_v48  ;;  %v1950_v5 = vadd.f32 %v1864_v37, %v5827_v36  ;;  %v1951_v23 = vadd.f32 %v1865_v26, %v5856_v7  ;;  %v5871_v48 = vld [vmem:[#allocation37_spill] sm:$0xff] }
 0x1d6   : > { %v4789_v32 = vsub.f32 %v1564_v57, %v4764_v40  ;;  %v1675_v50 = vadd.f32 -1.0000005e-06, %v1673_v10  ;;  %3224 = vlog2.f32 %v1723_v49  ;;  %v1915_v21 = vadd.f32 5e-07, %v1913_v3  ;;  %v5872_v49 = vld [vmem:[#allocation38_spill] sm:$0xff] }
 0x1d7   : > { %v4792_v15 = vsub.f32 %v1565_v42, %v4771_v29  ;;  %v1911_v18 = vmul.f32 %v3217_v28, %v1909_v6  ;;  %v4795_v60 = vadd.f32 %v1866_v39, %v5859_v4  ;;  %v4798_v12 = vadd.f32 %v1867_v38, %v5860_v9  ;;  %v5863_v42 = vld [vmem:[#allocation33_spill] sm:$0xff]  ;;  %v5864_v28 = vld [vmem:[#allocation35_spill] sm:$0xff] }
 0x1d8   : > { %5857 = vst [vmem:[#allocation42_spill] sm:$0xff] %v4789_v32  ;;  %v4801_v20 = vsub.f32 %v1620_v1, %v4764_v40  ;;  %v4804_v37 = vsub.f32 %v1621_v17, %v4771_v29  ;;  %v1676_v57 = vsub.f32 %v4784_v61, %v4623_v31  ;;  %v1916_v26 = vmul.f32 0.999999, %v1910_v47  ;;  %v5870_v17 = vld [vmem:[#allocation30_spill] sm:$0xff]  ;;  %v5873_v47 = vld [vmem:[#allocation27_spill] sm:$0xff] }
 0x1d9   : > { %5858 = vst [vmem:[#allocation18_spill] sm:$0xff] %v4792_v15  ;;  %3226 = vlog2.f32 %v1914_v46  ;;  %v4809_v22 = vadd.f32 %v1950_v5, %v5863_v42  ;;  %v4812_v39 = vadd.f32 %v1951_v23, %v5864_v28  ;;  %v4816_v52 = vadd.f32 %v4795_v60, %v5865_v13 }
 0x1da   : > { %5861 = vst [vmem:[#allocation23_spill] sm:$0xff] %v4801_v20  ;;  %5862 = vst [vmem:[#allocation48_spill] sm:$0xff] %v4804_v37  ;;  %v1677_v1 = vsub.f32 %v1675_v50, %v4635_v16  ;;  %3228 = vlog2.f32 %v1915_v21  ;;  %v4821_v25 = vadd.f32 %v4798_v12, %v5866_v0  ;;  %v4824_v11 = vadd.f32 %v1950_v5, %v5867_v53 }
 0x1db   : > { %v1917_v27 = vmul.f32 0.999999, %v1911_v18  ;;  %v1958_v38 = vmax.f32 %v4809_v22, %v4816_v52  ;;  %v4829_v3 = vadd.f32 %v1951_v23, %v5868_v24  ;;  %v4833_v55 = vadd.f32 %v4795_v60, %v5869_v58 }
 0x1dc   : > { %v1918_v14 = vadd.f32 5e-07, %v1916_v26  ;;  %v1965_v62 = vmax.f32 %v4812_v39, %v4821_v25  ;;  %v4839_v44 = vadd.f32 %v4798_v12, %v5870_v17  ;;  %v4842_v46 = vadd.f32 %v1950_v5, %v5871_v48 }
 0x1dd   : > { %v1959_v10 = vrot.slane %v1958_v38, 4  ;;  %v2014_v61 = vmax.f32 %v4824_v11, %v4833_v55  ;;  %v4847_v6 = vadd.f32 %v1951_v23, %v5872_v49  ;;  %v4851_v50 = vadd.f32 %v4795_v60, %v5873_v47 }
 0x1de   : > { %v1966_v21 = vrot.slane %v1965_v62, 4  ;;  %v2021_v18 = vmax.f32 %v4829_v3, %v4839_v44  ;;  %v4857_v26 = vadd.f32 %v4798_v12, %v5849_v30  ;;  %v4860_v37 = vadd.f32 %v1950_v5, %v5850_v56 }
 0x1df   : > { %v3223_v20 = vpop.eup %3222  ;;  %v1960_v48 = vmax.f32 %v1958_v38, %v1959_v10  ;;  %v2015_v17 = vrot.slane %v2014_v61, 4  ;;  %v2070_v49 = vmax.f32 %v4842_v46, %v4851_v50  ;;  %v4865_v47 = vadd.f32 %v1951_v23, %v5851_v34 }
 0x1e0   : > { %v3225_v58 = vpop.eup %3224  ;;  %v1725_v24 = vmul.f32 0.6931472, %v3223_v20  ;;  %v1967_v53 = vmax.f32 %v1965_v62, %v1966_v21  ;;  %v2022_v0 = vrot.slane %v2021_v18, 4  ;;  %v2077_v30 = vmax.f32 %v4847_v6, %v4857_v26 }
 0x1e1   : > { %v1727_v28 = vmul.f32 0.6931472, %v3225_v58  ;;  %v1961_v13 = vrot.slane %v1960_v48, 2  ;;  %v2016_v5 = vmax.f32 %v2014_v61, %v2015_v17  ;;  %v2071_v56 = vrot.slane %v2070_v49, 4 }
 0x1e2   : > { %v1728_v38 = vadd.f32 %v1725_v24, %v4722_v33  ;;  %v1919_v10 = vadd.f32 5e-07, %v1917_v27  ;;  %v1968_v42 = vrot.slane %v1967_v53, 2  ;;  %v2023_v9 = vmax.f32 %v2021_v18, %v2022_v0 }
 0x1e3   : > { %v3227_v7 = vpop.eup %3226  ;;  %v4871_v23 = vsub.f32 %v1676_v57, %v4764_v40  ;;  %v1729_v20 = vadd.f32 %v1727_v28, %v4726_v51  ;;  %v1962_v62 = vmax.f32 %v1960_v48, %v1961_v13  ;;  %v2017_v21 = vrot.slane %v2016_v5, 2 }
 0x1e4   : > { %v3229_v34 = vpop.eup %3228  ;;  %v4875_v4 = vsub.f32 %v1677_v1, %v4771_v29  ;;  %v1969_v58 = vmax.f32 %v1967_v53, %v1968_v42  ;;  %v2024_v17 = vrot.slane %v2023_v9, 2  ;;  %v2072_v61 = vmax.f32 %v2070_v49, %v2071_v56 }
 0x1e5   : > { %5874 = vst [vmem:[#allocation49_spill] sm:$0xff] %v4871_v23  ;;  %v4877_v36 = vadd.f32 -1.0000005e-06, %v1728_v38  ;;  %3230 = vlog2.f32 %v1918_v14  ;;  %v1963_v33 = vrot.slane %v1962_v62, 1  ;;  %v2018_v0 = vmax.f32 %v2016_v5, %v2017_v21 }
 0x1e6   : > { %5875 = vst [vmem:[#allocation50_spill] sm:$0xff] %v4875_v4  ;;  %v4879_v27 = vmul.f32 0.6931472, %v3227_v7  ;;  %3232 = vlog2.f32 %v1919_v10  ;;  %v1970_v57 = vrot.slane %v1969_v58, 1  ;;  %v2025_v24 = vmax.f32 %v2023_v9, %v2024_v17 }
 0x1e7   : > { %v4881_v51 = vadd.f32 -1.0000005e-06, %v1729_v20  ;;  %v4883_v28 = vmul.f32 0.6931472, %v3229_v34  ;;  %v4885_v13 = vmax.f32 %v1962_v62, %v1963_v33  ;;  %v2019_v1 = vrot.slane %v2018_v0, 1  ;;  %v2256_v33 = vpop.permute.xlu1 %2255 }
 0x1e8   : > { %5876 = vst [vmem:[#allocation51_spill] sm:$0xff] %v4879_v27  ;;  %v4887_v42 = vmax.f32 %v1969_v58, %v1970_v57  ;;  %v2026_v56 = vrot.slane %v2025_v24, 1  ;;  %v2073_v53 = vrot.slane %v2072_v61, 2  ;;  %v2078_v48 = vrot.slane %v2077_v30, 4 }
 0x1e9   : > { %5877 = vst [vmem:[#allocation52_spill] sm:$0xff] %v4883_v28  ;;  %v1732_v14 = vsub.f32 %v4877_v36, %v4623_v31  ;;  %v1972_v7 = vsub.f32 %v4809_v22, %v4885_v13  ;;  %v1974_v9 = vsub.f32 %v4816_v52, %v4885_v13  ;;  %v4895_v49 = vmax.f32 %v2018_v0, %v2019_v1  ;;  %v5878_v1 = vld [vmem:[#allocation28_spill] sm:$0xff] }
 0x1ea   : > { %v1973_v34 = vsub.f32 %v4812_v39, %v4887_v42  ;;  %v1975_v18 = vsub.f32 %v4821_v25, %v4887_v42  ;;  %v4901_v5 = vmax.f32 %v2025_v24, %v2026_v56  ;;  %v2074_v38 = vmax.f32 %v2072_v61, %v2073_v53  ;;  %v2251_v53 = vpop.permute.xlu0 %2250 }
 0x1eb   : > { %v1976_v10 = vmul.f32 1.442695, %v1972_v7  ;;  %v1980_v20 = vmul.f32 1.442695, %v1974_v9  ;;  %v2028_v62 = vsub.f32 %v4824_v11, %v4895_v49  ;;  %v2030_v22 = vsub.f32 %v4833_v55, %v4895_v49 }
 0x1ec   : > { %v1978_v52 = vmul.f32 1.442695, %v1973_v34  ;;  %v1982_v21 = vmul.f32 1.442695, %v1975_v18  ;;  %v2029_v58 = vsub.f32 %v4829_v3, %v4901_v5  ;;  %v2031_v39 = vsub.f32 %v4839_v44, %v4901_v5  ;;  %v5879_v44 = vld [vmem:[#allocation32_spill] sm:$0xff] }
 0x1ed   : > { %3234 = vpow2.f32 %v1976_v10  ;;  %v2032_v25 = vmul.f32 1.442695, %v2028_v62  ;;  %v2036_v17 = vmul.f32 1.442695, %v2030_v22  ;;  %v2075_v61 = vrot.slane %v2074_v38, 1  ;;  %v3434_v34 = vld [vmem:[%s3721_s18 + $0x50] sm:$0xff] }
 0x1ee   : > { %3236 = vpow2.f32 %v1978_v52  ;;  %v2034_v11 = vmul.f32 1.442695, %v2029_v58  ;;  %v2038_v0 = vmul.f32 1.442695, %v2031_v39  ;;  %v2079_v57 = vmax.f32 %v2077_v30, %v2078_v48  ;;  %v3435_v30 = vld [vmem:[%s3721_s18 + $0x58] sm:$0xff]  ;;  %v3436_v62 = vld [vmem:[%s3721_s18 + $0x40] sm:$0xff] }
 0x1ef   : > { %v3231_v55 = vpop.eup %3230  ;;  %3238 = vpow2.f32 %v1980_v20  ;;  %v4911_v24 = vmax.f32 %v2074_v38, %v2075_v61  ;;  %v4915_v3 = vadd.f32 %v4795_v60, %v5878_v1  ;;  %v4919_v56 = vadd.f32 %v4798_v12, %v5879_v44 }
 0x1f0   : > { %v3233_v7 = vpop.eup %3232  ;;  %3240 = vpow2.f32 %v1982_v21  ;;  %v2080_v9 = vrot.slane %v2079_v57, 2  ;;  %v4922_v18 = vadd.f32 %v3434_v34, %v2256_v33  ;;  %v4925_v48 = vadd.f32 %v3435_v30, %v2256_v33 }
 0x1f1   : > { %3242 = vpow2.f32 %v2032_v25  ;;  %v2084_v60 = vsub.f32 %v4842_v46, %v4911_v24  ;;  %v2086_v12 = vsub.f32 %v4851_v50, %v4911_v24  ;;  %v2126_v38 = vmax.f32 %v4860_v37, %v4915_v3  ;;  %v3437_v25 = vld [vmem:[%s3721_s18 + $0x48] sm:$0xff]  ;;  %s4989_s18 = sshll.u32 %s3717_s7, 3 }
 0x1f2   : > { %3244 = vpow2.f32 %v2034_v11  ;;  %v2081_v10 = vmax.f32 %v2079_v57, %v2080_v9  ;;  %v2133_v20 = vmax.f32 %v4865_v47, %v4919_v56  ;;  %v4936_v22 = vadd.f32 %v3436_v62, %v2251_v53  ;;  %s4998_s11 = scalar_lea.vmem [#allocation5], %s4989_s18  ;;  %s5046_s16 = scalar_lea.vmem [#allocation6], %s4989_s18 }
 0x1f3   : > { %3246 = vpow2.f32 %v2036_v17  ;;  %v2088_v52 = vmul.f32 1.442695, %v2084_v60  ;;  %v2092_v21 = vmul.f32 1.442695, %v2086_v12  ;;  %v2127_v58 = vrot.slane %v2126_v38, 4  ;;  %s2710_s20 = sshll.u32 %s5046_s16, 4  ;;  %s5500_s20 = int_to_ptr.vmem [resolvable:$true] %s2710_s20 }
 0x1f4   : > { %3248 = vpow2.f32 %v2038_v0  ;;  %v2082_v46 = vrot.slane %v2081_v10, 1  ;;  %v2134_v39 = vrot.slane %v2133_v20, 4  ;;  %v4939_v50 = vadd.f32 %v3437_v25, %v2251_v53  ;;  %s3466_s13 = scalar_lea.vmem %s5500_s20, 128  ;;  %p3473_p7 = scmp.lt.s32.totalorder %s5500_s20, %s3471_s15 }
 0x1f5   : > { %v1733_v61 = vsub.f32 %v4881_v51, %v4635_v16  ;;  %3250 = vpow2.f32 %v2088_v52  ;;  %v2128_v33 = vmax.f32 %v2126_v38, %v2127_v58  ;;  %v2262_v11 = vmax.f32 %v4936_v22, %v4922_v18  ;;  %p3467_p11 = scmp.ne.s32.totalorder %s5500_s20, %s3466_s13  ;;  %p3474_p8 = scmp.lt.s32.totalorder %s3472_s17, %s3466_s13 }
 0x1f6   : > { %v4945_v57 = vmax.f32 %v2081_v10, %v2082_v46  ;;  %3252 = vpow2.f32 %v2092_v21  ;;  %v2135_v17 = vmax.f32 %v2133_v20, %v2134_v39  ;;  %v2269_v0 = vmax.f32 %v4939_v50, %v4925_v48 }
 0x1f7   : > { %v3235_v9 = vpop.eup %3234  ;;  %v4949_v34 = vmul.f32 0.6931472, %v3231_v55  ;;  %v4951_v53 = vmul.f32 0.6931472, %v3233_v7  ;;  %v2129_v30 = vrot.slane %v2128_v33, 2  ;;  %v2263_v60 = vrot.slane %v2262_v11, 4  ;;  %p3468_p3 = pnand %p3467_p11, %p5962_p0  ;;  %p3475_p12 = por %p3474_p8, %p3473_p7 }
 0x1f8   : > { %v3237_v51 = vpop.eup %3236  ;;  %v2085_v12 = vsub.f32 %v4847_v6, %v4945_v57  ;;  %v2087_v38 = vsub.f32 %v4857_v26, %v4945_v57  ;;  %v2136_v10 = vrot.slane %v2135_v17, 2  ;;  %v2270_v62 = vrot.slane %v2269_v0, 4 }
 0x1f9   : > { %5880 = vst [vmem:[#allocation53_spill] sm:$0xff] %v4949_v34  ;;  %5881 = vst [vmem:[#allocation54_spill] sm:$0xff] %v4951_v53  ;;  %v3239_v20 = vpop.eup %3238  ;;  %v4961_v55 = vsub.f32 %v1732_v14, %v4764_v40  ;;  %v4964_v7 = vsub.f32 %v1733_v61, %v4771_v29  ;;  %v2130_v52 = vmax.f32 %v2128_v33, %v2129_v30  ;;  %p3469_p4 = pneg %p3468_p3 }
 0x1fa   : > { %v2264_v21 = vmax.f32 %v2262_v11, %v2263_v60  ;;  %v3241_v58 = vpop.eup %3240  ;;  %v1984_v46 = vadd.f32 %v3239_v20, %v3235_v9  ;;  %v2090_v6 = vmul.f32 1.442695, %v2085_v12  ;;  %v2094_v39 = vmul.f32 1.442695, %v2087_v38 }
 0x1fb   : > { %5882 = vst [vmem:[#allocation55_spill] sm:$0xff] %v4961_v55  ;;  %5883 = vst [vmem:[#allocation56_spill] sm:$0xff] %v4964_v7  ;;  %v2137_v25 = vmax.f32 %v2135_v17, %v2136_v10  ;;  %v3243_v26 = vpop.eup %3242  ;;  %v1991_v4 = vadd.f32 %v3241_v58, %v3237_v51  ;;  %v2131_v23 = vrot.slane %v2130_v52, 1  ;;  %v2271_v1 = vmax.f32 %v2269_v0, %v2270_v62  ;;  %p3476_p13 = pnand %p3475_p12, %p3469_p4 }
 0x1fc   : > { %v2265_v44 = vrot.slane %v2264_v21, 2  ;;  %v3245_v15 = vpop.eup %3244  ;;  %v1985_v32 = vrot.slane %v1984_v46, 4  ;;  %3254 = vpow2.f32 %v2090_v6 }
 0x1fd   : > { %v2138_v36 = vrot.slane %v2137_v25, 1  ;;  %v3247_v14 = vpop.eup %3246  ;;  %v1992_v55 = vrot.slane %v1991_v4, 4  ;;  %3256 = vpow2.f32 %v2094_v39  ;;  %v4966_v61 = vmax.f32 %v2130_v52, %v2131_v23 }
 0x1fe   : > { %v2266_v33 = vmax.f32 %v2264_v21, %v2265_v44  ;;  %v3249_v11 = vpop.eup %3248  ;;  %v1986_v9 = vadd.f32 %v1985_v32, %v1984_v46  ;;  %v2040_v30 = vadd.f32 %v3247_v14, %v3243_v26  ;;  %v2272_v17 = vrot.slane %v2271_v1, 2 }
 0x1ff   : > { %v4968_v60 = vmax.f32 %v2137_v25, %v2138_v36  ;;  %v3251_v51 = vpop.eup %3250  ;;  %v1993_v12 = vadd.f32 %v1992_v55, %v1991_v4  ;;  %v2047_v38 = vadd.f32 %v3249_v11, %v3245_v15  ;;  %v2140_v0 = vsub.f32 %v4860_v37, %v4966_v61 }
 0x200   : > { %v2142_v10 = vsub.f32 %v4915_v3, %v4966_v61  ;;  %v3253_v62 = vpop.eup %3252  ;;  %v1987_v20 = vrot.slane %v1986_v9, 2  ;;  %v2041_v23 = vrot.slane %v2040_v30, 4 }
 0x201   : > { %v2141_v44 = vsub.f32 %v4865_v47, %v4968_v60  ;;  %v2143_v32 = vsub.f32 %v4919_v56, %v4968_v60  ;;  %v1994_v52 = vrot.slane %v1993_v12, 2  ;;  %v2048_v21 = vrot.slane %v2047_v38, 4 }
 0x202   : > { %v2096_v58 = vadd.f32 %v3253_v62, %v3251_v51  ;;  %v2144_v4 = vmul.f32 1.442695, %v2140_v0  ;;  %v1988_v15 = vadd.f32 %v1987_v20, %v1986_v9  ;;  %v2042_v55 = vadd.f32 %v2041_v23, %v2040_v30 }
 0x203   : > { %v2146_v46 = vmul.f32 1.442695, %v2141_v44  ;;  %v2148_v37 = vmul.f32 1.442695, %v2142_v10  ;;  %v1995_v6 = vadd.f32 %v1994_v52, %v1993_v12  ;;  %v2049_v39 = vadd.f32 %v2048_v21, %v2047_v38 }
 0x204   : > { %v2097_v3 = vrot.slane %v2096_v58, 4  ;;  %3258 = vpow2.f32 %v2144_v4  ;;  %v1989_v25 = vrot.slane %v1988_v15, 1  ;;  %v2043_v26 = vrot.slane %v2042_v55, 2 }
 0x205   : > { %3260 = vpow2.f32 %v2146_v46  ;;  %v2150_v36 = vmul.f32 1.442695, %v2143_v32  ;;  %v1996_v47 = vrot.slane %v1995_v6, 1  ;;  %v2050_v14 = vrot.slane %v2049_v39, 2 }
 0x206   : > { %v2098_v11 = vadd.f32 %v2097_v3, %v2096_v58  ;;  %3262 = vpow2.f32 %v2148_v37  ;;  %v3255_v56 = vpop.eup %3254  ;;  %v1990_v7 = vadd.f32 %v1989_v25, %v1988_v15  ;;  %v2044_v51 = vadd.f32 %v2043_v26, %v2042_v55 }
 0x207   : > { %3264 = vpow2.f32 %v2150_v36  ;;  %v2267_v9 = vrot.slane %v2266_v33, 1  ;;  %v3257_v30 = vpop.eup %3256  ;;  %v1997_v0 = vadd.f32 %v1996_v47, %v1995_v6  ;;  %v2051_v10 = vadd.f32 %v2050_v14, %v2049_v39 }
 0x208   : > { %v2099_v12 = vrot.slane %v2098_v11, 2  ;;  %v2273_v38 = vmax.f32 %v2271_v1, %v2272_v17  ;;  %3266 = vlog2.f32 %v1990_v7  ;;  %v2045_v62 = vrot.slane %v2044_v51, 1 }
 0x209   : > { %v2103_v20 = vadd.f32 %v3257_v30, %v3255_v56  ;;  %v2268_v23 = vmax.f32 %v2266_v33, %v2267_v9  ;;  %3268 = vlog2.f32 %v1997_v0  ;;  %v2052_v44 = vrot.slane %v2051_v10, 1  ;;  %v5887_v0 = vld [vmem:[#allocation14_spill] sm:$0xff] }
 0x20a   : > { %v2100_v32 = vadd.f32 %v2099_v12, %v2098_v11  ;;  %v2274_v52 = vrot.slane %v2273_v38, 1  ;;  %v2046_v21 = vadd.f32 %v2045_v62, %v2044_v51  ;;  %v998_v7 = vsub.f32 %v4487_v8, %v4483_v41  ;;  %v395_v8 = vld [vmem:[%s4998_s11] sm:$0x3] }
 0x20b   : > { %v2104_v58 = vrot.slane %v2103_v20, 4  ;;  %v4979_v4 = vsub.f32 %v4936_v22, %v2268_v23  ;;  %v4982_v15 = vsub.f32 %v4922_v18, %v2268_v23  ;;  %v2053_v55 = vadd.f32 %v2052_v44, %v2051_v10  ;;  %v5889_v23 = vld [vmem:[#allocation13_spill] sm:$0xff] }
 0x20c   : > { %v2101_v46 = vrot.slane %v2100_v32, 1  ;;  %v2275_v1 = vmax.f32 %v2273_v38, %v2274_v52  ;;  %3270 = vlog2.f32 %v2046_v21  ;;  %v999_v25 = vsub.f32 %v4493_v43, %v4490_v54 }
 0x20d   : > { %v2105_v33 = vadd.f32 %v2104_v58, %v2103_v20  ;;  %v2280_v17 = vmul.f32 1.442695, %v4979_v4  ;;  %v2284_v37 = vmul.f32 1.442695, %v4982_v15  ;;  %3272 = vlog2.f32 %v2053_v55  ;;  %v396_v20 = vld [vmem:[%s4998_s11 + $0x2] sm:$0x3] }
 0x20e   : > { %v3259_v22 = vpop.eup %3258  ;;  %v2102_v6 = vadd.f32 %v2101_v46, %v2100_v32  ;;  %v4992_v18 = vsub.f32 %v4939_v50, %v2275_v1  ;;  %v4995_v39 = vsub.f32 %v4925_v48, %v2275_v1  ;;  %v3571_v26 = vmov 1966171168   ;;  %v5891_v58 = vld [vmem:[#allocation12_spill] sm:$0xff] }
 0x20f   : > { %v3261_v3 = vpop.eup %3260  ;;  %v2106_v41 = vrot.slane %v2105_v33, 2  ;;  %3274 = vpow2.f32 %v2280_v17  ;;  %v1004_v36 = vunpack.c.l.s4 %v3571_v26  ;;  %v5884_v14 = vlaneseq  ;;  %v5892_v46 = vld [vmem:[#allocation24_spill] sm:$0xff] }
 0x210   : > { %v3263_v47 = vpop.eup %3262  ;;  %3276 = vlog2.f32 %v2102_v6  ;;  %v2282_v50 = vmul.f32 1.442695, %v4992_v18  ;;  %v2286_v48 = vmul.f32 1.442695, %v4995_v39  ;;  %v1002_v30 = vcombine.low %v998_v7, %v999_v25 }
 0x211   : > { %vm5006_vm0 = vcmp.lt.s32.totalorder %v5884_v14, 256  ;;  %v3265_v56 = vpop.eup %3264  ;;  %v2107_v51 = vadd.f32 %v2106_v41, %v2105_v33  ;;  %v2152_v9 = vadd.f32 %v3263_v47, %v3259_v22  ;;  %3278 = vpow2.f32 %v2284_v37  ;;  %v5893_v37 = vld [vmem:[#allocation47_spill] sm:$0xff] }
 0x212   : > { %v2159_v54 = vadd.f32 %v3265_v56, %v3261_v3  ;;  %3280 = vpow2.f32 %v2282_v50  ;;  %v1005_v43 = vunpack.c.0.s8 %v1004_v36  ;;  %v5011_v10 = vrot.slane %v395_v8, %v5887_v0  ;;  %v3267_v12 = vpop.eup %3266 }
 0x213   : > { %v2108_v38 = vrot.slane %v2107_v51, 1  ;;  %v2153_v62 = vrot.slane %v2152_v9, 4  ;;  %3282 = vpow2.f32 %v2286_v48  ;;  %v5015_v44 = vrot.slane %v395_v8, %v5889_v23  ;;  %v3269_v32 = vpop.eup %3268 }
 0x214   : > { %5888 = vst [vmem:[#allocation14_spill] sm:$0xff] %v5011_v10  ;;  %v1999_v52 = vmul.f32 0.6931472, %v3267_v12  ;;  %v2160_v21 = vrot.slane %v2159_v54, 4  ;;  %v5018_v55 = vsub.s32 %v1005_v43, %v5891_v58  ;;  %v5022_v1 = vadd.f32 %v5011_v10, %v5892_v46  ;;  %v5894_v43 = vld [vmem:[#allocation17_spill] sm:$0xff] }
 0x215   : > { %5890 = vst [vmem:[#allocation13_spill] sm:$0xff] %v5015_v44  ;;  %v2001_v7 = vmul.f32 0.6931472, %v3269_v32  ;;  %v2109_v33 = vadd.f32 %v2108_v38, %v2107_v51  ;;  %v2154_v17 = vadd.f32 %v2153_v62, %v2152_v9  ;;  %v5026_v22 = vadd.f32 %v5015_v44, %v5893_v37  ;;  %v5895_v32 = vld [vmem:[#allocation45_spill] sm:$0xff] }
 0x216   : > { %v2002_v6 = vadd.f32 %v1999_v52, %v4885_v13  ;;  %v2161_v3 = vadd.f32 %v2160_v21, %v2159_v54  ;;  %v1009_v41 = vrot.slane %v1002_v30, %v5018_v55  ;;  %v5031_v8 = vrot.slane %v396_v20, %v5887_v0  ;;  %v3271_v25 = vpop.eup %3270 }
 0x217   : > { %v2003_v26 = vadd.f32 %v2001_v7, %v4887_v42  ;;  %3284 = vlog2.f32 %v2109_v33  ;;  %v2155_v36 = vrot.slane %v2154_v17, 2  ;;  %v5035_v47 = vrot.slane %v396_v20, %v5889_v23  ;;  %v3273_v50 = vpop.eup %3272 }
 0x218   : > { %v2004_v48 = vadd.f32 -1.0000005e-06, %v2002_v6  ;;  %v2055_v14 = vmul.f32 0.6931472, %v3271_v25  ;;  %v2162_v56 = vrot.slane %v2161_v3, 2  ;;  %v1016_v13 = vrot.slane %v1009_v41, %v5018_v55 }
 0x219   : > { %v3275_v51 = vpop.eup %3274  ;;  %v2005_v9 = vadd.f32 -1.0000005e-06, %v2003_v26  ;;  %v2057_v30 = vmul.f32 0.6931472, %v3273_v50  ;;  %v2156_v54 = vadd.f32 %v2155_v36, %v2154_v17  ;;  %v5040_v12 = vadd.f32 %v5031_v8, %v5894_v43 }
 0x21a   : > { %v3277_v42 = vpop.eup %3276  ;;  %v2006_v38 = vsub.f32 %v2004_v48, %v4879_v27  ;;  %v2058_v62 = vadd.f32 %v2055_v14, %v4895_v49  ;;  %v2163_v20 = vadd.f32 %v2162_v56, %v2161_v3  ;;  %v2314_v52 = vmul.f32 %v3275_v51, %v5895_v32  ;;  %1022 = vst.msk [vmem:[%s5046_s16] ss:$4 sm:$0x3] %vm5006_vm0, %v1016_v13 }
 0x21b   : > { %v3279_v21 = vpop.eup %3278  ;;  %v2007_v58 = vsub.f32 %v2005_v9, %v4883_v28  ;;  %v2059_v46 = vadd.f32 %v2057_v30, %v4901_v5  ;;  %v2111_v7 = vmul.f32 0.6931472, %v3277_v42  ;;  %v2157_v33 = vrot.slane %v2156_v54, 1  ;;  %v5898_v30 = vld [vmem:[#allocation46_spill] sm:$0xff] }
 0x21c   : > { %v3281_v17 = vpop.eup %3280  ;;  %v5054_v37 = vsub.f32 %v2006_v38, %v4949_v34  ;;  %v2060_v49 = vadd.f32 -1.0000005e-06, %v2058_v62  ;;  %v2164_v6 = vrot.slane %v2163_v20, 1  ;;  %v2288_v3 = vadd.f32 %v3279_v21, %v3275_v51 }
 0x21d   : > { %v3283_v41 = vpop.eup %3282  ;;  %v5057_v25 = vsub.f32 %v2007_v58, %v4951_v53  ;;  %v2061_v26 = vadd.f32 -1.0000005e-06, %v2059_v46  ;;  %v2114_v36 = vadd.f32 %v2111_v7, %v4911_v24  ;;  %v2158_v50 = vadd.f32 %v2157_v33, %v2156_v54 }
 0x21e   : > { %5896 = vst [vmem:[#allocation12_spill] sm:$0xff] %v5054_v37  ;;  %v2062_v48 = vsub.f32 %v2060_v49, %v4879_v27  ;;  %v2165_v5 = vadd.f32 %v2164_v6, %v2163_v20  ;;  %v2289_v14 = vrot.slane %v2288_v3, 4  ;;  %v2295_v56 = vadd.f32 %v3283_v41, %v3281_v17  ;;  %v5901_v20 = vld [vmem:[#allocation43_spill] sm:$0xff]  ;;  %v5902_v6 = vld [vmem:[#allocation44_spill] sm:$0xff] }
 0x21f   : > { %5897 = vst [vmem:[#allocation24_spill] sm:$0xff] %v5057_v25  ;;  %v2063_v13 = vsub.f32 %v2061_v26, %v4883_v28  ;;  %v2116_v9 = vadd.f32 -1.0000005e-06, %v2114_v36  ;;  %3286 = vlog2.f32 %v2158_v50  ;;  %v2315_v43 = vmul.f32 %v3281_v17, %v5898_v30  ;;  %v397_v30 = vld [vmem:[%s4998_s11 + $0x4] sm:$0x3] }
 0x220   : > { %v5064_v42 = vsub.f32 %v2062_v48, %v4949_v34  ;;  %3288 = vlog2.f32 %v2165_v5  ;;  %v2290_v38 = vadd.f32 %v2289_v14, %v2288_v3  ;;  %v2296_v62 = vrot.slane %v2295_v56, 4 }
 0x221   : > { %v3285_v32 = vpop.eup %3284  ;;  %v5067_v24 = vsub.f32 %v2063_v13, %v4951_v53  ;;  %v2118_v54 = vsub.f32 %v2116_v9, %v4879_v27  ;;  %v2316_v58 = vmul.f32 %v3279_v21, %v5901_v20  ;;  %v2317_v46 = vmul.f32 %v3283_v41, %v4362_v45 }
 0x222   : > { %5899 = vst [vmem:[#allocation47_spill] sm:$0xff] %v5064_v42  ;;  %v2113_v7 = vmul.f32 0.6931472, %v3285_v32  ;;  %v2291_v33 = vrot.slane %v2290_v38, 2  ;;  %v2297_v49 = vadd.f32 %v2296_v62, %v2295_v56  ;;  %v2334_v26 = vmul.f32 %v3275_v51, %v5902_v6  ;;  %v5904_v62 = vld [vmem:[#allocation16_spill] sm:$0xff] }
 0x223   : > { %5900 = vst [vmem:[#allocation17_spill] sm:$0xff] %v5067_v24  ;;  %v5074_v36 = vsub.f32 %v2118_v54, %v4949_v34  ;;  %v2318_v3 = vadd.f32 %v2316_v58, %v2314_v52  ;;  %v2325_v50 = vadd.f32 %v2317_v46, %v2315_v43  ;;  %v2335_v48 = vmul.f32 %v3281_v17, %v4357_v35  ;;  %v5934_v24 = vld [vmem:[#allocation28_spill] sm:$0xff] }
 0x224   : > { %v2115_v5 = vadd.f32 %v2113_v7, %v4945_v57  ;;  %v2292_v14 = vadd.f32 %v2291_v33, %v2290_v38  ;;  %v2298_v13 = vrot.slane %v2297_v49, 2  ;;  %v2336_v9 = vmul.f32 %v3279_v21, %v4271_v2 }
 0x225   : > { %5903 = vst [vmem:[#allocation45_spill] sm:$0xff] %v5074_v36  ;;  %v2319_v45 = vrot.slane %v2318_v3, 4  ;;  %v2326_v32 = vrot.slane %v2325_v50, 4  ;;  %v2337_v56 = vmul.f32 %v3283_v41, %v4277_v63  ;;  %v5083_v51 = vadd.f32 %v5035_v47, %v5904_v62  ;;  %v398_v62 = vld [vmem:[%s4998_s11 + $0x6] sm:$0x3] }
 0x226   : > { %v2117_v54 = vadd.f32 -1.0000005e-06, %v2115_v5  ;;  %v2293_v52 = vrot.slane %v2292_v14, 1  ;;  %v2299_v43 = vadd.f32 %v2298_v13, %v2297_v49  ;;  %v2338_v20 = vadd.f32 %v2336_v9, %v2334_v26 }
 0x227   : > { %v2320_v35 = vadd.f32 %v2319_v45, %v2318_v3  ;;  %v2327_v17 = vadd.f32 %v2326_v32, %v2325_v50  ;;  %v2345_v57 = vadd.f32 %v2337_v56, %v2335_v48  ;;  %v5086_v38 = vrot.slane %v397_v30, %v5887_v0 }
 0x228   : > { %v2119_v2 = vsub.f32 %v2117_v54, %v4883_v28  ;;  %v2294_v21 = vadd.f32 %v2293_v52, %v2292_v14  ;;  %v2300_v58 = vrot.slane %v2299_v43, 1  ;;  %v2339_v46 = vrot.slane %v2338_v20, 4 }
 0x229   : > { %v3287_v63 = vpop.eup %3286  ;;  %v2321_v41 = vrot.slane %v2320_v35, 2  ;;  %v2328_v7 = vrot.slane %v2327_v17, 2  ;;  %v2346_v33 = vrot.slane %v2345_v57, 4  ;;  %v5090_v6 = vrot.slane %v397_v30, %v5889_v23 }
 0x22a   : > { %v3289_v49 = vpop.eup %3288  ;;  %v5093_v26 = vsub.f32 %v2119_v2, %v4951_v53  ;;  %v2167_v3 = vmul.f32 0.6931472, %v3287_v63  ;;  %v2301_v50 = vadd.f32 %v2300_v58, %v2299_v43  ;;  %3290 = vlog2.f32 %v2294_v21  ;;  %v5906_v43 = vld [vmem:[#allocation15_spill] sm:$0xff] }
 0x22b   : > { %v2169_v48 = vmul.f32 0.6931472, %v3289_v49  ;;  %3292 = vrcp.f32 %v2294_v21  ;;  %v2322_v5 = vadd.f32 %v2321_v41, %v2320_v35  ;;  %v2329_v14 = vadd.f32 %v2328_v7, %v2327_v17 }
 0x22c   : > { %5905 = vst [vmem:[#allocation46_spill] sm:$0xff] %v5093_v26  ;;  %v2170_v13 = vadd.f32 %v2167_v3, %v4966_v61  ;;  %3294 = vlog2.f32 %v2301_v50  ;;  %v2340_v9 = vadd.f32 %v2339_v46, %v2338_v20  ;;  %v2347_v45 = vadd.f32 %v2346_v33, %v2345_v57  ;;  %v5907_v61 = vld [vmem:[#allocation22_spill] sm:$0xff] }
 0x22d   : > { %v2171_v30 = vadd.f32 %v2169_v48, %v4968_v60  ;;  %3296 = vrcp.f32 %v2301_v50  ;;  %v2323_v32 = vrot.slane %v2322_v5, 1  ;;  %v2330_v56 = vrot.slane %v2329_v14, 1 }
 0x22e   : > { %v2172_v54 = vadd.f32 -1.0000005e-06, %v2170_v13  ;;  %v2341_v52 = vrot.slane %v2340_v9, 2  ;;  %v2348_v2 = vrot.slane %v2347_v45, 2  ;;  %v5100_v58 = vadd.f32 %v5086_v38, %v5906_v43 }
 0x22f   : > { %v2173_v35 = vadd.f32 -1.0000005e-06, %v2171_v30  ;;  %v2324_v17 = vadd.f32 %v2323_v32, %v2322_v5  ;;  %v2331_v21 = vadd.f32 %v2330_v56, %v2329_v14  ;;  %v5104_v20 = vadd.f32 %v5090_v6, %v5907_v61 }
 0x230   : > { %v2174_v60 = vsub.f32 %v2172_v54, %v4879_v27  ;;  %v2342_v57 = vadd.f32 %v2341_v52, %v2340_v9  ;;  %v2349_v46 = vadd.f32 %v2348_v2, %v2347_v45  ;;  %v5108_v63 = vrot.slane %v398_v62, %v5887_v0  ;;  %v5912_v52 = vld [vmem:[#allocation42_spill] sm:$0xff] }
 0x231   : > { %v2175_v41 = vsub.f32 %v2173_v35, %v4883_v28  ;;  %v5112_v7 = vrot.slane %v398_v62, %v5889_v23  ;;  %v1303_v33 = vmax.f32 %v5022_v1, %v5040_v12  ;;  %v1304_v49 = vmax.f32 %v5026_v22, %v5083_v51 }
 0x232   : > { %v5119_v3 = vsub.f32 %v2174_v60, %v4949_v34  ;;  %v2343_v50 = vrot.slane %v2342_v57, 1  ;;  %v2350_v48 = vrot.slane %v2349_v46, 1  ;;  %v5123_v0 = vadd.f32 %v5108_v63, %v4748_v59 }
 0x233   : > { %v5126_v5 = vsub.f32 %v2175_v41, %v4951_v53  ;;  %v5130_v23 = vadd.f32 %v5112_v7, %v4760_v19  ;;  %v1305_v14 = vmax.f32 %v1303_v33, %v5100_v58  ;;  %v1306_v13 = vmax.f32 %v1304_v49, %v5104_v20 }
 0x234   : > { %5908 = vst [vmem:[#allocation43_spill] sm:$0xff] %v5119_v3  ;;  %v3291_v9 = vpop.eup %3290  ;;  %v2344_v45 = vadd.f32 %v2343_v50, %v2342_v57  ;;  %v2351_v30 = vadd.f32 %v2350_v48, %v2349_v46  ;;  %v1486_v32 = vsub.f32 %v4623_v31, %v4764_v40  ;;  %v1487_v59 = vsub.f32 %v4635_v16, %v4771_v29  ;;  %v5914_v31 = vld [vmem:[#allocation18_spill] sm:$0xff] }
 0x235   : > { %5909 = vst [vmem:[#allocation44_spill] sm:$0xff] %v5126_v5  ;;  %v3293_v56 = vpop.eup %3292  ;;  %v2303_v62 = vmul.f32 0.6931472, %v3291_v9  ;;  %v5139_v54 = vmax.f32 %v1305_v14, %v5123_v0  ;;  %v5142_v19 = vmax.f32 %v1306_v13, %v5130_v23  ;;  %v5146_v2 = vadd.f32 %v5912_v52, %v5011_v10  ;;  %v5916_v13 = vld [vmem:[#allocation20_spill] sm:$0xff]  ;;  %v5918_v52 = vld [vmem:[#allocation41_spill] sm:$0xff] }
 0x236   : > { %v3295_v43 = vpop.eup %3294  ;;  %v2332_v35 = vmul.f32 %v3293_v56, %v2324_v17  ;;  %v2352_v61 = vmul.f32 %v3293_v56, %v2344_v45  ;;  %v5148_v60 = vcombine.low %v1486_v32, %v1487_v59  ;;  %v5152_v16 = vadd.f32 %v5914_v31, %v5015_v44  ;;  %v5917_v45 = vld [vmem:[#allocation19_spill] sm:$0xff]  ;;  %v5921_v31 = vld [vmem:[#allocation25_spill] sm:$0xff] }
 0x237   : > { %5910 = vst [vmem:[#allocation16_spill] sm:$0xff] %v5139_v54  ;;  %5911 = vst [vmem:[#allocation15_spill] sm:$0xff] %v5142_v19  ;;  %v3297_v40 = vpop.eup %3296  ;;  %v2305_v29 = vmul.f32 0.6931472, %v3295_v43  ;;  %v2306_v57 = vsub.f32 %v4979_v4, %v2303_v62  ;;  %v2308_v46 = vsub.f32 %v4982_v15, %v2303_v62 }
 0x238   : > { %5913 = vst [vmem:[#allocation22_spill] sm:$0xff] %v5146_v2  ;;  %5915 = vst [vmem:[#allocation42_spill] sm:$0xff] %v5152_v16  ;;  %v2333_v33 = vmul.f32 %v3297_v40, %v2331_v21  ;;  %v2353_v49 = vmul.f32 %v3297_v40, %v2351_v30  ;;  %v2354_v50 = vmul.f32 0.999999, %v2332_v35  ;;  %v2358_v17 = vmul.f32 0.999999, %v2352_v61 }
 0x239   : > { %v2307_v48 = vsub.f32 %v4992_v18, %v2305_v29  ;;  %v2309_v14 = vsub.f32 %v4995_v39, %v2305_v29  ;;  %v2392_v9 = vadd.f32 %v2306_v57, %v5916_v13  ;;  %v2394_v32 = vadd.f32 %v2308_v46, %v5917_v45  ;;  %v5919_v30 = vld [vmem:[#allocation21_spill] sm:$0xff]  ;;  %v5922_v29 = vld [vmem:[#allocation35_spill] sm:$0xff]  ;;  %v5926_v13 = vld [vmem:[#allocation26_spill] sm:$0xff] }
 0x23a   : > { %v2355_v59 = vmul.f32 0.999999, %v2333_v33  ;;  %v2356_v56 = vadd.f32 5e-07, %v2354_v50  ;;  %v2359_v4 = vmul.f32 0.999999, %v2353_v49 }
 0x23b   : > { %v2360_v62 = vadd.f32 5e-07, %v2358_v17  ;;  %v2393_v21 = vadd.f32 %v2307_v48, %v5918_v52  ;;  %v2395_v43 = vadd.f32 %v2309_v14, %v5919_v30  ;;  %v5920_v35 = vld [vmem:[#allocation33_spill] sm:$0xff]  ;;  %v5170_v40 = vadd.f32 %v2394_v32, %v5921_v31  ;;  %v5924_v49 = vld [vmem:[#allocation34_spill] sm:$0xff]  ;;  %v5925_v48 = vld [vmem:[#allocation36_spill] sm:$0xff] }
 0x23c   : > { %v5167_v61 = vadd.f32 %v2392_v9, %v5920_v35  ;;  %v2357_v18 = vadd.f32 5e-07, %v2355_v59  ;;  %v2361_v39 = vadd.f32 5e-07, %v2359_v4  ;;  %3298 = vlog2.f32 %v2356_v56  ;;  %v5923_v46 = vld [vmem:[#allocation29_spill] sm:$0xff]  ;;  %v5927_v56 = vld [vmem:[#allocation30_spill] sm:$0xff] }
 0x23d   : > { %3300 = vlog2.f32 %v2360_v62  ;;  %v5173_v57 = vadd.f32 %v2393_v21, %v5922_v29  ;;  %v5176_v33 = vadd.f32 %v2395_v43, %v5923_v46  ;;  %v5179_v50 = vadd.f32 %v2392_v9, %v5924_v49  ;;  %v5928_v62 = vld [vmem:[#allocation37_spill] sm:$0xff]  ;;  %v5930_v29 = vld [vmem:[#allocation27_spill] sm:$0xff] }
 0x23e   : > { %3302 = vlog2.f32 %v2357_v18  ;;  %v2400_v17 = vmax.f32 %v5167_v61, %v5170_v40  ;;  %v5184_v14 = vadd.f32 %v2393_v21, %v5925_v48  ;;  %v5187_v45 = vadd.f32 %v2394_v32, %v5926_v13  ;;  %v5929_v18 = vld [vmem:[#allocation38_spill] sm:$0xff]  ;;  %v5931_v48 = vld [vmem:[#allocation31_spill] sm:$0xff] }
 0x23f   : > { %3304 = vlog2.f32 %v2361_v39  ;;  %v2407_v59 = vmax.f32 %v5173_v57, %v5176_v33  ;;  %v5192_v4 = vadd.f32 %v2395_v43, %v5927_v56  ;;  %v5195_v52 = vadd.f32 %v2392_v9, %v5928_v62  ;;  %v5932_v56 = vld [vmem:[#allocation39_spill] sm:$0xff] }
 0x240   : > { %v2401_v30 = vrot.slane %v2400_v17, 4  ;;  %v2456_v35 = vmax.f32 %v5179_v50, %v5187_v45  ;;  %v5200_v31 = vadd.f32 %v2393_v21, %v5929_v18  ;;  %v5203_v46 = vadd.f32 %v2394_v32, %v5930_v29  ;;  %v5933_v18 = vld [vmem:[#allocation40_spill] sm:$0xff] }
 0x241   : > { %v2408_v39 = vrot.slane %v2407_v59, 4  ;;  %v2463_v49 = vmax.f32 %v5184_v14, %v5192_v4  ;;  %v5208_v13 = vadd.f32 %v2395_v43, %v5931_v48  ;;  %v5211_v62 = vadd.f32 %v2392_v9, %v5932_v56  ;;  %v5935_v56 = vld [vmem:[#allocation32_spill] sm:$0xff] }
 0x242   : > { %v2402_v15 = vmax.f32 %v2400_v17, %v2401_v30  ;;  %v2457_v41 = vrot.slane %v2456_v35, 4  ;;  %v2512_v5 = vmax.f32 %v5195_v52, %v5203_v46  ;;  %v5216_v3 = vadd.f32 %v2393_v21, %v5933_v18 }
 0x243   : > { %v2409_v29 = vmax.f32 %v2407_v59, %v2408_v39  ;;  %v2464_v26 = vrot.slane %v2463_v49, 4  ;;  %v2519_v36 = vmax.f32 %v5200_v31, %v5208_v13  ;;  %v5221_v42 = vadd.f32 %v2394_v32, %v5934_v24 }
 0x244   : > { %v2403_v48 = vrot.slane %v2402_v15, 2  ;;  %v2458_v25 = vmax.f32 %v2456_v35, %v2457_v41  ;;  %v2513_v9 = vrot.slane %v2512_v5, 4  ;;  %v5224_v17 = vadd.f32 %v2395_v43, %v5935_v56 }
 0x245   : > { %v2410_v30 = vrot.slane %v2409_v29, 2  ;;  %v2465_v44 = vmax.f32 %v2463_v49, %v2464_v26  ;;  %v2520_v37 = vrot.slane %v2519_v36, 4  ;;  %v2568_v21 = vmax.f32 %v5211_v62, %v5221_v42 }
 0x246   : > { %v3299_v59 = vpop.eup %3298  ;;  %v2404_v39 = vmax.f32 %v2402_v15, %v2403_v48  ;;  %v2459_v18 = vrot.slane %v2458_v25, 2  ;;  %v2514_v10 = vmax.f32 %v2512_v5, %v2513_v9  ;;  %v5230_v24 = vmax.f32 %v5216_v3, %v5224_v17 }
 0x247   : > { %v3301_v32 = vpop.eup %3300  ;;  %v5232_v41 = vmul.f32 0.6931472, %v3299_v59  ;;  %v2411_v35 = vmax.f32 %v2409_v29, %v2410_v30  ;;  %v2466_v43 = vrot.slane %v2465_v44, 2  ;;  %v2521_v56 = vmax.f32 %v2519_v36, %v2520_v37 }
 0x248   : > { %v3303_v28 = vpop.eup %3302  ;;  %v5234_v26 = vmul.f32 0.6931472, %v3301_v32  ;;  %v2405_v49 = vrot.slane %v2404_v39, 1  ;;  %v2460_v53 = vmax.f32 %v2458_v25, %v2459_v18  ;;  %v2515_v27 = vrot.slane %v2514_v10, 2 }
 0x249   : > { %v3305_v34 = vpop.eup %3304  ;;  %v5236_v15 = vmul.f32 0.6931472, %v3303_v28  ;;  %v2412_v5 = vrot.slane %v2411_v35, 1  ;;  %v2467_v48 = vmax.f32 %v2465_v44, %v2466_v43  ;;  %v2522_v9 = vrot.slane %v2521_v56, 2 }
 0x24a   : > { %v5238_v16 = vmul.f32 0.6931472, %v3305_v34  ;;  %v5240_v2 = vmax.f32 %v2404_v39, %v2405_v49  ;;  %v2461_v59 = vrot.slane %v2460_v53, 1  ;;  %v2516_v29 = vmax.f32 %v2514_v10, %v2515_v27 }
 0x24b   : > { %v5242_v30 = vmax.f32 %v2411_v35, %v2412_v5  ;;  %v2468_v37 = vrot.slane %v2467_v48, 1  ;;  %v2523_v36 = vmax.f32 %v2521_v56, %v2522_v9  ;;  %v2569_v32 = vrot.slane %v2568_v21, 4 }
 0x24c   : > { %v2414_v25 = vsub.f32 %v5167_v61, %v5240_v2  ;;  %v2416_v28 = vsub.f32 %v5170_v40, %v5240_v2  ;;  %v5248_v18 = vmax.f32 %v2460_v53, %v2461_v59  ;;  %v2517_v44 = vrot.slane %v2516_v29, 1 }
 0x24d   : > { %v2415_v34 = vsub.f32 %v5173_v57, %v5242_v30  ;;  %v2417_v27 = vsub.f32 %v5176_v33, %v5242_v30  ;;  %v5254_v10 = vmax.f32 %v2467_v48, %v2468_v37  ;;  %v2524_v39 = vrot.slane %v2523_v36, 1 }
 0x24e   : > { %v2418_v35 = vmul.f32 1.442695, %v2414_v25  ;;  %v2422_v43 = vmul.f32 1.442695, %v2416_v28  ;;  %v2470_v61 = vsub.f32 %v5179_v50, %v5248_v18  ;;  %v2472_v40 = vsub.f32 %v5187_v45, %v5248_v18 }
 0x24f   : > { %v2420_v53 = vmul.f32 1.442695, %v2415_v34  ;;  %v2424_v56 = vmul.f32 1.442695, %v2417_v27  ;;  %v2471_v49 = vsub.f32 %v5184_v14, %v5254_v10  ;;  %v2473_v57 = vsub.f32 %v5192_v4, %v5254_v10 }
 0x250   : > { %3306 = vpow2.f32 %v2418_v35  ;;  %v2474_v33 = vmul.f32 1.442695, %v2470_v61  ;;  %v2478_v5 = vmul.f32 1.442695, %v2472_v40  ;;  %v5264_v48 = vmax.f32 %v2516_v29, %v2517_v44 }
 0x251   : > { %3308 = vpow2.f32 %v2420_v53  ;;  %v2476_v9 = vmul.f32 1.442695, %v2471_v49  ;;  %v2480_v59 = vmul.f32 1.442695, %v2473_v57  ;;  %v5266_v50 = vmax.f32 %v2523_v36, %v2524_v39 }
 0x252   : > { %3310 = vpow2.f32 %v2422_v43  ;;  %v2526_v45 = vsub.f32 %v5195_v52, %v5264_v48  ;;  %v2528_v14 = vsub.f32 %v5203_v46, %v5264_v48  ;;  %v2570_v37 = vmax.f32 %v2568_v21, %v2569_v32 }
 0x253   : > { %3312 = vpow2.f32 %v2424_v56  ;;  %v2527_v4 = vsub.f32 %v5200_v31, %v5266_v50  ;;  %v2529_v29 = vsub.f32 %v5208_v13, %v5266_v50  ;;  %v2576_v25 = vrot.slane %v5230_v24, 4 }
 0x254   : > { %3314 = vpow2.f32 %v2474_v33  ;;  %v2530_v36 = vmul.f32 1.442695, %v2526_v45  ;;  %v2534_v28 = vmul.f32 1.442695, %v2528_v14  ;;  %v2571_v44 = vrot.slane %v2570_v37, 2 }
 0x255   : > { %3316 = vpow2.f32 %v2476_v9  ;;  %v2532_v34 = vmul.f32 1.442695, %v2527_v4  ;;  %v2536_v52 = vmul.f32 1.442695, %v2529_v29  ;;  %v2577_v27 = vmax.f32 %v5230_v24, %v2576_v25 }
 0x256   : > { %3318 = vpow2.f32 %v2478_v5  ;;  %v2572_v46 = vmax.f32 %v2570_v37, %v2571_v44  ;;  %v5936_v21 = vsub.f32 %v5022_v1, %v5139_v54  ;;  %v5937_v13 = vsub.f32 %v5026_v22, %v5142_v19 }
 0x257   : > { %3320 = vpow2.f32 %v2480_v59  ;;  %v2578_v39 = vrot.slane %v2577_v27, 2  ;;  %v1315_v35 = vsub.f32 %v5040_v12, %v5139_v54  ;;  %v1316_v43 = vsub.f32 %v5083_v51, %v5142_v19 }
 0x258   : > { %v1311_v31 = vmul.f32 1.442695, %v5936_v21  ;;  %v1313_v32 = vmul.f32 1.442695, %v5937_v13  ;;  %3322 = vpow2.f32 %v2530_v36  ;;  %v2573_v24 = vrot.slane %v2572_v46, 1 }
 0x259   : > { %v1323_v61 = vsub.f32 %v5100_v58, %v5139_v54  ;;  %v1324_v1 = vsub.f32 %v5104_v20, %v5142_v19  ;;  %3324 = vpow2.f32 %v2532_v34  ;;  %v2579_v40 = vmax.f32 %v2577_v27, %v2578_v39 }
 0x25a   : > { %v1317_v22 = vmul.f32 1.442695, %v1315_v35  ;;  %v1319_v53 = vmul.f32 1.442695, %v1316_v43  ;;  %v3307_v56 = vpop.eup %3306  ;;  %3326 = vpow2.f32 %v2534_v28  ;;  %v5292_v49 = vmax.f32 %v2572_v46, %v2573_v24 }
 0x25b   : > { %v1325_v12 = vmul.f32 1.442695, %v1323_v61  ;;  %v1327_v57 = vmul.f32 1.442695, %v1324_v1  ;;  %v3309_v33 = vpop.eup %3308  ;;  %3328 = vpow2.f32 %v2536_v52  ;;  %v2580_v51 = vrot.slane %v2579_v40, 1  ;;  %v5938_v61 = vld [vmem:[#allocation23_spill] sm:$0xff] }
 0x25c   : > { %v1331_v5 = vsub.f32 %v5123_v0, %v5139_v54  ;;  %v1332_v58 = vsub.f32 %v5130_v23, %v5142_v19  ;;  %v3311_v20 = vpop.eup %3310  ;;  %v2582_v9 = vsub.f32 %v5211_v62, %v5292_v49  ;;  %v2584_v59 = vsub.f32 %v5221_v42, %v5292_v49 }
 0x25d   : > { %3330 = vpow2.f32 %v1311_v31  ;;  %v1497_v45 = vrot.slane %v5148_v60, %v5018_v55  ;;  %v3313_v14 = vpop.eup %3312  ;;  %v2426_v37 = vadd.f32 %v3311_v20, %v3307_v56  ;;  %v5304_v4 = vmax.f32 %v2579_v40, %v2580_v51  ;;  %v5939_v56 = vld [vmem:[#allocation48_spill] sm:$0xff] }
 0x25e   : > { %3332 = vpow2.f32 %v1313_v32  ;;  %v1333_v0 = vmul.f32 1.442695, %v1331_v5  ;;  %v3315_v29 = vpop.eup %3314  ;;  %v2433_v25 = vadd.f32 %v3313_v14, %v3309_v33  ;;  %v2586_v23 = vmul.f32 1.442695, %v2582_v9 }
 0x25f   : > { %v2590_v36 = vmul.f32 1.442695, %v2584_v59  ;;  %3334 = vpow2.f32 %v1317_v22  ;;  %v3317_v28 = vpop.eup %3316  ;;  %v2427_v62 = vrot.slane %v2426_v37, 4  ;;  %v2583_v42 = vsub.f32 %v5216_v3, %v5304_v4 }
 0x260   : > { %v2585_v44 = vsub.f32 %v5224_v17, %v5304_v4  ;;  %3336 = vpow2.f32 %v1319_v53  ;;  %v3319_v60 = vpop.eup %3318  ;;  %v2434_v34 = vrot.slane %v2433_v25, 4  ;;  %v1335_v52 = vmul.f32 1.442695, %v1332_v58 }
 0x261   : > { %3338 = vpow2.f32 %v2586_v23  ;;  %v1504_v27 = vrot.slane %v1497_v45, %v5018_v55  ;;  %v3321_v46 = vpop.eup %3320  ;;  %v2428_v21 = vadd.f32 %v2427_v62, %v2426_v37  ;;  %v2482_v31 = vadd.f32 %v3319_v60, %v3315_v29 }
 0x262   : > { %v2588_v13 = vmul.f32 1.442695, %v2583_v42  ;;  %3340 = vpow2.f32 %v2590_v36  ;;  %v3323_v32 = vpop.eup %3322  ;;  %v2435_v39 = vadd.f32 %v2434_v34, %v2433_v25  ;;  %v2489_v35 = vadd.f32 %v3321_v46, %v3317_v28  ;;  %v5940_v42 = vld [vmem:[#allocation49_spill] sm:$0xff] }
 0x263   : > { %v2592_v3 = vmul.f32 1.442695, %v2585_v44  ;;  %3342 = vpow2.f32 %v1325_v12  ;;  %2871 = vst.msk [vmem:[%s5046_s16 + $0x1] ss:$4 sm:$0x3] %vm5006_vm0, %v1504_v27  ;;  %v3325_v17 = vpop.eup %3324  ;;  %v2429_v43 = vrot.slane %v2428_v21, 2  ;;  %v5316_v1 = vadd.f32 %v5938_v61, %v5031_v8 }
 0x264   : > { %v2483_v24 = vrot.slane %v2482_v31, 4  ;;  %3344 = vpow2.f32 %v2588_v13  ;;  %v3327_v40 = vpop.eup %3326  ;;  %v2436_v22 = vrot.slane %v2435_v39, 2  ;;  %v2490_v53 = vrot.slane %v2489_v35, 4  ;;  %v5941_v27 = vld [vmem:[#allocation50_spill] sm:$0xff] }
 0x265   : > { %3346 = vpow2.f32 %v2592_v3  ;;  %v5320_v33 = vadd.f32 %v5939_v56, %v5035_v47  ;;  %v3329_v12 = vpop.eup %3328  ;;  %v2430_v51 = vadd.f32 %v2429_v43, %v2428_v21  ;;  %v2538_v58 = vadd.f32 %v3327_v40, %v3323_v32  ;;  %v5942_v32 = vld [vmem:[#allocation55_spill] sm:$0xff]  ;;  %v5943_v43 = vld [vmem:[#allocation56_spill] sm:$0xff] }
 0x266   : > { %v2484_v5 = vadd.f32 %v2483_v24, %v2482_v31  ;;  %3348 = vpow2.f32 %v1327_v57  ;;  %v2437_v9 = vadd.f32 %v2436_v22, %v2435_v39  ;;  %v2491_v59 = vadd.f32 %v2490_v53, %v2489_v35 }
 0x267   : > { %v5322_v20 = vpop.eup %3330  ;;  %v2545_v45 = vadd.f32 %v3329_v12, %v3325_v17  ;;  %3350 = vpow2.f32 %v1333_v0  ;;  %v2431_v37 = vrot.slane %v2430_v51, 1  ;;  %v2539_v25 = vrot.slane %v2538_v58, 4 }
 0x268   : > { %v5324_v14 = vpop.eup %3332  ;;  %v2485_v29 = vrot.slane %v2484_v5, 2  ;;  %3352 = vpow2.f32 %v1335_v52  ;;  %v2438_v36 = vrot.slane %v2437_v9, 1  ;;  %v2492_v28 = vrot.slane %v2491_v59, 2 }
 0x269   : > { %v5326_v23 = vpop.eup %3334  ;;  %v2546_v62 = vrot.slane %v2545_v45, 4  ;;  %v5330_v57 = vadd.f32 %v5940_v42, %v5086_v38  ;;  %v2432_v60 = vadd.f32 %v2431_v37, %v2430_v51  ;;  %v2540_v0 = vadd.f32 %v2539_v25, %v2538_v58 }
 0x26a   : > { %v5332_v44 = vpop.eup %3336  ;;  %v2486_v34 = vadd.f32 %v2485_v29, %v2484_v5  ;;  %v5336_v46 = vadd.f32 %v5941_v27, %v5090_v6  ;;  %v2439_v52 = vadd.f32 %v2438_v36, %v2437_v9  ;;  %v2493_v31 = vadd.f32 %v2492_v28, %v2491_v59  ;;  %v5944_v5 = vld [vmem:[#allocation22_spill] sm:$0xff]  ;;  %v5946_v36 = vld [vmem:[#allocation53_spill] sm:$0xff]  ;;  %v5947_v28 = vld [vmem:[#allocation51_spill] sm:$0xff] }
 0x26b   : > { %v3339_v21 = vpop.eup %3338  ;;  %v2547_v13 = vadd.f32 %v2546_v62, %v2545_v45  ;;  %v5340_v39 = vadd.f32 %v5942_v32, %v5108_v63  ;;  %3354 = vlog2.f32 %v2432_v60  ;;  %v2541_v17 = vrot.slane %v2540_v0, 2  ;;  %v5945_v9 = vld [vmem:[#allocation42_spill] sm:$0xff] }
 0x26c   : > { %v3341_v35 = vpop.eup %3340  ;;  %v2487_v3 = vrot.slane %v2486_v34, 1  ;;  %v5344_v24 = vadd.f32 %v5943_v43, %v5112_v7  ;;  %3356 = vlog2.f32 %v2439_v52  ;;  %v2494_v40 = vrot.slane %v2493_v31, 1  ;;  %v5949_v43 = vld [vmem:[#allocation52_spill] sm:$0xff] }
 0x26d   : > { %v5346_v61 = vpop.eup %3342  ;;  %v2548_v22 = vrot.slane %v2547_v13, 2  ;;  %v2594_v53 = vadd.f32 %v3341_v35, %v3339_v21  ;;  %v2542_v51 = vadd.f32 %v2541_v17, %v2540_v0  ;;  %v1744_v58 = vmax.f32 %v5944_v5, %v5316_v1  ;;  %v5948_v17 = vld [vmem:[#allocation54_spill] sm:$0xff] }
 0x26e   : > { %v3345_v56 = vpop.eup %3344  ;;  %v2488_v12 = vadd.f32 %v2487_v3, %v2486_v34  ;;  %v1745_v59 = vmax.f32 %v5945_v9, %v5320_v33  ;;  %v2495_v37 = vadd.f32 %v2494_v40, %v2493_v31 }
 0x26f   : > { %v3347_v45 = vpop.eup %3346  ;;  %v2549_v29 = vadd.f32 %v2548_v22, %v2547_v13  ;;  %v2595_v25 = vrot.slane %v2594_v53, 4  ;;  %v2543_v60 = vrot.slane %v2542_v51, 1  ;;  %v1746_v34 = vmax.f32 %v1744_v58, %v5330_v57  ;;  %v5950_v58 = vld [vmem:[#allocation14_spill] sm:$0xff] }
 0x270   : > { %v5354_v42 = vpop.eup %3348  ;;  %3358 = vlog2.f32 %v2488_v12  ;;  %v2601_v27 = vadd.f32 %v3347_v45, %v3345_v56  ;;  %v1747_v32 = vmax.f32 %v1745_v59, %v5336_v46  ;;  %v5951_v45 = vld [vmem:[#allocation12_spill] sm:$0xff] }
 0x271   : > { %v5357_v0 = vpop.eup %3350  ;;  %3360 = vlog2.f32 %v2495_v37  ;;  %v2550_v21 = vrot.slane %v2549_v29, 1  ;;  %v2596_v52 = vadd.f32 %v2595_v25, %v2594_v53  ;;  %v2544_v13 = vadd.f32 %v2543_v60, %v2542_v51 }
 0x272   : > { %v5360_v31 = vpop.eup %3352  ;;  %v2602_v35 = vrot.slane %v2601_v27, 4  ;;  %v5363_v3 = vmax.f32 %v1746_v34, %v5340_v39  ;;  %v5368_v12 = vmax.f32 %v1747_v32, %v5344_v24  ;;  %v5372_v53 = vadd.f32 %v5951_v45, %v5950_v58 }
 0x273   : > { %v2551_v22 = vadd.f32 %v2550_v21, %v2549_v29  ;;  %v2597_v56 = vrot.slane %v2596_v52, 2  ;;  %3362 = vlog2.f32 %v2544_v13 }
 0x274   : > { %v2603_v59 = vadd.f32 %v2602_v35, %v2601_v27  ;;  %v1750_v51 = vsub.f32 %v5944_v5, %v5363_v3  ;;  %v1756_v37 = vsub.f32 %v5316_v1, %v5363_v3  ;;  %v1751_v29 = vsub.f32 %v5945_v9, %v5368_v12 }
 0x275   : > { %3364 = vlog2.f32 %v2551_v22  ;;  %v2598_v25 = vadd.f32 %v2597_v56, %v2596_v52  ;;  %v1757_v60 = vsub.f32 %v5320_v33, %v5368_v12  ;;  %v3355_v34 = vpop.eup %3354  ;;  %v1764_v27 = vsub.f32 %v5330_v57, %v5363_v3 }
 0x276   : > { %v2604_v21 = vrot.slane %v2603_v59, 2  ;;  %v1752_v32 = vmul.f32 1.442695, %v1750_v51  ;;  %v1758_v45 = vmul.f32 1.442695, %v1756_v37  ;;  %v3357_v13 = vpop.eup %3356  ;;  %v1765_v1 = vsub.f32 %v5336_v46, %v5368_v12 }
 0x277   : > { %v2441_v5 = vmul.f32 0.6931472, %v3355_v34  ;;  %v2599_v35 = vrot.slane %v2598_v25, 1  ;;  %v1754_v62 = vmul.f32 1.442695, %v1751_v29  ;;  %v1772_v46 = vsub.f32 %v5340_v39, %v5363_v3 }
 0x278   : > { %v2443_v52 = vmul.f32 0.6931472, %v3357_v13  ;;  %v2605_v22 = vadd.f32 %v2604_v21, %v2603_v59  ;;  %3366 = vpow2.f32 %v1752_v32  ;;  %v1760_v9 = vmul.f32 1.442695, %v1757_v60 }
 0x279   : > { %v2444_v33 = vadd.f32 %v2441_v5, %v5240_v2  ;;  %v2600_v56 = vadd.f32 %v2599_v35, %v2598_v25  ;;  %3368 = vpow2.f32 %v1754_v62  ;;  %v1766_v51 = vmul.f32 1.442695, %v1764_v27 }
 0x27a   : > { %v3359_v37 = vpop.eup %3358  ;;  %v2445_v40 = vadd.f32 %v2443_v52, %v5242_v30  ;;  %v2606_v57 = vrot.slane %v2605_v22, 1  ;;  %3370 = vpow2.f32 %v1758_v45  ;;  %v1768_v34 = vmul.f32 1.442695, %v1765_v1 }
 0x27b   : > { %v3361_v19 = vpop.eup %3360  ;;  %v2446_v29 = vadd.f32 -1.0000005e-06, %v2444_v33  ;;  %v2497_v54 = vmul.f32 0.6931472, %v3359_v37  ;;  %3372 = vlog2.f32 %v2600_v56  ;;  %v1773_v30 = vsub.f32 %v5344_v24, %v5368_v12  ;;  %v5955_v37 = vld [vmem:[#allocation24_spill] sm:$0xff] }
 0x27c   : > { %v2447_v59 = vadd.f32 -1.0000005e-06, %v2445_v40  ;;  %v2499_v60 = vmul.f32 0.6931472, %v3361_v19  ;;  %v2607_v21 = vadd.f32 %v2606_v57, %v2605_v22  ;;  %3374 = vpow2.f32 %v1760_v9 }
 0x27d   : > { %v2448_v2 = vsub.f32 %v2446_v29, %v5232_v41  ;;  %v2500_v62 = vadd.f32 %v2497_v54, %v5248_v18  ;;  %3376 = vpow2.f32 %v1766_v51  ;;  %v3363_v25 = vpop.eup %3362  ;;  %v1774_v27 = vmul.f32 1.442695, %v1772_v46  ;;  %v5954_v51 = vld [vmem:[#allocation13_spill] sm:$0xff] }
 0x27e   : > { %v2449_v32 = vsub.f32 %v2447_v59, %v5236_v15  ;;  %v2501_v45 = vadd.f32 %v2499_v60, %v5254_v10  ;;  %3378 = vlog2.f32 %v2607_v21  ;;  %v2553_v13 = vmul.f32 0.6931472, %v3363_v25  ;;  %v5957_v59 = vld [vmem:[#allocation17_spill] sm:$0xff] }
 0x27f   : > { %v3365_v39 = vpop.eup %3364  ;;  %v2450_v19 = vsub.f32 %v2448_v2, %v5234_v26  ;;  %v2502_v40 = vadd.f32 -1.0000005e-06, %v2500_v62  ;;  %3380 = vpow2.f32 %v1768_v34  ;;  %v1776_v1 = vmul.f32 1.442695, %v1773_v30  ;;  %v5958_v21 = vld [vmem:[#allocation45_spill] sm:$0xff] }
 0x280   : > { %v2451_v5 = vsub.f32 %v2449_v32, %v5238_v16  ;;  %v2503_v54 = vadd.f32 -1.0000005e-06, %v2501_v45  ;;  %v2555_v18 = vmul.f32 0.6931472, %v3365_v39  ;;  %3382 = vpow2.f32 %v1774_v27  ;;  %v5959_v32 = vld [vmem:[#allocation46_spill] sm:$0xff]  ;;  %v5960_v27 = vld [vmem:[#allocation43_spill] sm:$0xff] }
 0x281   : > { %v2504_v24 = vsub.f32 %v2502_v40, %v5232_v41  ;;  %v2556_v35 = vadd.f32 %v2553_v13, %v5264_v48  ;;  %v5952_v10 = vsub.f32 %v5949_v43, %v5948_v17  ;;  %v5953_v52 = vsub.f32 %v5947_v28, %v5946_v36  ;;  %v5956_v48 = vld [vmem:[#allocation47_spill] sm:$0xff] }
 0x282   : > { %v5406_v9 = vpop.eup %3366  ;;  %v2505_v33 = vsub.f32 %v2503_v54, %v5236_v15  ;;  %v2557_v56 = vadd.f32 %v2555_v18, %v5266_v50  ;;  %v5412_v57 = vadd.f32 %v5955_v37, %v5954_v51  ;;  %v2180_v34 = vadd.f32 %v5956_v48, %v5031_v8  ;;  %v5961_v18 = vld [vmem:[#allocation44_spill] sm:$0xff] }
 0x283   : > { %v1932_v22 = vcombine.low %v5953_v52, %v5952_v10  ;;  %v5416_v29 = vpop.eup %3368  ;;  %v2506_v17 = vsub.f32 %v2504_v24, %v5234_v26  ;;  %v2558_v43 = vadd.f32 -1.0000005e-06, %v2556_v35  ;;  %3384 = vpow2.f32 %v1776_v1 }
 0x284   : > { %v5420_v28 = vpop.eup %3370  ;;  %v2507_v46 = vsub.f32 %v2505_v33, %v5238_v16  ;;  %v2559_v50 = vadd.f32 -1.0000005e-06, %v2557_v56  ;;  %v2181_v60 = vadd.f32 %v5957_v59, %v5035_v47  ;;  %v2182_v2 = vadd.f32 %v5958_v21, %v5086_v38 }
 0x285   : > { %v1939_v36 = vrot.slane %v1932_v22, %v5018_v55  ;;  %v3373_v62 = vpop.eup %3372  ;;  %v2560_v30 = vsub.f32 %v2558_v43, %v5232_v41  ;;  %v2183_v45 = vadd.f32 %v5959_v32, %v5090_v6  ;;  %v2184_v39 = vadd.f32 %v5960_v27, %v5108_v63 }
 0x286   : > { %v5433_v40 = vpop.eup %3374  ;;  %v2561_v13 = vsub.f32 %v2559_v50, %v5236_v15  ;;  %v2609_v54 = vmul.f32 0.6931472, %v3373_v62  ;;  %v2185_v24 = vadd.f32 %v5961_v18, %v5112_v7  ;;  %v2186_v35 = vmax.f32 %v5372_v53, %v2180_v34 }
 0x287   : > { %v1946_v25 = vrot.slane %v1939_v36, %v5018_v55  ;;  %v5439_v1 = vpop.eup %3376  ;;  %v2562_v10 = vsub.f32 %v2560_v30, %v5234_v26  ;;  %v2187_v52 = vmax.f32 %v5412_v57, %v2181_v60  ;;  %v2370_v22 = vsub.f32 %v5232_v41, %v5234_v26 }
 0x288   : > { %v2371_v33 = vsub.f32 %v5236_v15, %v5238_v16  ;;  %v3379_v56 = vpop.eup %3378  ;;  %v2563_v37 = vsub.f32 %v2561_v13, %v5238_v16  ;;  %v2612_v48 = vadd.f32 %v2609_v54, %v5292_v49  ;;  %v2188_v43 = vmax.f32 %v2186_v35, %v2182_v2 }
 0x289   : > { %2873 = vst.msk [vmem:[%s5046_s16 + $0x2] ss:$4 sm:$0x3] %vm5006_vm0, %v1946_v25  ;;  %v5453_v36 = vadd.f32 %v2450_v19, %v5950_v58  ;;  %v5455_v50 = vpop.eup %3380  ;;  %v2611_v59 = vmul.f32 0.6931472, %v3379_v56  ;;  %v2189_v21 = vmax.f32 %v2187_v52, %v2183_v45  ;;  %v5458_v30 = vadd.f32 %v2451_v5, %v5954_v51 }
 0x28a   : > { %v2374_v62 = vcombine.low %v2370_v22, %v2371_v33  ;;  %v5460_v25 = vpop.eup %3382  ;;  %v2614_v32 = vadd.f32 -1.0000005e-06, %v2612_v48  ;;  %v5462_v27 = vmax.f32 %v2188_v43, %v2184_v39  ;;  %v5465_v49 = vadd.f32 %v2506_v17, %v5031_v8 }
 0x28b   : > { %v5468_v58 = vadd.f32 %v2507_v46, %v5035_v47  ;;  %v2613_v19 = vadd.f32 %v2611_v59, %v5304_v4  ;;  %v5471_v13 = vmax.f32 %v2189_v21, %v2185_v24  ;;  %v5475_v51 = vadd.f32 %v2562_v10, %v5086_v38 }
 0x28c   : > { %v2381_v5 = vrot.slane %v2374_v62, %v5018_v55  ;;  %v2616_v54 = vsub.f32 %v2614_v32, %v5232_v41  ;;  %v2192_v18 = vsub.f32 %v5372_v53, %v5462_v27  ;;  %v2198_v8 = vsub.f32 %v2180_v34, %v5462_v27 }
 0x28d   : > { %v2206_v17 = vsub.f32 %v2182_v2, %v5462_v27  ;;  %v5482_v47 = vpop.eup %3384  ;;  %v2615_v46 = vadd.f32 -1.0000005e-06, %v2613_v19  ;;  %v2193_v4 = vsub.f32 %v5412_v57, %v5471_v13  ;;  %v2199_v35 = vsub.f32 %v2181_v60, %v5471_v13 }
 0x28e   : > { %v2207_v38 = vsub.f32 %v2183_v45, %v5471_v13  ;;  %v2618_v41 = vsub.f32 %v2616_v54, %v5234_v26  ;;  %v2194_v10 = vmul.f32 1.442695, %v2192_v18  ;;  %v2200_v53 = vmul.f32 1.442695, %v2198_v8 }
 0x28f   : > { %v2208_v52 = vmul.f32 1.442695, %v2206_v17  ;;  %v2617_v34 = vsub.f32 %v2615_v46, %v5236_v15  ;;  %v2196_v2 = vmul.f32 1.442695, %v2193_v4  ;;  %v2202_v22 = vmul.f32 1.442695, %v2199_v35 }
 0x290   : > { %v2210_v33 = vmul.f32 1.442695, %v2207_v38  ;;  %3386 = vpow2.f32 %v2194_v10  ;;  %v2214_v57 = vsub.f32 %v2184_v39, %v5462_v27  ;;  %v2215_v60 = vsub.f32 %v2185_v24, %v5471_v13 }
 0x291   : > { %v2388_v45 = vrot.slane %v2381_v5, %v5018_v55  ;;  %v2619_v26 = vsub.f32 %v2617_v34, %v5238_v16  ;;  %3388 = vpow2.f32 %v2196_v2  ;;  %v5504_v15 = vadd.f32 %v2563_v37, %v5090_v6 }
 0x292   : > { %v5507_v39 = vadd.f32 %v2618_v41, %v5108_v63  ;;  %3390 = vpow2.f32 %v2200_v53  ;;  %v2216_v24 = vmul.f32 1.442695, %v2214_v57  ;;  %v2218_v56 = vmul.f32 1.442695, %v2215_v60 }
 0x293   : > { %2875 = vst.msk [vmem:[%s5046_s16 + $0x3] ss:$4 sm:$0x3] %vm5006_vm0, %v2388_v45  ;;  %v2628_v48 = vmax.f32 %v5453_v36, %v5465_v49  ;;  %3392 = vpow2.f32 %v2202_v22  ;;  %v5515_v16 = vadd.f32 %v2619_v26, %v5112_v7  ;;  %v2629_v6 = vmax.f32 %v5458_v30, %v5468_v58 }
 0x294   : > { %3479 = shalt.err (!%p3476_p13)
}
 0x295   : > { %s3480_s26 = scalar_lea.hbm %s5498_s12, 128  ;;  %s3484_s19 = scalar_lea.hbm %s5661_s5, 256 }
 0x296   : > { %p3481_p1 = scmp.ne.s32.totalorder %s5498_s12, %s3480_s26  ;;  %p3485_p9 = scmp.lt.u32.totalorder %s5498_s12, %s5661_s5 }
 0x297   : > { %p3486_p10 = scmp.lt.u32.totalorder %s3484_s19, %s3480_s26  ;;  %p3488_p11 = scmp.lt.u32.totalorder %s3480_s26, %s5498_s12 }
 0x298   : > { %p3482_p2 = pnand %p3481_p1, %p5962_p0 }
 0x299   : > { %p3487_p6 = por %p3486_p10, %p3485_p9 }
 0x29a   : > { %p3483_p5 = pneg %p3482_p2 }
 0x29b   : > { %p3489_p3 = por %p3488_p11, %p3487_p6 }
 0x29d   : > { %p3490_p4 = pnand %p3489_p3, %p3483_p5 }
 0x29f   : > { %3493 = shalt.err (!%p3490_p4)
}
 0x2a0   : > { %2892 = dma.vmem_to_hbm [thread:$0]  (%p5962_p0), %s5500_s20, 128, %s5498_s12, %s2691_s14   ;;  %v1321_v63 = vadd.f32 %v5326_v23, %v5322_v20  ;;  %3394 = vpow2.f32 %v2208_v52  ;;  %v2630_v7 = vmax.f32 %v2628_v48, %v5475_v51  ;;  %v1322_v37 = vadd.f32 %v5332_v44, %v5324_v14 }
 0x2a1   : > { %v1762_v43 = vadd.f32 %v5420_v28, %v5406_v9  ;;  %3396 = vpow2.f32 %v2210_v33  ;;  %v2631_v59 = vmax.f32 %v2629_v6, %v5504_v15  ;;  %v1763_v62 = vadd.f32 %v5433_v40, %v5416_v29  ;;  %s369_s20 = scalar_lea.vmem [#allocation7], %s4989_s18  ;;  %s2887_s18 = sshll.u32 %s3633_s25, 5 }
 0x2a2   : > { %v1329_v21 = vadd.f32 %v5346_v61, %v1321_v63  ;;  %3398 = vpow2.f32 %v2216_v24  ;;  %v5553_v20 = vmax.f32 %v2630_v7, %v5507_v39  ;;  %v1330_v23 = vadd.f32 %v5354_v42, %v1322_v37  ;;  %s2723_s12 = sshll.u32 %s369_s20, 4  ;;  %s5607_s8 = scalar_lea.hbm %s5662_s6, %s2887_s18  ;;  %s5609_s12 = int_to_ptr.vmem [resolvable:$true] %s2723_s12 }
 0x2a3   : > { %v1770_v32 = vadd.f32 %v5439_v1, %v1762_v43  ;;  %3400 = vpow2.f32 %v2218_v56  ;;  %v5558_v14 = vmax.f32 %v2631_v59, %v5515_v16  ;;  %v1771_v9 = vadd.f32 %v5455_v50, %v1763_v62  ;;  %v3387_v50 = vpop.eup %3386  ;;  %s2696_s25 = scalar_lea.sflag [#allocation8], %s3717_s7  ;;  %s3494_s15 = scalar_lea.vmem %s5609_s12, 128 }
 0x2a4   : > { %v1337_v44 = vadd.f32 %v5357_v0, %v1329_v21  ;;  %v2634_v61 = vsub.f32 %v5453_v36, %v5553_v20  ;;  %v2640_v29 = vsub.f32 %v5465_v49, %v5553_v20  ;;  %v2648_v28 = vsub.f32 %v5475_v51, %v5553_v20  ;;  %v3389_v51 = vpop.eup %3388  ;;  %p3495_p7 = scmp.ne.s32.totalorder %s5609_s12, %s3494_s15  ;;  %s3573_s17 = smov [#allocation7]  }
 0x2a5   : > { %v2656_v42 = vsub.f32 %v5507_v39, %v5553_v20  ;;  %v2635_v40 = vsub.f32 %v5458_v30, %v5558_v14  ;;  %v2641_v0 = vsub.f32 %v5468_v58, %v5558_v14  ;;  %v2649_v1 = vsub.f32 %v5504_v15, %v5558_v14  ;;  %v3391_v8 = vpop.eup %3390  ;;  %v5963_v15 = vld [vmem:[#allocation16_spill] sm:$0xff]  ;;  %s3498_s26 = sshll.u32 %s3573_s17, 4  ;;  %s3499_s26 = int_to_ptr.vmem [resolvable:$false] %s3498_s26 }
 0x2a6   : > { %v2657_v36 = vsub.f32 %v5515_v16, %v5558_v14  ;;  %v2636_v49 = vmul.f32 1.442695, %v2634_v61  ;;  %v2642_v19 = vmul.f32 1.442695, %v2640_v29  ;;  %v1338_v5 = vadd.f32 %v5360_v31, %v1330_v23  ;;  %v3393_v17 = vpop.eup %3392  ;;  %v5964_v29 = vld [vmem:[#allocation15_spill] sm:$0xff]  ;;  %p3496_p8 = pnand %p3495_p7, %p5962_p0  ;;  %s3500_s11 = scalar_lea.vmem %s3499_s26, 256 }
 0x2a7   : > { %v2638_v54 = vmul.f32 1.442695, %v2635_v40  ;;  %v2644_v18 = vmul.f32 1.442695, %v2641_v0  ;;  %3402 = vlog2.f32 %v1337_v44  ;;  %v2650_v30 = vmul.f32 1.442695, %v2648_v28  ;;  %p3501_p13 = scmp.lt.s32.totalorder %s5609_s12, %s3499_s26  ;;  %p3502_p1 = scmp.lt.s32.totalorder %s3500_s11, %s3494_s15 }
 0x2a8   : > { %3404 = vpow2.f32 %v2636_v49  ;;  %v1778_v58 = vadd.f32 %v5460_v25, %v1770_v32  ;;  %v2652_v46 = vmul.f32 1.442695, %v2649_v1  ;;  %v1779_v4 = vadd.f32 %v5482_v47, %v1771_v9  ;;  %p3497_p12 = pneg %p3496_p8 }
 0x2a9   : > { %3406 = vpow2.f32 %v2638_v54  ;;  %v2204_v35 = vadd.f32 %v3391_v8, %v3387_v50  ;;  %v2658_v41 = vmul.f32 1.442695, %v2656_v42  ;;  %v2205_v10 = vadd.f32 %v3393_v17, %v3389_v51  ;;  %p3503_p2 = por %p3502_p1, %p3501_p13 }
 0x2aa   : > { %v3395_v38 = vpop.eup %3394  ;;  %3408 = vpow2.f32 %v2642_v19  ;;  %v2660_v53 = vmul.f32 1.442695, %v2657_v36 }
 0x2ab   : > { %v3397_v31 = vpop.eup %3396  ;;  %3410 = vpow2.f32 %v2644_v18  ;;  %v2212_v52 = vadd.f32 %v3395_v38, %v2204_v35  ;;  %p3504_p5 = pnand %p3503_p2, %p3497_p12 }
 0x2ac   : > { %v3399_v34 = vpop.eup %3398  ;;  %3412 = vpow2.f32 %v2650_v30  ;;  %v2213_v2 = vadd.f32 %v3397_v31, %v2205_v10 }
 0x2ad   : > { %v3401_v22 = vpop.eup %3400  ;;  %3414 = vpow2.f32 %v2652_v46  ;;  %v2220_v25 = vadd.f32 %v3399_v34, %v2212_v52 }
 0x2ae   : > { %3416 = vpow2.f32 %v2658_v41  ;;  %v2221_v33 = vadd.f32 %v3401_v22, %v2213_v2 }
 0x2af   : > { %3418 = vpow2.f32 %v2660_v53 }
 0x2b0   : > { %3420 = vlog2.f32 %v1338_v5 }
 0x2b1   : > { %v3403_v47 = vpop.eup %3402  ;;  %3422 = vlog2.f32 %v1778_v58 }
 0x2b2   : > { %v3405_v57 = vpop.eup %3404  ;;  %v1340_v60 = vmul.f32 0.6931472, %v3403_v47  ;;  %3424 = vlog2.f32 %v1779_v4 }
 0x2b3   : > { %v3407_v45 = vpop.eup %3406  ;;  %3426 = vlog2.f32 %v2220_v25 }
 0x2b4   : > { %v3409_v26 = vpop.eup %3408  ;;  %v1343_v39 = vadd.f32 %v1340_v60, %v5963_v15  ;;  %3428 = vlog2.f32 %v2221_v33 }
 0x2b5   : > { %v3411_v24 = vpop.eup %3410  ;;  %v2646_v56 = vadd.f32 %v3409_v26, %v3405_v57 }
 0x2b6   : > { %v3413_v48 = vpop.eup %3412  ;;  %v2647_v16 = vadd.f32 %v3411_v24, %v3407_v45 }
 0x2b7   : > { %v3415_v6 = vpop.eup %3414  ;;  %v2654_v63 = vadd.f32 %v3413_v48, %v2646_v56 }
 0x2b8   : > { %v3417_v7 = vpop.eup %3416  ;;  %v2655_v37 = vadd.f32 %v3415_v6, %v2647_v16 }
 0x2b9   : > { %v3419_v43 = vpop.eup %3418  ;;  %v2662_v59 = vadd.f32 %v3417_v7, %v2654_v63 }
 0x2ba   : > { %v3421_v21 = vpop.eup %3420  ;;  %v2663_v62 = vadd.f32 %v3419_v43, %v2655_v37 }
 0x2bb   : > { %v3423_v23 = vpop.eup %3422  ;;  %v1342_v32 = vmul.f32 0.6931472, %v3421_v21  ;;  %3430 = vlog2.f32 %v2662_v59 }
 0x2bc   : > { %v3425_v44 = vpop.eup %3424  ;;  %v1781_v9 = vmul.f32 0.6931472, %v3423_v23  ;;  %3432 = vlog2.f32 %v2663_v62 }
 0x2bd   : > { %v3427_v61 = vpop.eup %3426  ;;  %v1344_v28 = vadd.f32 %v1342_v32, %v5964_v29  ;;  %v1783_v42 = vmul.f32 0.6931472, %v3425_v44 }
 0x2be   : > { %v3429_v40 = vpop.eup %3428  ;;  %v1784_v0 = vadd.f32 %v1781_v9, %v5363_v3  ;;  %v2223_v1 = vmul.f32 0.6931472, %v3427_v61 }
 0x2bf   : > { %v1347_v36 = vcombine.low %v1343_v39, %v1344_v28  ;;  %v1785_v50 = vadd.f32 %v1783_v42, %v5368_v12  ;;  %v2225_v49 = vmul.f32 0.6931472, %v3429_v40 }
 0x2c0   : > { %v2226_v19 = vadd.f32 %v2223_v1, %v5462_v27 }
 0x2c1   : > { %v1354_v5 = vrot.slane %v1347_v36, %v5018_v55  ;;  %v1788_v51 = vcombine.low %v1784_v0, %v1785_v50  ;;  %v2227_v54 = vadd.f32 %v2225_v49, %v5471_v13 }
 0x2c3   : > { %v1361_v18 = vrot.slane %v1354_v5, %v5018_v55  ;;  %v1795_v8 = vrot.slane %v1788_v51, %v5018_v55  ;;  %v2230_v30 = vcombine.low %v2226_v19, %v2227_v54 }
 0x2c5   : > { %v3431_v58 = vpop.eup %3430  ;;  %1363 = vst.msk [vmem:[%s369_s20] sm:$0x3] %vm5006_vm0, %v1361_v18  ;;  %v1802_v3 = vrot.slane %v1795_v8, %v5018_v55  ;;  %v2237_v12 = vrot.slane %v2230_v30, %v5018_v55 }
 0x2c6   : > { %v3433_v27 = vpop.eup %3432  ;;  %v2665_v17 = vmul.f32 0.6931472, %v3431_v58 }
 0x2c7   : > { %2872 = vst.msk [vmem:[%s369_s20 + $0x2] sm:$0x3] %vm5006_vm0, %v1802_v3  ;;  %v2244_v13 = vrot.slane %v2237_v12, %v5018_v55  ;;  %v2667_v46 = vmul.f32 0.6931472, %v3433_v27 }
 0x2c8   : > { %v2668_v4 = vadd.f32 %v2665_v17, %v5553_v20 }
 0x2c9   : > { %2874 = vst.msk [vmem:[%s369_s20 + $0x4] sm:$0x3] %vm5006_vm0, %v2244_v13  ;;  %v2669_v35 = vadd.f32 %v2667_v46, %v5558_v14 }
 0x2cb   : > { %v2672_v38 = vcombine.low %v2668_v4, %v2669_v35 }
 0x2cd   : > { %v2679_v41 = vrot.slane %v2672_v38, %v5018_v55 }
 0x2cf   : > { %v2686_v20 = vrot.slane %v2679_v41, %v5018_v55 }
 0x2d1   : > { %2876 = vst.msk [vmem:[%s369_s20 + $0x6] sm:$0x3] %vm5006_vm0, %v2686_v20 }
 0x2d2   : > { %3507 = shalt.err (!%p3504_p5)
}
 0x2d3   : > { %s3508_s16 = scalar_lea.hbm %s5607_s8, 128  ;;  %s3512_s29 = scalar_lea.hbm %s5662_s6, 256 }
 0x2d4   : > { %p3509_p9 = scmp.ne.s32.totalorder %s5607_s8, %s3508_s16  ;;  %p3513_p11 = scmp.lt.u32.totalorder %s5607_s8, %s5662_s6 }
 0x2d5   : > { %p3514_p3 = scmp.lt.u32.totalorder %s3512_s29, %s3508_s16  ;;  %p3516_p7 = scmp.lt.u32.totalorder %s3508_s16, %s5607_s8 }
 0x2d6   : > { %p3510_p10 = pnand %p3509_p9, %p5962_p0 }
 0x2d7   : > { %p3515_p4 = por %p3514_p3, %p3513_p11 }
 0x2d8   : > { %p3511_p6 = pneg %p3510_p10 }
 0x2d9   : > { %p3517_p8 = por %p3516_p7, %p3515_p4 }
 0x2db   : > { %p3518_p12 = pnand %p3517_p8, %p3511_p6 }
 0x2dd   : > { %3521 = shalt.err (!%p3518_p12)
}
 0x2de   : > { %s3574_s14 = smov 32   ;;  %s3575_s13 = smov 64  }
 0x2df   : > { %s3576_s15 = smov 2  }
 0x2e0   : > { %2893 = dma.vmem_to_hbm [thread:$0]  (%p5962_p0), %s5609_s12, 128, %s5607_s8, %s2696_s25, %s3574_s14, %s3575_s13, %s3576_s15  }
 0x2e1 PF: > { %s2738_s17 = sand.u32 1, %s3552_s21   ;;  %p5965_p13 = scmp.ne.s32.totalorder %s5758_s10, 0 }
 0x2e2   : > { %p5966_p1 = scmp.ge.s32.totalorder %s3564_s24, 2  ;;  %s2739_s26 = scalar_lea.sflag [#allocation4], %s2738_s17 }
 0x2e4   : > { %p2897_p2 = pnand %p5966_p1, %p5965_p13 }
 0x2e6   : > { %3543 = dma.done.wait (!%p2897_p2), %s2739_s26, 128  }
 0x2e7   : > { %3545 = vsyncadd (!%p2897_p2), %s2739_s26, 4294967168  ;;  %s2748_s11 = scalar_lea.sflag [#allocation8], %s2738_s17 }
 0x2e8   : > { %3547 = dma.done.wait (!%p2897_p2), %s2748_s11, 128  }
 0x2e9   : > { %3549 = vsyncadd (!%p2897_p2), %s2748_s11, 4294967168  ;;  %p23_p0 = scmp.ge.s32.totalorder %s3637_s27, 4   ;;  %s5967_s21 = smov %s3556_s22 }
 0x2ea   : > { %s5968_s22 = smov %s3560_s23  ;;  %s5969_s23 = smov %s3649_s30 }
 0x2eb   : > { %s5970_s24 = smov %s3637_s27  ;;  %25 = sbr.rel (!%p23_p0) target bundleno = 7 (0x7), region = 160 }
 0x2f2   :  { %2753 = vsyncpa [#allocation3], 1 }
 0x2f3   :  { %2755 = vsyncpa [#allocation3 + $0x1], 1 }
 0x2f4   :  { %2756 = vsyncpa [#allocation4], 1 }
 0x2f5   :  { %2758 = vsyncpa [#allocation4 + $0x1], 1 }
 0x2f6   :  { %2759 = vsyncpa [#allocation8], 1 }
 0x2f7   :  { %2761 = vsyncpa [#allocation8 + $0x1], 1 }

</bundles_post_ra>
